<compile_context>
chip_gen: v5e
topology: v5e:2x2
jax: 0.10.0
libtpu: 0.0.40
codegen_flags: <defaults>
</compile_context>

<pallas_src>
import functools

import jax
import jax.numpy as jnp
from jax.experimental import pallas as pl
from jax.experimental.pallas import tpu as pltpu

N_BITS = 8
QMAX = float(2 ** (N_BITS - 1) - 1)   # 127 (symmetric 8-bit)
EPS = 1e-8
VMEM_LIMIT = 32 * 1024 * 1024


def _act_scale(x):
    """Per-tensor symmetric activation scale.  Global reduce is done by XLA (HBM roofline),
    deliberately NOT inside the tiled kernels (per-tile maxima would change numerics)."""
    return jnp.maximum(jnp.max(jnp.abs(x)) / QMAX, EPS)


def _quant_codes(x, inv_s):
    """Integer codes round(x / s), clipped, carried as bf16 (exact for |code| <= 127)."""
    return jnp.clip(jnp.round(x * inv_s), -QMAX, QMAX).astype(jnp.bfloat16)


# ---------------------------------------------------------------------------------------------
# Kernel 1: fused (activation fake-quant -> KhxKw conv with BN folded -> bias -> ReLU), row-tiled
# ---------------------------------------------------------------------------------------------
def _conv_bn_relu_kernel(inv_s_ref, xp_ref, w_ref, cscale_ref, bias_ref, y_ref,
                         *, kh, kw, tile_h):
    # inv_s_ref  : (1,)                 f32  SMEM   1 / s_act (input activation scale)
    # xp_ref     : (1, Hp, Wp, Cin)     f32  VMEM   zero-padded input image (one batch element)
    # w_ref      : (kh*kw, Cin, Cout)   bf16 VMEM   per-tap BN-folded weight codes
    # cscale_ref : (1, Cout)            f32  VMEM   s_act * s_w per output channel
    # bias_ref   : (1, Cout)            f32  VMEM   BN-folded bias
    # y_ref      : (1, tile_h, W, Cout) f32  VMEM   un-quantized ReLU output (row tile)
    t = pl.program_id(1)
    w_out = y_ref.shape[2]
    cin = xp_ref.shape[3]
    cout = y_ref.shape[3]

    row0 = pl.multiple_of(t * tile_h, tile_h)
    x = xp_ref[0, pl.ds(row0, tile_h + kh - 1), :, :]        # (tile_h+kh-1, Wp, Cin)

    inv_s = inv_s_ref[0]
    codes = _quant_codes(x, inv_s)                           # padding zeros stay exactly zero

    m = tile_h * w_out
    acc = jnp.zeros((m, cout), jnp.float32)
    for dh in range(kh):                                     # static taps -> per-tap MXU matmuls
        for dw in range(kw):
            tap = codes[dh:dh + tile_h, dw:dw + w_out, :].reshape(m, cin)
            acc = acc + jnp.dot(tap, w_ref[dh * kw + dw],
                                preferred_element_type=jnp.float32)

    # f32 epilogue: rescale quantized-domain accumulator, add folded bias, ReLU.
    out = jnp.maximum(acc * cscale_ref[...] + bias_ref[...], 0.0)
    y_ref[...] = out.reshape(1, tile_h, w_out, cout)


def _conv_bn_relu_stage(x_nhwc, s_act, p):
    b, h, w, cin = x_nhwc.shape
    kh, kw, ph, pw = p["kh"], p["kw"], p["ph"], p["pw"]
    cout = p["bias"].shape[1]

    xp = jnp.pad(x_nhwc, ((0, 0), (ph, ph), (pw, pw), (0, 0)))
    hp, wp = h + 2 * ph, w + 2 * pw
    h_out, w_out = hp - kh + 1, wp - kw + 1

    tile_h = min(8, h_out)
    assert h_out % tile_h == 0
    grid = (b, h_out // tile_h)

    inv_s = jnp.reshape(1.0 / s_act, (1,)).astype(jnp.float32)
    cscale = (s_act * p["w_scale"]).reshape(1, cout).astype(jnp.float32)

    kernel = functools.partial(_conv_bn_relu_kernel, kh=kh, kw=kw, tile_h=tile_h)
    return pl.pallas_call(
        kernel,
        out_shape=jax.ShapeDtypeStruct((b, h_out, w_out, cout), jnp.float32),
        grid=grid,
        in_specs=[
            pl.BlockSpec(memory_space=pltpu.MemorySpace.SMEM),                    # inv_s
            pl.BlockSpec((1, hp, wp, cin), lambda bi, ti: (bi, 0, 0, 0)),         # padded input
            pl.BlockSpec((kh * kw, cin, cout), lambda bi, ti: (0, 0, 0)),         # weight codes
            pl.BlockSpec((1, cout), lambda bi, ti: (0, 0)),                       # s_act * s_w
            pl.BlockSpec((1, cout), lambda bi, ti: (0, 0)),                       # folded bias
        ],
        out_specs=pl.BlockSpec((1, tile_h, w_out, cout), lambda bi, ti: (bi, ti, 0, 0)),
        compiler_params=pltpu.CompilerParams(
            dimension_semantics=("parallel", "arbitrary"),
            vmem_limit_bytes=VMEM_LIMIT),
    )(inv_s, xp, p["w_codes"], cscale, p["bias"])


# ---------------------------------------------------------------------------------------------
# Kernel 2: fused dual branch — 1x3 conv and 3x1 conv share one quantized input read
# ---------------------------------------------------------------------------------------------
def _dual_conv_kernel(inv_s_ref, xp_ref, w13_ref, w31_ref,
                      cs13_ref, b13_ref, cs31_ref, b31_ref,
                      y1_ref, y2_ref, *, tile_h):
    # xp_ref: (1, H+2, W+2, C) padded once for both branches (each uses only its own halo).
    t = pl.program_id(1)
    w_out = y1_ref.shape[2]
    c = xp_ref.shape[3]

    row0 = pl.multiple_of(t * tile_h, tile_h)
    x = xp_ref[0, pl.ds(row0, tile_h + 2), :, :]             # (tile_h+2, W+2, C)
    codes = _quant_codes(x, inv_s_ref[0])

    m = tile_h * w_out
    acc1 = jnp.zeros((m, c), jnp.float32)                    # conv1x3: padding (0, 1)
    for dw in range(3):
        tap = codes[1:1 + tile_h, dw:dw + w_out, :].reshape(m, c)
        acc1 = acc1 + jnp.dot(tap, w13_ref[dw], preferred_element_type=jnp.float32)

    acc2 = jnp.zeros((m, c), jnp.float32)                    # conv3x1: padding (1, 0)
    for dh in range(3):
        tap = codes[dh:dh + tile_h, 1:1 + w_out, :].reshape(m, c)
        acc2 = acc2 + jnp.dot(tap, w31_ref[dh], preferred_element_type=jnp.float32)

    y1 = jnp.maximum(acc1 * cs13_ref[...] + b13_ref[...], 0.0)
    y2 = jnp.maximum(acc2 * cs31_ref[...] + b31_ref[...], 0.0)
    y1_ref[...] = y1.reshape(1, tile_h, w_out, c)
    y2_ref[...] = y2.reshape(1, tile_h, w_out, c)


def _dual_conv_stage(x_nhwc, s_act, p13, p31):
    b, h, w, c = x_nhwc.shape
    xp = jnp.pad(x_nhwc, ((0, 0), (1, 1), (1, 1), (0, 0)))

    tile_h = min(8, h)
    assert h % tile_h == 0
    grid = (b, h // tile_h)

    inv_s = jnp.reshape(1.0 / s_act, (1,)).astype(jnp.float32)
    cs13 = (s_act * p13["w_scale"]).reshape(1, c).astype(jnp.float32)
    cs31 = (s_act * p31["w_scale"]).reshape(1, c).astype(jnp.float32)

    kernel = functools.partial(_dual_conv_kernel, tile_h=tile_h)
    out_spec = pl.BlockSpec((1, tile_h, w, c), lambda bi, ti: (bi, ti, 0, 0))
    return pl.pallas_call(
        kernel,
        out_shape=(jax.ShapeDtypeStruct((b, h, w, c), jnp.float32),
                   jax.ShapeDtypeStruct((b, h, w, c), jnp.float32)),
        grid=grid,
        in_specs=[
            pl.BlockSpec(memory_space=pltpu.MemorySpace.SMEM),                    # inv_s
            pl.BlockSpec((1, h + 2, w + 2, c), lambda bi, ti: (bi, 0, 0, 0)),
            pl.BlockSpec((3, c, c), lambda bi, ti: (0, 0, 0)),                    # w 1x3
            pl.BlockSpec((3, c, c), lambda bi, ti: (0, 0, 0)),                    # w 3x1
            pl.BlockSpec((1, c), lambda bi, ti: (0, 0)),
            pl.BlockSpec((1, c), lambda bi, ti: (0, 0)),
            pl.BlockSpec((1, c), lambda bi, ti: (0, 0)),
            pl.BlockSpec((1, c), lambda bi, ti: (0, 0)),
        ],
        out_specs=(out_spec, out_spec),
        compiler_params=pltpu.CompilerParams(
            dimension_semantics=("parallel", "arbitrary"),
            vmem_limit_bytes=VMEM_LIMIT),
    )(inv_s, xp, p13["w_codes"], p31["w_codes"], cs13, p13["bias"], cs31, p31["bias"])


# ---------------------------------------------------------------------------------------------
# Kernel 3: final q_rescaling_activ (fake-quant with a precomputed global scale), row-tiled
# ---------------------------------------------------------------------------------------------
def _requant_kernel(s_ref, inv_s_ref, x_ref, y_ref):
    codes = jnp.clip(jnp.round(x_ref[...] * inv_s_ref[0]), -QMAX, QMAX)
    y_ref[...] = codes * s_ref[0]


def _requant_stage(x_nhwc, s_act):
    b, h, w, c = x_nhwc.shape
    tile_h = min(8, h)
    assert h % tile_h == 0
    grid = (b, h // tile_h)
    s = jnp.reshape(s_act, (1,)).astype(jnp.float32)
    inv_s = jnp.reshape(1.0 / s_act, (1,)).astype(jnp.float32)
    blk = pl.BlockSpec((1, tile_h, w, c), lambda bi, ti: (bi, ti, 0, 0))
    return pl.pallas_call(
        _requant_kernel,
        out_shape=jax.ShapeDtypeStruct((b, h, w, c), jnp.float32),
        grid=grid,
        in_specs=[
            pl.BlockSpec(memory_space=pltpu.MemorySpace.SMEM),
            pl.BlockSpec(memory_space=pltpu.MemorySpace.SMEM),
            blk,
        ],
        out_specs=blk,
        compiler_params=pltpu.CompilerParams(
            dimension_semantics=("parallel", "arbitrary"),
            vmem_limit_bytes=VMEM_LIMIT),
    )(s, inv_s, x_nhwc)


# ---------------------------------------------------------------------------------------------
# Full branch forward
# ---------------------------------------------------------------------------------------------
def q_conv_seq3x3_branch(x_nchw, params):
    """x_nchw: (B, Cin, H, W) f32.  Returns (y_nchw (B, 2*C_last, H, W), output scaling factor)."""
    # Single NCHW -> NHWC transpose at entry; all kernels run channels-last (lane axis).
    h = jnp.transpose(x_nchw, (0, 2, 3, 1)).astype(jnp.float32)

    # q_input_act + conv_list: each stage's input QuantAct is fused into its conv kernel; only the
    # global per-tensor max (the scale) is computed between stages by XLA.
    for p in params["conv_list"]:
        h = _conv_bn_relu_stage(h, _act_scale(h), p)

    # conv1x3 / conv3x1 consume the same quantized input -> one fused dual-output kernel.
    y1, y2 = _dual_conv_stage(h, _act_scale(h), params["conv1x3"], params["conv3x1"])

    # torch.cat(dim=channel) then q_rescaling_activ with the concat's global scale.
    ycat = jnp.concatenate([y1, y2], axis=-1)
    s_out = _act_scale(ycat)
    y = _requant_stage(ycat, s_out)

    return jnp.transpose(y, (0, 3, 1, 2)), s_out


# ---------------------------------------------------------------------------------------------
# Deterministic parameter construction: conv (no bias) + BN, folded, per-out-channel quantized
# ---------------------------------------------------------------------------------------------
def _make_conv_params(key, cin, cout, kh, kw, ph, pw):
    kw_, kg, kb, km, kv = jax.random.split(key, 5)
    w = 0.1 * jax.random.normal(kw_, (cout, cin, kh, kw), jnp.float32)
    gamma = 1.0 + 0.1 * jax.random.normal(kg, (cout,), jnp.float32)
    beta = 0.1 * jax.random.normal(kb, (cout,), jnp.float32)
    mean = 0.05 * jax.random.normal(km, (cout,), jnp.float32)
    var = 1.0 + 0.1 * jnp.abs(jax.random.normal(kv, (cout,), jnp.float32))
    bn_eps = 1e-5

    inv_std = 1.0 / jnp.sqrt(var + bn_eps)
    w_fold = w * (gamma * inv_std)[:, None, None, None]          # (cout, cin, kh, kw)
    b_fold = beta - gamma * mean * inv_std                       # (cout,)

    # QuantBnConv2d-style per-output-channel symmetric 8-bit weight quantization.
    w_scale = jnp.maximum(jnp.max(jnp.abs(w_fold.reshape(cout, -1)), axis=1) / QMAX, EPS)
    codes = jnp.clip(jnp.round(w_fold / w_scale[:, None, None, None]), -QMAX, QMAX)
    # Lay out as (kh*kw, cin, cout) bf16 codes (exact, |code| <= 127) for per-tap MXU matmuls.
    w_codes = jnp.transpose(codes, (2, 3, 1, 0)).reshape(kh * kw, cin, cout).astype(jnp.bfloat16)

    return dict(kh=kh, kw=kw, ph=ph, pw=pw,
                w_codes=w_codes,
                w_scale=w_scale.astype(jnp.float32),
                bias=b_fold.reshape(1, cout).astype(jnp.float32))


if __name__ == "__main__":
    key = jax.random.PRNGKey(0)
    kx, k1, k2, k3, k4 = jax.random.split(key, 5)

    # Small shapes mirroring the InceptionE-style instantiation:
    #   conv_list = [1x1 (pad 0), 3x3 (pad 1)], then parallel 1x3 / 3x1 branches, channel concat.
    B, Cin, H, W = 2, 4, 16, 16
    C1, C2 = 8, 8

    params = dict(
        conv_list=[
            _make_conv_params(k1, Cin, C1, 1, 1, 0, 0),
            _make_conv_params(k2, C1, C2, 3, 3, 1, 1),
        ],
        conv1x3=_make_conv_params(k3, C2, C2, 1, 3, 0, 1),
        conv3x1=_make_conv_params(k4, C2, C2, 3, 1, 1, 0),
    )

    x = jax.random.normal(kx, (B, Cin, H, W), jnp.float32)

    fwd = jax.jit(lambda xx: q_conv_seq3x3_branch(xx, params))
    y, out_sf = fwd(x)
    jax.block_until_ready((y, out_sf))

    assert y.shape == (B, 2 * C2, H, W)
    assert bool(jnp.all(jnp.isfinite(y)))
    print("KERNEL_OK")
</pallas_src>

<mosaic_0001>
module attributes {stable_mosaic.version = 11 : i64} {
  func.func @_conv_bn_relu_kernel(%arg0: i32, %arg1: i32, %arg2: memref<1xf32, #tpu.memory_space<smem>>, %arg3: memref<1x16x16x4xf32, #tpu.memory_space<vmem>>, %arg4: memref<1x4x8xbf16, #tpu.memory_space<vmem>>, %arg5: memref<1x8xf32, #tpu.memory_space<vmem>>, %arg6: memref<1x8xf32, #tpu.memory_space<vmem>>, %arg7: memref<1x8x16x8xf32, #tpu.memory_space<vmem>>) attributes {dimension_semantics = [#tpu.dimension_semantics<parallel>, #tpu.dimension_semantics<arbitrary>], iteration_bounds = array<i64: 2, 2>, scalar_prefetch = 0 : i64, scratch_operands = 0 : i64, tpu.core_type = #tpu.core_type<tc>, window_params = [{transform_indices = @transform_0, window_bounds = array<i64: 1>}, {transform_indices = @transform_1, window_bounds = array<i64: 1, 16, 16, 4>}, {pipeline_mode = #tpu.pipeline_mode<synchronous>, transform_indices = @transform_2, window_bounds = array<i64: 1, 4, 8>}, {pipeline_mode = #tpu.pipeline_mode<synchronous>, transform_indices = @transform_3, window_bounds = array<i64: 1, 8>}, {pipeline_mode = #tpu.pipeline_mode<synchronous>, transform_indices = @transform_4, window_bounds = array<i64: 1, 8>}, {transform_indices = @transform_5, window_bounds = array<i64: 1, 8, 16, 8>}]} {
    %c8_i32 = arith.constant 8 : i32
    %0 = arith.muli %arg1, %c8_i32 : i32
    %1 = tpu.assume_multiple %0, 8 : i32
    %c0 = arith.constant 0 : index
    %2 = arith.index_cast %1 : i32 to index
    %c0_0 = arith.constant 0 : index
    %c0_1 = arith.constant 0 : index
    %3 = vector.load %arg3[%c0, %2, %c0_0, %c0_1] : memref<1x16x16x4xf32, #tpu.memory_space<vmem>>, vector<1x8x16x4xf32>
    %4 = vector.shape_cast %3 : vector<1x8x16x4xf32> to vector<8x16x4xf32>
    %c0_2 = arith.constant 0 : index
    %5 = memref.load %arg2[%c0_2] : memref<1xf32, #tpu.memory_space<smem>>
    %6 = vector.broadcast %5 : f32 to vector<8x16x4xf32>
    %7 = arith.mulf %4, %6 : vector<8x16x4xf32>
    %8 = math.roundeven %7 : vector<8x16x4xf32>
    %cst = arith.constant -1.270000e+02 : f32
    %cst_3 = arith.constant 1.270000e+02 : f32
    %9 = vector.broadcast %cst : f32 to vector<8x16x4xf32>
    %10 = arith.maximumf %9, %8 : vector<8x16x4xf32>
    %11 = vector.broadcast %cst_3 : f32 to vector<8x16x4xf32>
    %12 = arith.minimumf %11, %10 : vector<8x16x4xf32>
    %13 = arith.truncf %12 : vector<8x16x4xf32> to vector<8x16x4xbf16>
    %cst_4 = arith.constant 0.000000e+00 : f32
    %14 = vector.broadcast %cst_4 : f32 to vector<128x8xf32>
    %15 = vector.shape_cast %13 : vector<8x16x4xbf16> to vector<128x4xbf16>
    %c0_5 = arith.constant 0 : index
    %c0_6 = arith.constant 0 : index
    %c0_7 = arith.constant 0 : index
    %16 = vector.load %arg4[%c0_5, %c0_6, %c0_7] : memref<1x4x8xbf16, #tpu.memory_space<vmem>>, vector<1x4x8xbf16>
    %17 = vector.shape_cast %16 : vector<1x4x8xbf16> to vector<4x8xbf16>
    %cst_8 = arith.constant dense<0.000000e+00> : vector<128x8xf32>
    %18 = tpu.matmul %15, %17, %cst_8 {dimension_numbers = #tpu.dot_dimension_numbers<[1], [0], [0], [1], [0, 0, 1, 1], [], []>} : vector<128x4xbf16>, vector<4x8xbf16>, vector<128x8xf32> -> vector<128x8xf32>
    %19 = arith.addf %14, %18 : vector<128x8xf32>
    %c0_9 = arith.constant 0 : index
    %c0_10 = arith.constant 0 : index
    %20 = vector.load %arg5[%c0_9, %c0_10] : memref<1x8xf32, #tpu.memory_space<vmem>>, vector<1x8xf32>
    %21 = vector.broadcast %20 : vector<1x8xf32> to vector<128x8xf32>
    %22 = arith.mulf %19, %21 : vector<128x8xf32>
    %c0_11 = arith.constant 0 : index
    %c0_12 = arith.constant 0 : index
    %23 = vector.load %arg6[%c0_11, %c0_12] : memref<1x8xf32, #tpu.memory_space<vmem>>, vector<1x8xf32>
    %24 = vector.broadcast %23 : vector<1x8xf32> to vector<128x8xf32>
    %25 = arith.addf %22, %24 : vector<128x8xf32>
    %cst_13 = arith.constant 0.000000e+00 : f32
    %26 = vector.broadcast %cst_13 : f32 to vector<128x8xf32>
    %27 = arith.maximumf %25, %26 : vector<128x8xf32>
    %28 = vector.shape_cast %27 : vector<128x8xf32> to vector<1x8x16x8xf32>
    %c0_14 = arith.constant 0 : index
    %c0_15 = arith.constant 0 : index
    %c0_16 = arith.constant 0 : index
    %c0_17 = arith.constant 0 : index
    %29 = vector.load %arg7[%c0_14, %c0_15, %c0_16, %c0_17] : memref<1x8x16x8xf32, #tpu.memory_space<vmem>>, vector<1x8x16x8xf32>
    tpu.vector_store %arg7[%c0_14, %c0_15, %c0_16, %c0_17], %28 {strides = array<i32>} : memref<1x8x16x8xf32, #tpu.memory_space<vmem>>, vector<1x8x16x8xf32>,
    return
  }
  func.func @transform_0(%arg0: i32, %arg1: i32) -> i32 {
    %c0_i32 = arith.constant 0 : i32
    %c0_i32_0 = arith.constant 0 : i32
    return %c0_i32 : i32
  }
  func.func @transform_1(%arg0: i32, %arg1: i32) -> (i32, i32, i32, i32) {
    %c0_i32 = arith.constant 0 : i32
    %c0_i32_0 = arith.constant 0 : i32
    %c0_i32_1 = arith.constant 0 : i32
    %c0_i32_2 = arith.constant 0 : i32
    return %arg0, %c0_i32, %c0_i32_0, %c0_i32_1 : i32, i32, i32, i32
  }
  func.func @transform_2(%arg0: i32, %arg1: i32) -> (i32, i32, i32) {
    %c0_i32 = arith.constant 0 : i32
    %c0_i32_0 = arith.constant 0 : i32
    %c0_i32_1 = arith.constant 0 : i32
    %c0_i32_2 = arith.constant 0 : i32
    return %c0_i32, %c0_i32_0, %c0_i32_1 : i32, i32, i32
  }
  func.func @transform_3(%arg0: i32, %arg1: i32) -> (i32, i32) {
    %c0_i32 = arith.constant 0 : i32
    %c0_i32_0 = arith.constant 0 : i32
    %c0_i32_1 = arith.constant 0 : i32
    return %c0_i32, %c0_i32_0 : i32, i32
  }
  func.func @transform_4(%arg0: i32, %arg1: i32) -> (i32, i32) {
    %c0_i32 = arith.constant 0 : i32
    %c0_i32_0 = arith.constant 0 : i32
    %c0_i32_1 = arith.constant 0 : i32
    return %c0_i32, %c0_i32_0 : i32, i32
  }
  func.func @transform_5(%arg0: i32, %arg1: i32) -> (i32, i32, i32, i32) {
    %c0_i32 = arith.constant 0 : i32
    %c0_i32_0 = arith.constant 0 : i32
    %c0_i32_1 = arith.constant 0 : i32
    return %arg0, %arg1, %c0_i32, %c0_i32_0 : i32, i32, i32, i32
  }
}

module attributes {stable_mosaic.version = 11 : i64} {
  func.func @_conv_bn_relu_kernel(%arg0: i32, %arg1: i32, %arg2: memref<1xf32, #tpu.memory_space<smem>>, %arg3: memref<1x18x18x8xf32, #tpu.memory_space<vmem>>, %arg4: memref<9x8x8xbf16, #tpu.memory_space<vmem>>, %arg5: memref<1x8xf32, #tpu.memory_space<vmem>>, %arg6: memref<1x8xf32, #tpu.memory_space<vmem>>, %arg7: memref<1x8x16x8xf32, #tpu.memory_space<vmem>>) attributes {dimension_semantics = [#tpu.dimension_semantics<parallel>, #tpu.dimension_semantics<arbitrary>], iteration_bounds = array<i64: 2, 2>, scalar_prefetch = 0 : i64, scratch_operands = 0 : i64, tpu.core_type = #tpu.core_type<tc>, window_params = [{transform_indices = @transform_0, window_bounds = array<i64: 1>}, {transform_indices = @transform_1, window_bounds = array<i64: 1, 18, 18, 8>}, {pipeline_mode = #tpu.pipeline_mode<synchronous>, transform_indices = @transform_2, window_bounds = array<i64: 9, 8, 8>}, {pipeline_mode = #tpu.pipeline_mode<synchronous>, transform_indices = @transform_3, window_bounds = array<i64: 1, 8>}, {pipeline_mode = #tpu.pipeline_mode<synchronous>, transform_indices = @transform_4, window_bounds = array<i64: 1, 8>}, {transform_indices = @transform_5, window_bounds = array<i64: 1, 8, 16, 8>}]} {
    %c8_i32 = arith.constant 8 : i32
    %0 = arith.muli %arg1, %c8_i32 : i32
    %1 = tpu.assume_multiple %0, 8 : i32
    %c0 = arith.constant 0 : index
    %2 = arith.index_cast %1 : i32 to index
    %c0_0 = arith.constant 0 : index
    %c0_1 = arith.constant 0 : index
    %3 = vector.load %arg3[%c0, %2, %c0_0, %c0_1] : memref<1x18x18x8xf32, #tpu.memory_space<vmem>>, vector<1x10x18x8xf32>
    %4 = vector.shape_cast %3 : vector<1x10x18x8xf32> to vector<10x18x8xf32>
    %c0_2 = arith.constant 0 : index
    %5 = memref.load %arg2[%c0_2] : memref<1xf32, #tpu.memory_space<smem>>
    %6 = vector.broadcast %5 : f32 to vector<10x18x8xf32>
    %7 = arith.mulf %4, %6 : vector<10x18x8xf32>
    %8 = math.roundeven %7 : vector<10x18x8xf32>
    %cst = arith.constant -1.270000e+02 : f32
    %cst_3 = arith.constant 1.270000e+02 : f32
    %9 = vector.broadcast %cst : f32 to vector<10x18x8xf32>
    %10 = arith.maximumf %9, %8 : vector<10x18x8xf32>
    %11 = vector.broadcast %cst_3 : f32 to vector<10x18x8xf32>
    %12 = arith.minimumf %11, %10 : vector<10x18x8xf32>
    %13 = arith.truncf %12 : vector<10x18x8xf32> to vector<10x18x8xbf16>
    %cst_4 = arith.constant 0.000000e+00 : f32
    %14 = vector.broadcast %cst_4 : f32 to vector<128x8xf32>
    %15 = vector.extract_strided_slice %13 {offsets = [0, 0, 0], sizes = [8, 16, 8], strides = [1, 1, 1]} : vector<10x18x8xbf16> to vector<8x16x8xbf16>
    %16 = vector.shape_cast %15 : vector<8x16x8xbf16> to vector<128x8xbf16>
    %c0_5 = arith.constant 0 : index
    %c0_6 = arith.constant 0 : index
    %c0_7 = arith.constant 0 : index
    %17 = vector.load %arg4[%c0_5, %c0_6, %c0_7] : memref<9x8x8xbf16, #tpu.memory_space<vmem>>, vector<1x8x8xbf16>
    %18 = vector.shape_cast %17 : vector<1x8x8xbf16> to vector<8x8xbf16>
    %cst_8 = arith.constant dense<0.000000e+00> : vector<128x8xf32>
    %19 = tpu.matmul %16, %18, %cst_8 {dimension_numbers = #tpu.dot_dimension_numbers<[1], [0], [0], [1], [0, 0, 1, 1], [], []>} : vector<128x8xbf16>, vector<8x8xbf16>, vector<128x8xf32> -> vector<128x8xf32>
    %20 = arith.addf %14, %19 : vector<128x8xf32>
    %21 = vector.extract_strided_slice %13 {offsets = [0, 1, 0], sizes = [8, 16, 8], strides = [1, 1, 1]} : vector<10x18x8xbf16> to vector<8x16x8xbf16>
    %22 = vector.shape_cast %21 : vector<8x16x8xbf16> to vector<128x8xbf16>
    %c1 = arith.constant 1 : index
    %c0_9 = arith.constant 0 : index
    %c0_10 = arith.constant 0 : index
    %23 = vector.load %arg4[%c1, %c0_9, %c0_10] : memref<9x8x8xbf16, #tpu.memory_space<vmem>>, vector<1x8x8xbf16>
    %24 = vector.shape_cast %23 : vector<1x8x8xbf16> to vector<8x8xbf16>
    %cst_11 = arith.constant dense<0.000000e+00> : vector<128x8xf32>
    %25 = tpu.matmul %22, %24, %cst_11 {dimension_numbers = #tpu.dot_dimension_numbers<[1], [0], [0], [1], [0, 0, 1, 1], [], []>} : vector<128x8xbf16>, vector<8x8xbf16>, vector<128x8xf32> -> vector<128x8xf32>
    %26 = arith.addf %20, %25 : vector<128x8xf32>
    %27 = vector.extract_strided_slice %13 {offsets = [0, 2, 0], sizes = [8, 16, 8], strides = [1, 1, 1]} : vector<10x18x8xbf16> to vector<8x16x8xbf16>
    %28 = vector.shape_cast %27 : vector<8x16x8xbf16> to vector<128x8xbf16>
    %c2 = arith.constant 2 : index
    %c0_12 = arith.constant 0 : index
    %c0_13 = arith.constant 0 : index
    %29 = vector.load %arg4[%c2, %c0_12, %c0_13] : memref<9x8x8xbf16, #tpu.memory_space<vmem>>, vector<1x8x8xbf16>
    %30 = vector.shape_cast %29 : vector<1x8x8xbf16> to vector<8x8xbf16>
    %cst_14 = arith.constant dense<0.000000e+00> : vector<128x8xf32>
    %31 = tpu.matmul %28, %30, %cst_14 {dimension_numbers = #tpu.dot_dimension_numbers<[1], [0], [0], [1], [0, 0, 1, 1], [], []>} : vector<128x8xbf16>, vector<8x8xbf16>, vector<128x8xf32> -> vector<128x8xf32>
    %32 = arith.addf %26, %31 : vector<128x8xf32>
    %33 = vector.extract_strided_slice %13 {offsets = [1, 0, 0], sizes = [8, 16, 8], strides = [1, 1, 1]} : vector<10x18x8xbf16> to vector<8x16x8xbf16>
    %34 = vector.shape_cast %33 : vector<8x16x8xbf16> to vector<128x8xbf16>
    %c3 = arith.constant 3 : index
    %c0_15 = arith.constant 0 : index
    %c0_16 = arith.constant 0 : index
    %35 = vector.load %arg4[%c3, %c0_15, %c0_16] : memref<9x8x8xbf16, #tpu.memory_space<vmem>>, vector<1x8x8xbf16>
    %36 = vector.shape_cast %35 : vector<1x8x8xbf16> to vector<8x8xbf16>
    %cst_17 = arith.constant dense<0.000000e+00> : vector<128x8xf32>
    %37 = tpu.matmul %34, %36, %cst_17 {dimension_numbers = #tpu.dot_dimension_numbers<[1], [0], [0], [1], [0, 0, 1, 1], [], []>} : vector<128x8xbf16>, vector<8x8xbf16>, vector<128x8xf32> -> vector<128x8xf32>
    %38 = arith.addf %32, %37 : vector<128x8xf32>
    %39 = vector.extract_strided_slice %13 {offsets = [1, 1, 0], sizes = [8, 16, 8], strides = [1, 1, 1]} : vector<10x18x8xbf16> to vector<8x16x8xbf16>
    %40 = vector.shape_cast %39 : vector<8x16x8xbf16> to vector<128x8xbf16>
    %c4 = arith.constant 4 : index
    %c0_18 = arith.constant 0 : index
    %c0_19 = arith.constant 0 : index
    %41 = vector.load %arg4[%c4, %c0_18, %c0_19] : memref<9x8x8xbf16, #tpu.memory_space<vmem>>, vector<1x8x8xbf16>
    %42 = vector.shape_cast %41 : vector<1x8x8xbf16> to vector<8x8xbf16>
    %cst_20 = arith.constant dense<0.000000e+00> : vector<128x8xf32>
    %43 = tpu.matmul %40, %42, %cst_20 {dimension_numbers = #tpu.dot_dimension_numbers<[1], [0], [0], [1], [0, 0, 1, 1], [], []>} : vector<128x8xbf16>, vector<8x8xbf16>, vector<128x8xf32> -> vector<128x8xf32>
    %44 = arith.addf %38, %43 : vector<128x8xf32>
    %45 = vector.extract_strided_slice %13 {offsets = [1, 2, 0], sizes = [8, 16, 8], strides = [1, 1, 1]} : vector<10x18x8xbf16> to vector<8x16x8xbf16>
    %46 = vector.shape_cast %45 : vector<8x16x8xbf16> to vector<128x8xbf16>
    %c5 = arith.constant 5 : index
    %c0_21 = arith.constant 0 : index
    %c0_22 = arith.constant 0 : index
    %47 = vector.load %arg4[%c5, %c0_21, %c0_22] : memref<9x8x8xbf16, #tpu.memory_space<vmem>>, vector<1x8x8xbf16>
    %48 = vector.shape_cast %47 : vector<1x8x8xbf16> to vector<8x8xbf16>
    %cst_23 = arith.constant dense<0.000000e+00> : vector<128x8xf32>
    %49 = tpu.matmul %46, %48, %cst_23 {dimension_numbers = #tpu.dot_dimension_numbers<[1], [0], [0], [1], [0, 0, 1, 1], [], []>} : vector<128x8xbf16>, vector<8x8xbf16>, vector<128x8xf32> -> vector<128x8xf32>
    %50 = arith.addf %44, %49 : vector<128x8xf32>
    %51 = vector.extract_strided_slice %13 {offsets = [2, 0, 0], sizes = [8, 16, 8], strides = [1, 1, 1]} : vector<10x18x8xbf16> to vector<8x16x8xbf16>
    %52 = vector.shape_cast %51 : vector<8x16x8xbf16> to vector<128x8xbf16>
    %c6 = arith.constant 6 : index
    %c0_24 = arith.constant 0 : index
    %c0_25 = arith.constant 0 : index
    %53 = vector.load %arg4[%c6, %c0_24, %c0_25] : memref<9x8x8xbf16, #tpu.memory_space<vmem>>, vector<1x8x8xbf16>
    %54 = vector.shape_cast %53 : vector<1x8x8xbf16> to vector<8x8xbf16>
    %cst_26 = arith.constant dense<0.000000e+00> : vector<128x8xf32>
    %55 = tpu.matmul %52, %54, %cst_26 {dimension_numbers = #tpu.dot_dimension_numbers<[1], [0], [0], [1], [0, 0, 1, 1], [], []>} : vector<128x8xbf16>, vector<8x8xbf16>, vector<128x8xf32> -> vector<128x8xf32>
    %56 = arith.addf %50, %55 : vector<128x8xf32>
    %57 = vector.extract_strided_slice %13 {offsets = [2, 1, 0], sizes = [8, 16, 8], strides = [1, 1, 1]} : vector<10x18x8xbf16> to vector<8x16x8xbf16>
    %58 = vector.shape_cast %57 : vector<8x16x8xbf16> to vector<128x8xbf16>
    %c7 = arith.constant 7 : index
    %c0_27 = arith.constant 0 : index
    %c0_28 = arith.constant 0 : index
    %59 = vector.load %arg4[%c7, %c0_27, %c0_28] : memref<9x8x8xbf16, #tpu.memory_space<vmem>>, vector<1x8x8xbf16>
    %60 = vector.shape_cast %59 : vector<1x8x8xbf16> to vector<8x8xbf16>
    %cst_29 = arith.constant dense<0.000000e+00> : vector<128x8xf32>
    %61 = tpu.matmul %58, %60, %cst_29 {dimension_numbers = #tpu.dot_dimension_numbers<[1], [0], [0], [1], [0, 0, 1, 1], [], []>} : vector<128x8xbf16>, vector<8x8xbf16>, vector<128x8xf32> -> vector<128x8xf32>
    %62 = arith.addf %56, %61 : vector<128x8xf32>
    %63 = vector.extract_strided_slice %13 {offsets = [2, 2, 0], sizes = [8, 16, 8], strides = [1, 1, 1]} : vector<10x18x8xbf16> to vector<8x16x8xbf16>
    %64 = vector.shape_cast %63 : vector<8x16x8xbf16> to vector<128x8xbf16>
    %c8 = arith.constant 8 : index
    %c0_30 = arith.constant 0 : index
    %c0_31 = arith.constant 0 : index
    %65 = vector.load %arg4[%c8, %c0_30, %c0_31] : memref<9x8x8xbf16, #tpu.memory_space<vmem>>, vector<1x8x8xbf16>
    %66 = vector.shape_cast %65 : vector<1x8x8xbf16> to vector<8x8xbf16>
    %cst_32 = arith.constant dense<0.000000e+00> : vector<128x8xf32>
    %67 = tpu.matmul %64, %66, %cst_32 {dimension_numbers = #tpu.dot_dimension_numbers<[1], [0], [0], [1], [0, 0, 1, 1], [], []>} : vector<128x8xbf16>, vector<8x8xbf16>, vector<128x8xf32> -> vector<128x8xf32>
    %68 = arith.addf %62, %67 : vector<128x8xf32>
    %c0_33 = arith.constant 0 : index
    %c0_34 = arith.constant 0 : index
    %69 = vector.load %arg5[%c0_33, %c0_34] : memref<1x8xf32, #tpu.memory_space<vmem>>, vector<1x8xf32>
    %70 = vector.broadcast %69 : vector<1x8xf32> to vector<128x8xf32>
    %71 = arith.mulf %68, %70 : vector<128x8xf32>
    %c0_35 = arith.constant 0 : index
    %c0_36 = arith.constant 0 : index
    %72 = vector.load %arg6[%c0_35, %c0_36] : memref<1x8xf32, #tpu.memory_space<vmem>>, vector<1x8xf32>
    %73 = vector.broadcast %72 : vector<1x8xf32> to vector<128x8xf32>
    %74 = arith.addf %71, %73 : vector<128x8xf32>
    %cst_37 = arith.constant 0.000000e+00 : f32
    %75 = vector.broadcast %cst_37 : f32 to vector<128x8xf32>
    %76 = arith.maximumf %74, %75 : vector<128x8xf32>
    %77 = vector.shape_cast %76 : vector<128x8xf32> to vector<1x8x16x8xf32>
    %c0_38 = arith.constant 0 : index
    %c0_39 = arith.constant 0 : index
    %c0_40 = arith.constant 0 : index
    %c0_41 = arith.constant 0 : index
    %78 = vector.load %arg7[%c0_38, %c0_39, %c0_40, %c0_41] : memref<1x8x16x8xf32, #tpu.memory_space<vmem>>, vector<1x8x16x8xf32>
    tpu.vector_store %arg7[%c0_38, %c0_39, %c0_40, %c0_41], %77 {strides = array<i32>} : memref<1x8x16x8xf32, #tpu.memory_space<vmem>>, vector<1x8x16x8xf32>,
    return
  }
  func.func @transform_0(%arg0: i32, %arg1: i32) -> i32 {
    %c0_i32 = arith.constant 0 : i32
    %c0_i32_0 = arith.constant 0 : i32
    return %c0_i32 : i32
  }
  func.func @transform_1(%arg0: i32, %arg1: i32) -> (i32, i32, i32, i32) {
    %c0_i32 = arith.constant 0 : i32
    %c0_i32_0 = arith.constant 0 : i32
    %c0_i32_1 = arith.constant 0 : i32
    %c0_i32_2 = arith.constant 0 : i32
    return %arg0, %c0_i32, %c0_i32_0, %c0_i32_1 : i32, i32, i32, i32
  }
  func.func @transform_2(%arg0: i32, %arg1: i32) -> (i32, i32, i32) {
    %c0_i32 = arith.constant 0 : i32
    %c0_i32_0 = arith.constant 0 : i32
    %c0_i32_1 = arith.constant 0 : i32
    %c0_i32_2 = arith.constant 0 : i32
    return %c0_i32, %c0_i32_0, %c0_i32_1 : i32, i32, i32
  }
  func.func @transform_3(%arg0: i32, %arg1: i32) -> (i32, i32) {
    %c0_i32 = arith.constant 0 : i32
    %c0_i32_0 = arith.constant 0 : i32
    %c0_i32_1 = arith.constant 0 : i32
    return %c0_i32, %c0_i32_0 : i32, i32
  }
  func.func @transform_4(%arg0: i32, %arg1: i32) -> (i32, i32) {
    %c0_i32 = arith.constant 0 : i32
    %c0_i32_0 = arith.constant 0 : i32
    %c0_i32_1 = arith.constant 0 : i32
    return %c0_i32, %c0_i32_0 : i32, i32
  }
  func.func @transform_5(%arg0: i32, %arg1: i32) -> (i32, i32, i32, i32) {
    %c0_i32 = arith.constant 0 : i32
    %c0_i32_0 = arith.constant 0 : i32
    %c0_i32_1 = arith.constant 0 : i32
    return %arg0, %arg1, %c0_i32, %c0_i32_0 : i32, i32, i32, i32
  }
}

module attributes {stable_mosaic.version = 11 : i64} {
  func.func @_dual_conv_kernel(%arg0: i32, %arg1: i32, %arg2: memref<1xf32, #tpu.memory_space<smem>>, %arg3: memref<1x18x18x8xf32, #tpu.memory_space<vmem>>, %arg4: memref<3x8x8xbf16, #tpu.memory_space<vmem>>, %arg5: memref<3x8x8xbf16, #tpu.memory_space<vmem>>, %arg6: memref<1x8xf32, #tpu.memory_space<vmem>>, %arg7: memref<1x8xf32, #tpu.memory_space<vmem>>, %arg8: memref<1x8xf32, #tpu.memory_space<vmem>>, %arg9: memref<1x8xf32, #tpu.memory_space<vmem>>, %arg10: memref<1x8x16x8xf32, #tpu.memory_space<vmem>>, %arg11: memref<1x8x16x8xf32, #tpu.memory_space<vmem>>) attributes {dimension_semantics = [#tpu.dimension_semantics<parallel>, #tpu.dimension_semantics<arbitrary>], iteration_bounds = array<i64: 2, 2>, scalar_prefetch = 0 : i64, scratch_operands = 0 : i64, tpu.core_type = #tpu.core_type<tc>, window_params = [{transform_indices = @transform_0, window_bounds = array<i64: 1>}, {transform_indices = @transform_1, window_bounds = array<i64: 1, 18, 18, 8>}, {pipeline_mode = #tpu.pipeline_mode<synchronous>, transform_indices = @transform_2, window_bounds = array<i64: 3, 8, 8>}, {pipeline_mode = #tpu.pipeline_mode<synchronous>, transform_indices = @transform_3, window_bounds = array<i64: 3, 8, 8>}, {pipeline_mode = #tpu.pipeline_mode<synchronous>, transform_indices = @transform_4, window_bounds = array<i64: 1, 8>}, {pipeline_mode = #tpu.pipeline_mode<synchronous>, transform_indices = @transform_5, window_bounds = array<i64: 1, 8>}, {pipeline_mode = #tpu.pipeline_mode<synchronous>, transform_indices = @transform_6, window_bounds = array<i64: 1, 8>}, {pipeline_mode = #tpu.pipeline_mode<synchronous>, transform_indices = @transform_7, window_bounds = array<i64: 1, 8>}, {transform_indices = @transform_8, window_bounds = array<i64: 1, 8, 16, 8>}, {transform_indices = @transform_9, window_bounds = array<i64: 1, 8, 16, 8>}]} {
    %c8_i32 = arith.constant 8 : i32
    %0 = arith.muli %arg1, %c8_i32 : i32
    %1 = tpu.assume_multiple %0, 8 : i32
    %c0 = arith.constant 0 : index
    %2 = arith.index_cast %1 : i32 to index
    %c0_0 = arith.constant 0 : index
    %c0_1 = arith.constant 0 : index
    %3 = vector.load %arg3[%c0, %2, %c0_0, %c0_1] : memref<1x18x18x8xf32, #tpu.memory_space<vmem>>, vector<1x10x18x8xf32>
    %4 = vector.shape_cast %3 : vector<1x10x18x8xf32> to vector<10x18x8xf32>
    %c0_2 = arith.constant 0 : index
    %5 = memref.load %arg2[%c0_2] : memref<1xf32, #tpu.memory_space<smem>>
    %6 = vector.broadcast %5 : f32 to vector<10x18x8xf32>
    %7 = arith.mulf %4, %6 : vector<10x18x8xf32>
    %8 = math.roundeven %7 : vector<10x18x8xf32>
    %cst = arith.constant -1.270000e+02 : f32
    %cst_3 = arith.constant 1.270000e+02 : f32
    %9 = vector.broadcast %cst : f32 to vector<10x18x8xf32>
    %10 = arith.maximumf %9, %8 : vector<10x18x8xf32>
    %11 = vector.broadcast %cst_3 : f32 to vector<10x18x8xf32>
    %12 = arith.minimumf %11, %10 : vector<10x18x8xf32>
    %13 = arith.truncf %12 : vector<10x18x8xf32> to vector<10x18x8xbf16>
    %cst_4 = arith.constant 0.000000e+00 : f32
    %14 = vector.broadcast %cst_4 : f32 to vector<128x8xf32>
    %15 = vector.extract_strided_slice %13 {offsets = [1, 0, 0], sizes = [8, 16, 8], strides = [1, 1, 1]} : vector<10x18x8xbf16> to vector<8x16x8xbf16>
    %16 = vector.shape_cast %15 : vector<8x16x8xbf16> to vector<128x8xbf16>
    %c0_5 = arith.constant 0 : index
    %c0_6 = arith.constant 0 : index
    %c0_7 = arith.constant 0 : index
    %17 = vector.load %arg4[%c0_5, %c0_6, %c0_7] : memref<3x8x8xbf16, #tpu.memory_space<vmem>>, vector<1x8x8xbf16>
    %18 = vector.shape_cast %17 : vector<1x8x8xbf16> to vector<8x8xbf16>
    %cst_8 = arith.constant dense<0.000000e+00> : vector<128x8xf32>
    %19 = tpu.matmul %16, %18, %cst_8 {dimension_numbers = #tpu.dot_dimension_numbers<[1], [0], [0], [1], [0, 0, 1, 1], [], []>} : vector<128x8xbf16>, vector<8x8xbf16>, vector<128x8xf32> -> vector<128x8xf32>
    %20 = arith.addf %14, %19 : vector<128x8xf32>
    %21 = vector.extract_strided_slice %13 {offsets = [1, 1, 0], sizes = [8, 16, 8], strides = [1, 1, 1]} : vector<10x18x8xbf16> to vector<8x16x8xbf16>
    %22 = vector.shape_cast %21 : vector<8x16x8xbf16> to vector<128x8xbf16>
    %c1 = arith.constant 1 : index
    %c0_9 = arith.constant 0 : index
    %c0_10 = arith.constant 0 : index
    %23 = vector.load %arg4[%c1, %c0_9, %c0_10] : memref<3x8x8xbf16, #tpu.memory_space<vmem>>, vector<1x8x8xbf16>
    %24 = vector.shape_cast %23 : vector<1x8x8xbf16> to vector<8x8xbf16>
    %cst_11 = arith.constant dense<0.000000e+00> : vector<128x8xf32>
    %25 = tpu.matmul %22, %24, %cst_11 {dimension_numbers = #tpu.dot_dimension_numbers<[1], [0], [0], [1], [0, 0, 1, 1], [], []>} : vector<128x8xbf16>, vector<8x8xbf16>, vector<128x8xf32> -> vector<128x8xf32>
    %26 = arith.addf %20, %25 : vector<128x8xf32>
    %27 = vector.extract_strided_slice %13 {offsets = [1, 2, 0], sizes = [8, 16, 8], strides = [1, 1, 1]} : vector<10x18x8xbf16> to vector<8x16x8xbf16>
    %28 = vector.shape_cast %27 : vector<8x16x8xbf16> to vector<128x8xbf16>
    %c2 = arith.constant 2 : index
    %c0_12 = arith.constant 0 : index
    %c0_13 = arith.constant 0 : index
    %29 = vector.load %arg4[%c2, %c0_12, %c0_13] : memref<3x8x8xbf16, #tpu.memory_space<vmem>>, vector<1x8x8xbf16>
    %30 = vector.shape_cast %29 : vector<1x8x8xbf16> to vector<8x8xbf16>
    %cst_14 = arith.constant dense<0.000000e+00> : vector<128x8xf32>
    %31 = tpu.matmul %28, %30, %cst_14 {dimension_numbers = #tpu.dot_dimension_numbers<[1], [0], [0], [1], [0, 0, 1, 1], [], []>} : vector<128x8xbf16>, vector<8x8xbf16>, vector<128x8xf32> -> vector<128x8xf32>
    %32 = arith.addf %26, %31 : vector<128x8xf32>
    %cst_15 = arith.constant 0.000000e+00 : f32
    %33 = vector.broadcast %cst_15 : f32 to vector<128x8xf32>
    %34 = vector.extract_strided_slice %13 {offsets = [0, 1, 0], sizes = [8, 16, 8], strides = [1, 1, 1]} : vector<10x18x8xbf16> to vector<8x16x8xbf16>
    %35 = vector.shape_cast %34 : vector<8x16x8xbf16> to vector<128x8xbf16>
    %c0_16 = arith.constant 0 : index
    %c0_17 = arith.constant 0 : index
    %c0_18 = arith.constant 0 : index
    %36 = vector.load %arg5[%c0_16, %c0_17, %c0_18] : memref<3x8x8xbf16, #tpu.memory_space<vmem>>, vector<1x8x8xbf16>
    %37 = vector.shape_cast %36 : vector<1x8x8xbf16> to vector<8x8xbf16>
    %cst_19 = arith.constant dense<0.000000e+00> : vector<128x8xf32>
    %38 = tpu.matmul %35, %37, %cst_19 {dimension_numbers = #tpu.dot_dimension_numbers<[1], [0], [0], [1], [0, 0, 1, 1], [], []>} : vector<128x8xbf16>, vector<8x8xbf16>, vector<128x8xf32> -> vector<128x8xf32>
    %39 = arith.addf %33, %38 : vector<128x8xf32>
    %40 = vector.extract_strided_slice %13 {offsets = [1, 1, 0], sizes = [8, 16, 8], strides = [1, 1, 1]} : vector<10x18x8xbf16> to vector<8x16x8xbf16>
    %41 = vector.shape_cast %40 : vector<8x16x8xbf16> to vector<128x8xbf16>
    %c1_20 = arith.constant 1 : index
    %c0_21 = arith.constant 0 : index
    %c0_22 = arith.constant 0 : index
    %42 = vector.load %arg5[%c1_20, %c0_21, %c0_22] : memref<3x8x8xbf16, #tpu.memory_space<vmem>>, vector<1x8x8xbf16>
    %43 = vector.shape_cast %42 : vector<1x8x8xbf16> to vector<8x8xbf16>
    %cst_23 = arith.constant dense<0.000000e+00> : vector<128x8xf32>
    %44 = tpu.matmul %41, %43, %cst_23 {dimension_numbers = #tpu.dot_dimension_numbers<[1], [0], [0], [1], [0, 0, 1, 1], [], []>} : vector<128x8xbf16>, vector<8x8xbf16>, vector<128x8xf32> -> vector<128x8xf32>
    %45 = arith.addf %39, %44 : vector<128x8xf32>
    %46 = vector.extract_strided_slice %13 {offsets = [2, 1, 0], sizes = [8, 16, 8], strides = [1, 1, 1]} : vector<10x18x8xbf16> to vector<8x16x8xbf16>
    %47 = vector.shape_cast %46 : vector<8x16x8xbf16> to vector<128x8xbf16>
    %c2_24 = arith.constant 2 : index
    %c0_25 = arith.constant 0 : index
    %c0_26 = arith.constant 0 : index
    %48 = vector.load %arg5[%c2_24, %c0_25, %c0_26] : memref<3x8x8xbf16, #tpu.memory_space<vmem>>, vector<1x8x8xbf16>
    %49 = vector.shape_cast %48 : vector<1x8x8xbf16> to vector<8x8xbf16>
    %cst_27 = arith.constant dense<0.000000e+00> : vector<128x8xf32>
    %50 = tpu.matmul %47, %49, %cst_27 {dimension_numbers = #tpu.dot_dimension_numbers<[1], [0], [0], [1], [0, 0, 1, 1], [], []>} : vector<128x8xbf16>, vector<8x8xbf16>, vector<128x8xf32> -> vector<128x8xf32>
    %51 = arith.addf %45, %50 : vector<128x8xf32>
    %c0_28 = arith.constant 0 : index
    %c0_29 = arith.constant 0 : index
    %52 = vector.load %arg6[%c0_28, %c0_29] : memref<1x8xf32, #tpu.memory_space<vmem>>, vector<1x8xf32>
    %53 = vector.broadcast %52 : vector<1x8xf32> to vector<128x8xf32>
    %54 = arith.mulf %32, %53 : vector<128x8xf32>
    %c0_30 = arith.constant 0 : index
    %c0_31 = arith.constant 0 : index
    %55 = vector.load %arg7[%c0_30, %c0_31] : memref<1x8xf32, #tpu.memory_space<vmem>>, vector<1x8xf32>
    %56 = vector.broadcast %55 : vector<1x8xf32> to vector<128x8xf32>
    %57 = arith.addf %54, %56 : vector<128x8xf32>
    %cst_32 = arith.constant 0.000000e+00 : f32
    %58 = vector.broadcast %cst_32 : f32 to vector<128x8xf32>
    %59 = arith.maximumf %57, %58 : vector<128x8xf32>
    %c0_33 = arith.constant 0 : index
    %c0_34 = arith.constant 0 : index
    %60 = vector.load %arg8[%c0_33, %c0_34] : memref<1x8xf32, #tpu.memory_space<vmem>>, vector<1x8xf32>
    %61 = vector.broadcast %60 : vector<1x8xf32> to vector<128x8xf32>
    %62 = arith.mulf %51, %61 : vector<128x8xf32>
    %c0_35 = arith.constant 0 : index
    %c0_36 = arith.constant 0 : index
    %63 = vector.load %arg9[%c0_35, %c0_36] : memref<1x8xf32, #tpu.memory_space<vmem>>, vector<1x8xf32>
    %64 = vector.broadcast %63 : vector<1x8xf32> to vector<128x8xf32>
    %65 = arith.addf %62, %64 : vector<128x8xf32>
    %cst_37 = arith.constant 0.000000e+00 : f32
    %66 = vector.broadcast %cst_37 : f32 to vector<128x8xf32>
    %67 = arith.maximumf %65, %66 : vector<128x8xf32>
    %68 = vector.shape_cast %59 : vector<128x8xf32> to vector<1x8x16x8xf32>
    %c0_38 = arith.constant 0 : index
    %c0_39 = arith.constant 0 : index
    %c0_40 = arith.constant 0 : index
    %c0_41 = arith.constant 0 : index
    %69 = vector.load %arg10[%c0_38, %c0_39, %c0_40, %c0_41] : memref<1x8x16x8xf32, #tpu.memory_space<vmem>>, vector<1x8x16x8xf32>
    tpu.vector_store %arg10[%c0_38, %c0_39, %c0_40, %c0_41], %68 {strides = array<i32>} : memref<1x8x16x8xf32, #tpu.memory_space<vmem>>, vector<1x8x16x8xf32>,
    %70 = vector.shape_cast %67 : vector<128x8xf32> to vector<1x8x16x8xf32>
    %c0_42 = arith.constant 0 : index
    %c0_43 = arith.constant 0 : index
    %c0_44 = arith.constant 0 : index
    %c0_45 = arith.constant 0 : index
    %71 = vector.load %arg11[%c0_42, %c0_43, %c0_44, %c0_45] : memref<1x8x16x8xf32, #tpu.memory_space<vmem>>, vector<1x8x16x8xf32>
    tpu.vector_store %arg11[%c0_42, %c0_43, %c0_44, %c0_45], %70 {strides = array<i32>} : memref<1x8x16x8xf32, #tpu.memory_space<vmem>>, vector<1x8x16x8xf32>,
    return
  }
  func.func @transform_0(%arg0: i32, %arg1: i32) -> i32 {
    %c0_i32 = arith.constant 0 : i32
    %c0_i32_0 = arith.constant 0 : i32
    return %c0_i32 : i32
  }
  func.func @transform_1(%arg0: i32, %arg1: i32) -> (i32, i32, i32, i32) {
    %c0_i32 = arith.constant 0 : i32
    %c0_i32_0 = arith.constant 0 : i32
    %c0_i32_1 = arith.constant 0 : i32
    %c0_i32_2 = arith.constant 0 : i32
    return %arg0, %c0_i32, %c0_i32_0, %c0_i32_1 : i32, i32, i32, i32
  }
  func.func @transform_2(%arg0: i32, %arg1: i32) -> (i32, i32, i32) {
    %c0_i32 = arith.constant 0 : i32
    %c0_i32_0 = arith.constant 0 : i32
    %c0_i32_1 = arith.constant 0 : i32
    %c0_i32_2 = arith.constant 0 : i32
    return %c0_i32, %c0_i32_0, %c0_i32_1 : i32, i32, i32
  }
  func.func @transform_3(%arg0: i32, %arg1: i32) -> (i32, i32, i32) {
    %c0_i32 = arith.constant 0 : i32
    %c0_i32_0 = arith.constant 0 : i32
    %c0_i32_1 = arith.constant 0 : i32
    %c0_i32_2 = arith.constant 0 : i32
    return %c0_i32, %c0_i32_0, %c0_i32_1 : i32, i32, i32
  }
  func.func @transform_4(%arg0: i32, %arg1: i32) -> (i32, i32) {
    %c0_i32 = arith.constant 0 : i32
    %c0_i32_0 = arith.constant 0 : i32
    %c0_i32_1 = arith.constant 0 : i32
    return %c0_i32, %c0_i32_0 : i32, i32
  }
  func.func @transform_5(%arg0: i32, %arg1: i32) -> (i32, i32) {
    %c0_i32 = arith.constant 0 : i32
    %c0_i32_0 = arith.constant 0 : i32
    %c0_i32_1 = arith.constant 0 : i32
    return %c0_i32, %c0_i32_0 : i32, i32
  }
  func.func @transform_6(%arg0: i32, %arg1: i32) -> (i32, i32) {
    %c0_i32 = arith.constant 0 : i32
    %c0_i32_0 = arith.constant 0 : i32
    %c0_i32_1 = arith.constant 0 : i32
    return %c0_i32, %c0_i32_0 : i32, i32
  }
  func.func @transform_7(%arg0: i32, %arg1: i32) -> (i32, i32) {
    %c0_i32 = arith.constant 0 : i32
    %c0_i32_0 = arith.constant 0 : i32
    %c0_i32_1 = arith.constant 0 : i32
    return %c0_i32, %c0_i32_0 : i32, i32
  }
  func.func @transform_8(%arg0: i32, %arg1: i32) -> (i32, i32, i32, i32) {
    %c0_i32 = arith.constant 0 : i32
    %c0_i32_0 = arith.constant 0 : i32
    %c0_i32_1 = arith.constant 0 : i32
    return %arg0, %arg1, %c0_i32, %c0_i32_0 : i32, i32, i32, i32
  }
  func.func @transform_9(%arg0: i32, %arg1: i32) -> (i32, i32, i32, i32) {
    %c0_i32 = arith.constant 0 : i32
    %c0_i32_0 = arith.constant 0 : i32
    %c0_i32_1 = arith.constant 0 : i32
    return %arg0, %arg1, %c0_i32, %c0_i32_0 : i32, i32, i32, i32
  }
}

module attributes {stable_mosaic.version = 11 : i64} {
  func.func @_requant_kernel(%arg0: i32, %arg1: i32, %arg2: memref<1xf32, #tpu.memory_space<smem>>, %arg3: memref<1xf32, #tpu.memory_space<smem>>, %arg4: memref<1x8x16x16xf32, #tpu.memory_space<vmem>>, %arg5: memref<1x8x16x16xf32, #tpu.memory_space<vmem>>) attributes {dimension_semantics = [#tpu.dimension_semantics<parallel>, #tpu.dimension_semantics<arbitrary>], iteration_bounds = array<i64: 2, 2>, scalar_prefetch = 0 : i64, scratch_operands = 0 : i64, tpu.core_type = #tpu.core_type<tc>, window_params = [{transform_indices = @transform_0, window_bounds = array<i64: 1>}, {transform_indices = @transform_1, window_bounds = array<i64: 1>}, {transform_indices = @transform_2, window_bounds = array<i64: 1, 8, 16, 16>}, {transform_indices = @transform_3, window_bounds = array<i64: 1, 8, 16, 16>}]} {
    %c0 = arith.constant 0 : index
    %c0_0 = arith.constant 0 : index
    %c0_1 = arith.constant 0 : index
    %c0_2 = arith.constant 0 : index
    %0 = vector.load %arg4[%c0, %c0_0, %c0_1, %c0_2] : memref<1x8x16x16xf32, #tpu.memory_space<vmem>>, vector<1x8x16x16xf32>
    %c0_3 = arith.constant 0 : index
    %1 = memref.load %arg3[%c0_3] : memref<1xf32, #tpu.memory_space<smem>>
    %2 = vector.broadcast %1 : f32 to vector<1x8x16x16xf32>
    %3 = arith.mulf %0, %2 : vector<1x8x16x16xf32>
    %4 = math.roundeven %3 : vector<1x8x16x16xf32>
    %cst = arith.constant -1.270000e+02 : f32
    %cst_4 = arith.constant 1.270000e+02 : f32
    %5 = vector.broadcast %cst : f32 to vector<1x8x16x16xf32>
    %6 = arith.maximumf %5, %4 : vector<1x8x16x16xf32>
    %7 = vector.broadcast %cst_4 : f32 to vector<1x8x16x16xf32>
    %8 = arith.minimumf %7, %6 : vector<1x8x16x16xf32>
    %c0_5 = arith.constant 0 : index
    %9 = memref.load %arg2[%c0_5] : memref<1xf32, #tpu.memory_space<smem>>
    %10 = vector.broadcast %9 : f32 to vector<1x8x16x16xf32>
    %11 = arith.mulf %8, %10 : vector<1x8x16x16xf32>
    %c0_6 = arith.constant 0 : index
    %c0_7 = arith.constant 0 : index
    %c0_8 = arith.constant 0 : index
    %c0_9 = arith.constant 0 : index
    %12 = vector.load %arg5[%c0_6, %c0_7, %c0_8, %c0_9] : memref<1x8x16x16xf32, #tpu.memory_space<vmem>>, vector<1x8x16x16xf32>
    tpu.vector_store %arg5[%c0_6, %c0_7, %c0_8, %c0_9], %11 {strides = array<i32>} : memref<1x8x16x16xf32, #tpu.memory_space<vmem>>, vector<1x8x16x16xf32>,
    return
  }
  func.func @transform_0(%arg0: i32, %arg1: i32) -> i32 {
    %c0_i32 = arith.constant 0 : i32
    %c0_i32_0 = arith.constant 0 : i32
    return %c0_i32 : i32
  }
  func.func @transform_1(%arg0: i32, %arg1: i32) -> i32 {
    %c0_i32 = arith.constant 0 : i32
    %c0_i32_0 = arith.constant 0 : i32
    return %c0_i32 : i32
  }
  func.func @transform_2(%arg0: i32, %arg1: i32) -> (i32, i32, i32, i32) {
    %c0_i32 = arith.constant 0 : i32
    %c0_i32_0 = arith.constant 0 : i32
    %c0_i32_1 = arith.constant 0 : i32
    return %arg0, %arg1, %c0_i32, %c0_i32_0 : i32, i32, i32, i32
  }
  func.func @transform_3(%arg0: i32, %arg1: i32) -> (i32, i32, i32, i32) {
    %c0_i32 = arith.constant 0 : i32
    %c0_i32_0 = arith.constant 0 : i32
    %c0_i32_1 = arith.constant 0 : i32
    return %arg0, %arg1, %c0_i32, %c0_i32_0 : i32, i32, i32, i32
  }
}

</mosaic_0001>

<bundles_post_ra>
// kernel: _lambda_.4
= control target key start
LH: loop header
LB: loop body
LE: loop exit
PB: predicated region body
PF: predicated region fallthrough
CT: control target
= control target key end

     0   :  { %s924_s20 = smov 0   ;;  %s926_s21 = smov 0   ;;  %s1190_s0 = inlined_call_operand.<no memory space> [shape: f32[1], index: 0, kind: input, shape index: {}]   ;;  %s1191_s1 = inlined_call_operand.vmem [shape: f32[2,16,16,4], index: 1, kind: input, shape index: {}]   ;;  %s1192_s2 = inlined_call_operand.vmem [shape: bf16[1,4,8], index: 2, kind: input, shape index: {}]   ;;  %s1193_s3 = inlined_call_operand.vmem [shape: f32[1,8], index: 3, kind: input, shape index: {}]   ;;  %s1194_s4 = inlined_call_operand.vmem [shape: f32[1,8], index: 4, kind: input, shape index: {}]   ;;  %s1195_s5 = inlined_call_operand.vmem [shape: f32[2,16,16,8], index: 5, kind: output, shape index: {}]  }
   0x1   :  { %10 = sst [smem:[#allocation2]] %s1190_s0  ;;  %s928_s22 = smov 0  }
   0x2   :  { %s930_s23 = smov 0   ;;  %s932_s24 = smov 0  }
   0x3 LB: > { %s25_s0 = sadd.s32 1, %s881_s22  ;;  %s28_s25 = sadd.s32 1, %s885_s23  ;;  %s889_s24 = sphi %s932_s24, %s16_s24   ;;  %s885_s23 = sphi %s930_s23, %s1221_s23   ;;  %s881_s22 = sphi %s928_s22, %s1220_s22   ;;  %s877_s21 = sphi %s926_s21, %s1219_s21   ;;  %s873_s20 = sphi %s924_s20, %s1218_s20  }
   0x4   : > { %p26_p0 = scmp.ge.s32.totalorder %s25_s0, 2  ;;  %p641_p1 = scmp.ge.s32.totalorder %s889_s24, 1 }
   0x5   : > { %p202_p2 = scmp.lt.s32.totalorder %s889_s24, 5 }
   0x6   : > { %s1223_s0 = smov (%p26_p0, %s25_s0), 0  ;;  %s1225_s25 = smov (!%p26_p0, %s28_s25), %s885_s23 }
   0x7   : > { %p203_p3 = pnand %p641_p1, %p202_p2  ;;  %p30_p4 = scmp.ge.s32.totalorder %s1225_s25, 2 }
   0x8   : > { %p235_p5 = scmp.lt.s32.totalorder (!%p203_p3), %s877_s21, 1  ;;  %s271_s28 = sld [smem:[#allocation2]] (!%p203_p3) }
   0x9   : > { %s1227_s25 = smov (%p30_p4, %s1225_s25), 0  ;;  %206 = sbr.rel (%p203_p3) target bundleno = 226 (0xe2), region = 40 }
   0xa   : > { %s677_s29 = sshll.u32 (!%p203_p3), %s873_s20, 7  ;;  %s644_s10 = sshll.u32 (!%p203_p3), %s873_s20, 3 }
   0xb   : > { %p243_p6 = scmp.lt.s32.totalorder (!%p203_p3), %s644_s10, 15 }
   0xe   : > { %v353_v0 = vld [vmem:[%s1192_s2] sm:$0x3]  ;;  %vm419_vm0 = vcmask 1041408   ;;  %s1229_s21 = smov (!%p235_p5, %s877_s21), 1  ;;  %v970_v4 = vstv %s271_s28  ;;  %vm394_vm6 = vcmask 31744   ;;  %s1231_s10 = smov (!%p243_p6, %s644_s10), 15 }
   0xf   : > { %v421_v1 = vsel %vm419_vm0, %v353_v0, 0  ;;  %s676_s30 = sshll.u32 %s1229_s21, 8  ;;  %s645_s11 = sshll.u32 %s1231_s10, 1 }
  0x10   : > { %430 = vmatpush.bf16.msra.mxu0 %v421_v1  ;;  %678 = vmatpush.bf16.msra.mxu1 %v421_v1  ;;  %s239_s8 = scalar_lea.vmem %s1191_s1, %s676_s30  ;;  %s646_s12 = sshll.u32 %s1229_s21, 5 }
  0x11   : > { %679 = vmatpush.bf16.msra.mxu2 %v421_v1  ;;  %680 = vmatpush.bf16.msra.mxu3 %v421_v1  ;;  %s966_s9 = scalar_lea.vmem %s239_s8, %s677_s29  ;;  %s247_s15 = sadd.s32 %s646_s12, %s645_s11 }
  0x12   : > { %v255_v2 = vld [vmem:[%s966_s9] sm:$0xff]  ;;  %v256_v3 = vld [vmem:[%s966_s9 + $0x8] sm:$0xff]  ;;  %s647_s18 = sshll.u32 %s247_s15, 3 }
  0x13   : > { %v259_v5 = vld [vmem:[%s966_s9 + $0x20] sm:$0xff]  ;;  %v273_v6 = vmul.f32 %v970_v4, %v255_v2  ;;  %v274_v7 = vmul.f32 %v970_v4, %v256_v3  ;;  %v260_v8 = vld [vmem:[%s966_s9 + $0x28] sm:$0xff]  ;;  %s1111_s21 = scalar_lea.vmem %s1195_s5, %s647_s18 }
  0x14   : > { %v277_v9 = vmul.f32 %v970_v4, %v259_v5  ;;  %v263_v10 = vld [vmem:[%s966_s9 + $0x40] sm:$0xff]  ;;  %v264_v11 = vld [vmem:[%s966_s9 + $0x48] sm:$0xff]  ;;  %v278_v12 = vmul.f32 %v970_v4, %v260_v8 }
  0x15   : > { %v281_v13 = vmul.f32 %v970_v4, %v263_v10  ;;  %v681_v14 = vand.u32 2147483647, %v273_v6  ;;  %v683_v15 = vcvt.f32.s32 %v273_v6  ;;  %v689_v16 = vand.u32 2147483647, %v274_v7  ;;  %v267_v50 = vld [vmem:[%s966_s9 + $0x60] sm:$0xff]  ;;  %v268_v55 = vld [vmem:[%s966_s9 + $0x68] sm:$0xff] }
  0x16   : > { %v982_v17 = vmul.f32 %v970_v4, %v264_v11  ;;  %v686_v18 = vand.u32 2147483648, %v273_v6  ;;  %v691_v19 = vcvt.f32.s32 %v274_v7  ;;  %v713_v20 = vand.u32 2147483647, %v277_v9 }
  0x17   : > { %v715_v21 = vcvt.f32.s32 %v277_v9  ;;  %vm984_vm1 = vcmp.lt.f32.partialorder %v681_v14, 8388608.0  ;;  %v684_v23 = vcvt.s32.f32 %v683_v15  ;;  %vm988_vm2 = vcmp.lt.f32.partialorder %v689_v16, 8388608.0 }
  0x18   : > { %v694_v25 = vand.u32 2147483648, %v274_v7  ;;  %v692_v26 = vcvt.s32.f32 %v691_v19  ;;  %v718_v28 = vand.u32 2147483648, %v277_v9  ;;  %v721_v29 = vand.u32 2147483647, %v278_v12 }
  0x19   : > { %v716_v27 = vcvt.s32.f32 %v715_v21  ;;  %v685_v30 = vand.u32 2147483647, %v684_v23  ;;  %vm992_vm3 = vcmp.lt.f32.partialorder %v713_v20, 8388608.0  ;;  %v723_v32 = vcvt.f32.s32 %v278_v12  ;;  %v257_v23 = vld [vmem:[%s966_s9 + $0x10] sm:$0xff] }
  0x1a   : > { %v745_v33 = vand.u32 2147483647, %v281_v13  ;;  %v693_v34 = vand.u32 2147483647, %v692_v26  ;;  %v726_v36 = vand.u32 2147483648, %v278_v12  ;;  %v747_v37 = vcvt.f32.s32 %v281_v13 }
  0x1b   : > { %v717_v35 = vand.u32 2147483647, %v716_v27  ;;  %v687_v38 = vor.u32 %v686_v18, %v685_v30  ;;  %vm996_vm4 = vcmp.lt.f32.partialorder %v721_v29, 8388608.0  ;;  %v724_v40 = vcvt.s32.f32 %v723_v32  ;;  %v258_v27 = vld [vmem:[%s966_s9 + $0x18] sm:$0xff] }
  0x1c   : > { %vm1000_vm5 = vcmp.lt.f32.partialorder %v745_v33, 8388608.0  ;;  %v695_v42 = vor.u32 %v694_v25, %v693_v34  ;;  %v748_v44 = vcvt.s32.f32 %v747_v37  ;;  %v750_v45 = vand.u32 2147483648, %v281_v13  ;;  %v262_v37 = vld [vmem:[%s966_s9 + $0x38] sm:$0xff] }
  0x1d   : > { %v719_v43 = vor.u32 %v718_v28, %v717_v35  ;;  %v688_v46 = vsel %vm984_vm1, %v687_v38, %v273_v6  ;;  %v725_v47 = vand.u32 2147483647, %v724_v40  ;;  %v753_v48 = vand.u32 2147483647, %v982_v17  ;;  %v261_v28 = vld [vmem:[%s966_s9 + $0x30] sm:$0xff] }
  0x1e   : > { %v755_v49 = vcvt.f32.s32 %v982_v17  ;;  %v696_v51 = vsel %vm988_vm2, %v695_v42, %v274_v7  ;;  %v650_v52 = vclamps-f32 %v688_v46, 127.0  ;;  %v749_v54 = vand.u32 2147483647, %v748_v44 }
  0x1f   : > { %v720_v53 = vsel %vm992_vm3, %v719_v43, %v277_v9  ;;  %v651_v56 = vclamps-f32 %v696_v51, 127.0  ;;  %v727_v57 = vor.u32 %v726_v36, %v725_v47  ;;  %v758_v59 = vand.u32 2147483648, %v982_v17 }
  0x20   : > { %v654_v58 = vclamps-f32 %v720_v53, 127.0  ;;  %v337_v60 = vpack.c.bf16 %v650_v52, %v650_v52  ;;  %v751_v61 = vor.u32 %v750_v45, %v749_v54  ;;  %v756_v62 = vcvt.s32.f32 %v755_v49 }
  0x21   : > { %v285_v63 = vmul.f32 %v970_v4, %v267_v50  ;;  %v338_v0 = vpack.c.bf16 %v651_v56, %v651_v56  ;;  %v728_v1 = vsel %vm996_vm4, %v727_v57, %v278_v12  ;;  %v286_v3 = vmul.f32 %v970_v4, %v268_v55 }
  0x22   : > { %v341_v2 = vpack.c.bf16 %v654_v58, %v654_v58  ;;  %v370_v5 = vunpack.c.l.b16 %v337_v60  ;;  %v655_v6 = vclamps-f32 %v728_v1, 127.0  ;;  %v752_v7 = vsel %vm1000_vm5, %v751_v61, %v281_v13 }
  0x23   : > { %v757_v8 = vand.u32 2147483647, %v756_v62  ;;  %v371_v9 = vunpack.c.l.b16 %v338_v0  ;;  %vm1021_vm7 = vcmp.lt.f32.partialorder %v753_v48, 8388608.0  ;;  %v658_v11 = vclamps-f32 %v752_v7, 127.0 }
  0x24   : > { %v777_v14 = vand.u32 2147483647, %v285_v63  ;;  %v342_v12 = vpack.c.bf16 %v655_v6, %v655_v6  ;;  %v374_v15 = vunpack.c.l.b16 %v341_v2  ;;  %v779_v18 = vcvt.f32.s32 %v285_v63 }
  0x25   : > { %v759_v16 = vor.u32 %v758_v59, %v757_v8  ;;  %v386_v19 = vpack.c.b16 %v371_v9, %v370_v5  ;;  %v345_v20 = vpack.c.bf16 %v658_v11, %v658_v11  ;;  %v782_v21 = vand.u32 2147483648, %v285_v63  ;;  %v265_v9 = vld [vmem:[%s966_s9 + $0x50] sm:$0xff] }
  0x26   : > { %v785_v22 = vand.u32 2147483647, %v286_v3  ;;  %v375_v13 = vunpack.c.l.b16 %v342_v12  ;;  %v780_v25 = vcvt.s32.f32 %v779_v18  ;;  %v787_v26 = vcvt.f32.s32 %v286_v3 }
  0x27   : > { %v760_v24 = vsel %vm1021_vm7, %v759_v16, %v982_v17  ;;  %666 = vmatmul.msk.bf16.vlgmr.msra.gmra.mxu0 %vm394_vm6, %v386_v19  ;;  %v378_v30 = vunpack.c.l.b16 %v345_v20  ;;  %vm1032_vm8 = vcmp.lt.f32.partialorder %v777_v14, 8388608.0  ;;  %v790_v32 = vand.u32 2147483648, %v286_v3 }
  0x28   : > { %v659_v29 = vclamps-f32 %v760_v24, 127.0  ;;  %v388_v33 = vpack.c.b16 %v375_v13, %v374_v15  ;;  %v781_v34 = vand.u32 2147483647, %v780_v25  ;;  %v788_v35 = vcvt.s32.f32 %v787_v26  ;;  %v266_v15 = vld [vmem:[%s966_s9 + $0x58] sm:$0xff]  ;;  %v269_v24 = vld [vmem:[%s966_s9 + $0x70] sm:$0xff] }
  0x29   : > { %v275_v36 = vmul.f32 %v970_v4, %v257_v23  ;;  %vm1038_vm9 = vcmp.lt.f32.partialorder %v785_v22, 8388608.0  ;;  %v276_v39 = vmul.f32 %v970_v4, %v258_v27  ;;  %v1044_v40 = vmul.f32 %v970_v4, %v261_v28 }
  0x2a   : > { %v346_v17 = vpack.c.bf16 %v659_v29, %v659_v29  ;;  %668 = vmatmul.msk.bf16.vlgmr.msra.gmra.mxu1 %vm394_vm6, %v388_v33  ;;  %v783_v41 = vor.u32 %v782_v21, %v781_v34  ;;  %v789_v42 = vand.u32 2147483647, %v788_v35  ;;  %v1048_v48 = vmul.f32 %v970_v4, %v262_v37  ;;  %v270_v34 = vld [vmem:[%s966_s9 + $0x78] sm:$0xff] }
  0x2b   : > { %v697_v43 = vand.u32 2147483647, %v275_v36  ;;  %v699_v44 = vcvt.f32.s32 %v275_v36  ;;  %v702_v46 = vand.u32 2147483648, %v275_v36  ;;  %v707_v47 = vcvt.f32.s32 %v276_v39 }
  0x2c   : > { %v379_v45 = vunpack.c.l.b16 %v346_v17  ;;  %v784_v49 = vsel %vm1032_vm8, %v783_v41, %v285_v63  ;;  %v791_v50 = vor.u32 %v790_v32, %v789_v42  ;;  %v705_v52 = vand.u32 2147483647, %v276_v39 }
  0x2d   : > { %v700_v51 = vcvt.s32.f32 %v699_v44  ;;  %v662_v54 = vclamps-f32 %v784_v49, 127.0  ;;  %vm1052_vm10 = vcmp.lt.f32.partialorder %v697_v43, 8388608.0  ;;  %v708_v56 = vcvt.s32.f32 %v707_v47 }
  0x2e   : > { %v390_v53 = vpack.c.b16 %v379_v45, %v378_v30  ;;  %v792_v57 = vsel %vm1038_vm9, %v791_v50, %v286_v3  ;;  %v710_v59 = vand.u32 2147483648, %v276_v39  ;;  %v729_v60 = vand.u32 2147483647, %v1044_v40 }
  0x2f   : > { %v701_v58 = vand.u32 2147483647, %v700_v51  ;;  %v663_v61 = vclamps-f32 %v792_v57, 127.0  ;;  %v349_v62 = vpack.c.bf16 %v662_v54, %v662_v54  ;;  %v709_v63 = vand.u32 2147483647, %v708_v56 }
  0x30   : > { %670 = vmatmul.msk.bf16.vlgmr.msra.gmra.mxu2 %vm394_vm6, %v390_v53  ;;  %v731_v0 = vcvt.f32.s32 %v1044_v40  ;;  %vm1061_vm11 = vcmp.lt.f32.partialorder %v705_v52, 8388608.0  ;;  %v734_v3 = vand.u32 2147483648, %v1044_v40  ;;  %vm1069_vm12 = vcmp.lt.f32.partialorder %v729_v60, 8388608.0 }
  0x31   : > { %v703_v1 = vor.u32 %v702_v46, %v701_v58  ;;  %v350_v5 = vpack.c.bf16 %v663_v61, %v663_v61  ;;  %v382_v6 = vunpack.c.l.b16 %v349_v62  ;;  %v711_v7 = vor.u32 %v710_v59, %v709_v63 }
  0x32   : > { %v732_v8 = vcvt.s32.f32 %v731_v0  ;;  %v737_v14 = vand.u32 2147483647, %v1048_v48  ;;  %v739_v12 = vcvt.f32.s32 %v1048_v48  ;;  %v742_v23 = vand.u32 2147483648, %v1048_v48 }
  0x33   : > { %v704_v10 = vsel %vm1052_vm10, %v703_v1, %v275_v36  ;;  %v383_v16 = vunpack.c.l.b16 %v350_v5  ;;  %v712_v18 = vsel %vm1061_vm11, %v711_v7, %v276_v39  ;;  %v283_v13 = vmul.f32 %v970_v4, %v265_v9 }
  0x34   : > { %v652_v19 = vclamps-f32 %v704_v10, 127.0  ;;  %v733_v20 = vand.u32 2147483647, %v732_v8  ;;  %v653_v21 = vclamps-f32 %v712_v18, 127.0  ;;  %v740_v22 = vcvt.s32.f32 %v739_v12 }
  0x35   : > { %v392_v25 = vpack.c.b16 %v383_v16, %v382_v6  ;;  %v284_v28 = vmul.f32 %v970_v4, %v266_v15  ;;  %v763_v31 = vcvt.f32.s32 %v283_v13  ;;  %vm738_vm13 = vcmp.lt.f32.partialorder %v737_v14, 8388608.0 }
  0x36   : > { %v339_v26 = vpack.c.bf16 %v652_v19, %v652_v19  ;;  %v735_v27 = vor.u32 %v734_v3, %v733_v20  ;;  %v340_v29 = vpack.c.bf16 %v653_v21, %v653_v21  ;;  %v741_v30 = vand.u32 2147483647, %v740_v22 }
  0x37   : > { %672 = vmatmul.msk.bf16.vlgmr.msra.gmra.mxu3 %vm394_vm6, %v392_v25  ;;  %v287_v35 = vmul.f32 %v970_v4, %v269_v24  ;;  %v761_v38 = vand.u32 2147483647, %v283_v13  ;;  %v764_v39 = vcvt.s32.f32 %v763_v31  ;;  %v766_v41 = vand.u32 2147483648, %v283_v13  ;;  %v1099_v25 = vld [vmem:[%s1193_s3] ss:$0 sm:$0xff] }
  0x38   : > { %v372_v32 = vunpack.c.l.b16 %v339_v26  ;;  %v736_v33 = vsel %vm1069_vm12, %v735_v27, %v1044_v40  ;;  %v373_v36 = vunpack.c.l.b16 %v340_v29  ;;  %v743_v37 = vor.u32 %v742_v23, %v741_v30  ;;  %v1104_v26 = vld [vmem:[%s1194_s4] ss:$0 sm:$0xff] }
  0x39   : > { %v656_v17 = vclamps-f32 %v736_v33, 127.0  ;;  %v769_v42 = vand.u32 2147483647, %v284_v28  ;;  %v771_v43 = vcvt.f32.s32 %v284_v28  ;;  %v288_v47 = vmul.f32 %v970_v4, %v270_v34 }
  0x3a   : > { %v387_v44 = vpack.c.b16 %v373_v36, %v372_v32  ;;  %v744_v45 = vsel %vm738_vm13, %v743_v37, %v1048_v48  ;;  %v765_v40 = vand.u32 2147483647, %v764_v39  ;;  %v774_v51 = vand.u32 2147483648, %v284_v28 }
  0x3b   : > { %v343_v46 = vpack.c.bf16 %v656_v17, %v656_v17  ;;  %v657_v49 = vclamps-f32 %v744_v45, 127.0  ;;  %v772_v50 = vcvt.s32.f32 %v771_v43  ;;  %vm762_vm14 = vcmp.lt.f32.partialorder %v761_v38, 8388608.0 }
  0x3c   : > { %667 = vmatmul.msk.bf16.gmra.mxu0 %vm394_vm6, %v387_v44  ;;  %v793_v52 = vand.u32 2147483647, %v287_v35  ;;  %v795_v53 = vcvt.f32.s32 %v287_v35  ;;  %v767_v56 = vor.u32 %v766_v41, %v765_v40  ;;  %vm770_vm15 = vcmp.lt.f32.partialorder %v769_v42, 8388608.0 }
  0x3d   : > { %v344_v54 = vpack.c.bf16 %v657_v49, %v657_v49  ;;  %v376_v55 = vunpack.c.l.b16 %v343_v46  ;;  %v773_v57 = vand.u32 2147483647, %v772_v50  ;;  %v798_v59 = vand.u32 2147483648, %v287_v35 }
  0x3e   : > { %v796_v58 = vcvt.s32.f32 %v795_v53  ;;  %v803_v48 = vcvt.f32.s32 %v288_v47  ;;  %v768_v61 = vsel %vm762_vm14, %v767_v56, %v283_v13  ;;  %v801_v62 = vand.u32 2147483647, %v288_v47 }
  0x3f   : > { %v377_v60 = vunpack.c.l.b16 %v344_v54  ;;  %v775_v4 = vor.u32 %v774_v51, %v773_v57  ;;  %v660_v63 = vclamps-f32 %v768_v61, 127.0  ;;  %v806_v2 = vand.u32 2147483648, %v288_v47 }
  0x40   : > { %v797_v0 = vand.u32 2147483647, %v796_v58  ;;  %v804_v1 = vcvt.s32.f32 %v803_v48  ;;  %vm794_vm0 = vcmp.lt.f32.partialorder %v793_v52, 8388608.0  ;;  %vm802_vm1 = vcmp.lt.f32.partialorder %v801_v62, 8388608.0 }
  0x41   : > { %v389_v3 = vpack.c.b16 %v377_v60, %v376_v55  ;;  %v776_v5 = vsel %vm770_vm15, %v775_v4, %v284_v28  ;;  %v347_v7 = vpack.c.bf16 %v660_v63, %v660_v63  ;;  %vm528_vm2 = vcmask 64512  }
  0x42   : > { %v661_v6 = vclamps-f32 %v776_v5, 127.0  ;;  %v799_v8 = vor.u32 %v798_v59, %v797_v0  ;;  %v805_v9 = vand.u32 2147483647, %v804_v1 }
  0x43   : > { %669 = vmatmul.msk.bf16.gmra.mxu1 %vm394_vm6, %v389_v3  ;;  %v380_v11 = vunpack.c.l.b16 %v347_v7 }
  0x44   : > { %v348_v10 = vpack.c.bf16 %v661_v6, %v661_v6  ;;  %v800_v14 = vsel %vm794_vm0, %v799_v8, %v287_v35  ;;  %v807_v12 = vor.u32 %v806_v2, %v805_v9 }
  0x45   : > { %v664_v15 = vclamps-f32 %v800_v14, 127.0 }
  0x46   : > { %v381_v16 = vunpack.c.l.b16 %v348_v10  ;;  %v808_v18 = vsel %vm802_vm1, %v807_v12, %v288_v47 }
  0x47   : > { %v665_v19 = vclamps-f32 %v808_v18, 127.0  ;;  %v351_v20 = vpack.c.bf16 %v664_v15, %v664_v15 }
  0x48   : > { %v391_v21 = vpack.c.b16 %v381_v16, %v380_v11 }
  0x49   : > { %v352_v22 = vpack.c.bf16 %v665_v19, %v665_v19  ;;  %v384_v23 = vunpack.c.l.b16 %v351_v20 }
  0x4a   : > { %671 = vmatmul.msk.bf16.gmra.mxu2 %vm394_vm6, %v391_v21 }
  0x4b   : > { %v385_v13 = vunpack.c.l.b16 %v352_v22 }
  0x4d   : > { %v393_v24 = vpack.c.b16 %v385_v13, %v384_v23 }
  0x4f   : > { %673 = vmatmul.msk.bf16.gmra.mxu3 %vm394_vm6, %v393_v24 }
  0xa4   : > { %v432_v27 = vpop.f32.mrf.mxu0 }
  0xa5   : > { %v476_v28 = vmul.f32 %v1099_v25, %v432_v27 }
  0xa7   : > { %v496_v29 = vadd.f32 %v1104_v26, %v476_v28  ;;  %v442_v30 = vpop.f32.mrf.mxu1 }
  0xa8   : > { %v480_v31 = vmul.f32 %v1099_v25, %v442_v30 }
  0xa9   : > { %v512_v32 = vmax.f32 %v496_v29, 0.0 }
  0xaa   : > { %v500_v33 = vadd.f32 %v1104_v26, %v480_v31 }
  0xab   : > { %529 = vst.msk [vmem:[%s1111_s21] sm:$0xff] %vm528_vm2, %v512_v32 }
  0xac   : > { %v516_v34 = vmax.f32 %v500_v33, 0.0  ;;  %v434_v35 = vpop.f32.mrf.mxu0 }
  0xad   : > { %v477_v36 = vmul.f32 %v1099_v25, %v434_v35 }
  0xae   : > { %533 = vst.msk [vmem:[%s1111_s21 + $0x20] sm:$0xff] %vm528_vm2, %v516_v34 }
  0xaf   : > { %v497_v37 = vadd.f32 %v1104_v26, %v477_v36  ;;  %v444_v17 = vpop.f32.mrf.mxu1 }
  0xb0   : > { %v481_v38 = vmul.f32 %v1099_v25, %v444_v17 }
  0xb1   : > { %v513_v39 = vmax.f32 %v497_v37, 0.0 }
  0xb2   : > { %v501_v42 = vadd.f32 %v1104_v26, %v481_v38 }
  0xb3   : > { %v452_v41 = vpop.f32.mrf.mxu2  ;;  %530 = vst.msk [vmem:[%s1111_s21 + $0x8] sm:$0xff] %vm528_vm2, %v513_v39 }
  0xb4   : > { %v484_v43 = vmul.f32 %v1099_v25, %v452_v41  ;;  %v517_v44 = vmax.f32 %v501_v42, 0.0 }
  0xb6   : > { %v504_v45 = vadd.f32 %v1104_v26, %v484_v43  ;;  %534 = vst.msk [vmem:[%s1111_s21 + $0x28] sm:$0xff] %vm528_vm2, %v517_v44 }
  0xb8   : > { %v520_v46 = vmax.f32 %v504_v45, 0.0 }
  0xb9   : > { %v437_v47 = vpop.f32.mrf.mxu0 }
  0xba   : > { %537 = vst.msk [vmem:[%s1111_s21 + $0x40] sm:$0xff] %vm528_vm2, %v520_v46  ;;  %v462_v49 = vpop.f32.mrf.mxu3  ;;  %v478_v50 = vmul.f32 %v1099_v25, %v437_v47 }
  0xbb   : > { %v454_v40 = vpop.f32.mrf.mxu2  ;;  %v488_v51 = vmul.f32 %v1099_v25, %v462_v49 }
  0xbc   : > { %v485_v52 = vmul.f32 %v1099_v25, %v454_v40  ;;  %v498_v53 = vadd.f32 %v1104_v26, %v478_v50 }
  0xbd   : > { %v508_v54 = vadd.f32 %v1104_v26, %v488_v51 }
  0xbe   : > { %v505_v55 = vadd.f32 %v1104_v26, %v485_v52  ;;  %v514_v56 = vmax.f32 %v498_v53, 0.0 }
  0xbf   : > { %v524_v57 = vmax.f32 %v508_v54, 0.0 }
  0xc0   : > { %v521_v58 = vmax.f32 %v505_v55, 0.0  ;;  %531 = vst.msk [vmem:[%s1111_s21 + $0x10] sm:$0xff] %vm528_vm2, %v514_v56  ;;  %v447_v59 = vpop.f32.mrf.mxu1 }
  0xc1   : > { %541 = vst.msk [vmem:[%s1111_s21 + $0x60] sm:$0xff] %vm528_vm2, %v524_v57  ;;  %v482_v48 = vmul.f32 %v1099_v25, %v447_v59  ;;  %v439_v60 = vpop.f32.mrf.mxu0 }
  0xc2   : > { %538 = vst.msk [vmem:[%s1111_s21 + $0x48] sm:$0xff] %vm528_vm2, %v521_v58  ;;  %v464_v61 = vpop.f32.mrf.mxu3  ;;  %v479_v4 = vmul.f32 %v1099_v25, %v439_v60 }
  0xc3   : > { %v489_v62 = vmul.f32 %v1099_v25, %v464_v61  ;;  %v502_v63 = vadd.f32 %v1104_v26, %v482_v48 }
  0xc4   : > { %v499_v0 = vadd.f32 %v1104_v26, %v479_v4 }
  0xc5   : > { %v509_v1 = vadd.f32 %v1104_v26, %v489_v62  ;;  %v518_v2 = vmax.f32 %v502_v63, 0.0 }
  0xc6   : > { %v515_v3 = vmax.f32 %v499_v0, 0.0 }
  0xc7   : > { %v525_v5 = vmax.f32 %v509_v1, 0.0  ;;  %535 = vst.msk [vmem:[%s1111_s21 + $0x30] sm:$0xff] %vm528_vm2, %v518_v2 }
  0xc8   : > { %532 = vst.msk [vmem:[%s1111_s21 + $0x18] sm:$0xff] %vm528_vm2, %v515_v3  ;;  %v449_v6 = vpop.f32.mrf.mxu1 }
  0xc9   : > { %542 = vst.msk [vmem:[%s1111_s21 + $0x68] sm:$0xff] %vm528_vm2, %v525_v5  ;;  %v483_v7 = vmul.f32 %v1099_v25, %v449_v6 }
  0xcb   : > { %v503_v8 = vadd.f32 %v1104_v26, %v483_v7 }
  0xcd   : > { %v457_v9 = vpop.f32.mrf.mxu2  ;;  %v519_v10 = vmax.f32 %v503_v8, 0.0 }
  0xce   : > { %v486_v11 = vmul.f32 %v1099_v25, %v457_v9 }
  0xcf   : > { %536 = vst.msk [vmem:[%s1111_s21 + $0x38] sm:$0xff] %vm528_vm2, %v519_v10 }
  0xd0   : > { %v506_v14 = vadd.f32 %v1104_v26, %v486_v11 }
  0xd2   : > { %v522_v12 = vmax.f32 %v506_v14, 0.0  ;;  %v467_v15 = vpop.f32.mrf.mxu3 }
  0xd3   : > { %v490_v16 = vmul.f32 %v1099_v25, %v467_v15 }
  0xd4   : > { %539 = vst.msk [vmem:[%s1111_s21 + $0x50] sm:$0xff] %vm528_vm2, %v522_v12 }
  0xd5   : > { %v510_v18 = vadd.f32 %v1104_v26, %v490_v16  ;;  %v459_v19 = vpop.f32.mrf.mxu2 }
  0xd6   : > { %v487_v20 = vmul.f32 %v1099_v25, %v459_v19 }
  0xd7   : > { %v526_v21 = vmax.f32 %v510_v18, 0.0 }
  0xd8   : > { %v507_v22 = vadd.f32 %v1104_v26, %v487_v20 }
  0xd9   : > { %543 = vst.msk [vmem:[%s1111_s21 + $0x70] sm:$0xff] %vm528_vm2, %v526_v21 }
  0xda   : > { %v523_v23 = vmax.f32 %v507_v22, 0.0  ;;  %v469_v13 = vpop.f32.mrf.mxu3 }
  0xdb   : > { %v491_v24 = vmul.f32 %v1099_v25, %v469_v13 }
  0xdc   : > { %540 = vst.msk [vmem:[%s1111_s21 + $0x58] sm:$0xff] %vm528_vm2, %v523_v23 }
  0xdd   : > { %v511_v27 = vadd.f32 %v1104_v26, %v491_v24 }
  0xdf   : > { %v527_v28 = vmax.f32 %v511_v27, 0.0 }
  0xe1   : > { %544 = vst.msk [vmem:[%s1111_s21 + $0x78] sm:$0xff] %vm528_vm2, %v527_v28 }
  0xe2 PF: > { %s16_s24 = sadd.s32 1, %s889_s24   ;;  %s1218_s20 = smov %s881_s22 }
  0xe3   : > { %p13_p7 = scmp.ge.s32.totalorder %s16_s24, 6   ;;  %s1219_s21 = smov %s885_s23 }
  0xe4   : > { %s1220_s22 = smov %s1223_s0  ;;  %s1221_s23 = smov %s1227_s25 }
  0xe5   :  { %15 = sbr.rel (!%p13_p7) target bundleno = 3 (0x3), region = 71 }

// kernel: _lambda_.5
= control target key start
LH: loop header
LB: loop body
LE: loop exit
PB: predicated region body
PF: predicated region fallthrough
CT: control target
= control target key end

     0   :  { %s2219_s20 = smov 0   ;;  %s2221_s21 = smov 0   ;;  %s3200_s0 = inlined_call_operand.<no memory space> [shape: f32[1], index: 0, kind: input, shape index: {}]   ;;  %s3201_s1 = inlined_call_operand.vmem [shape: f32[2,18,18,8], index: 1, kind: input, shape index: {}]   ;;  %s3202_s2 = inlined_call_operand.vmem [shape: bf16[9,8,8], index: 2, kind: input, shape index: {}]   ;;  %s3203_s3 = inlined_call_operand.vmem [shape: f32[1,8], index: 3, kind: input, shape index: {}]   ;;  %s3204_s4 = inlined_call_operand.vmem [shape: f32[1,8], index: 4, kind: input, shape index: {}]   ;;  %s3205_s5 = inlined_call_operand.vmem [shape: f32[2,16,16,8], index: 5, kind: output, shape index: {}]  }
   0x1   :  { %10 = sst [smem:[#allocation2]] %s3200_s0  ;;  %s2223_s22 = smov 0  }
   0x2   :  { %s2225_s23 = smov 0   ;;  %s2227_s24 = smov 0  }
   0x3 LB: > { %s25_s0 = sadd.s32 1, %s2176_s22  ;;  %s28_s25 = sadd.s32 1, %s2180_s23  ;;  %s2184_s24 = sphi %s2227_s24, %s16_s24   ;;  %s2180_s23 = sphi %s2225_s23, %s3271_s23   ;;  %s2176_s22 = sphi %s2223_s22, %s3270_s22   ;;  %s2172_s21 = sphi %s2221_s21, %s3269_s21   ;;  %s2168_s20 = sphi %s2219_s20, %s3268_s20  }
   0x4   : > { %p26_p0 = scmp.ge.s32.totalorder %s25_s0, 2  ;;  %p1730_p1 = scmp.ge.s32.totalorder %s2184_s24, 1 }
   0x5   : > { %p202_p2 = scmp.lt.s32.totalorder %s2184_s24, 5 }
   0x6   : > { %s3273_s0 = smov (%p26_p0, %s25_s0), 0  ;;  %s3275_s25 = smov (!%p26_p0, %s28_s25), %s2180_s23 }
   0x7   : > { %p203_p3 = pnand %p1730_p1, %p202_p2  ;;  %p30_p4 = scmp.ge.s32.totalorder %s3275_s25, 2 }
   0x8   : > { %p235_p5 = scmp.lt.s32.totalorder (!%p203_p3), %s2172_s21, 1  ;;  %s285_s28 = sld [smem:[#allocation2]] (!%p203_p3) }
   0x9   : > { %s3277_s25 = smov (%p30_p4, %s3275_s25), 0  ;;  %206 = sbr.rel (%p203_p3) target bundleno = 535 (0x217), region = 40 }
   0xa   : > { %s1737_s29 = smul.u32 (!%p203_p3), 192, %s2168_s20  ;;  %s1732_s7 = sshll.u32 (!%p203_p3), %s2168_s20, 3 }
   0xb   : > { %p243_p6 = scmp.lt.s32.totalorder (!%p203_p3), %s1732_s7, 15 }
   0xe   : > { %v1768_v0 = vld [vmem:[%s3202_s2 + $0x4] sm:$0xf]  ;;  %vm684_vm0 = vcmask 1043456   ;;  %s3279_s21 = smov (!%p235_p5, %s2172_s21), 1  ;;  %v2264_v2 = vstv %s285_s28  ;;  %vm438_vm6 = vsmask.f32 3328 }
   0xf   : > { %v686_v1 = vsel %vm684_vm0, %v1768_v0, 0  ;;  %s1863_s30 = smul.u32 432, %s3279_s21  ;;  %vm439_vm7 = vsmask.f32 7440  ;;  %vm659_vm9 = vcmask 64512   ;;  %s3281_s7 = smov (!%p243_p6, %s1732_s7), 15 }
  0x10   : > { %1860 = vmatpush.bf16.msra.mxu1 %v686_v1  ;;  %1861 = vmatpush.bf16.msra.mxu2 %v686_v1  ;;  %vm2361_vm10 = vmor %vm438_vm6, %vm439_vm7 }
  0x11   : > { %1862 = vmatpush.bf16.msra.mxu3 %v686_v1  ;;  %695 = vmatpush.bf16.msra.mxu0 %v686_v1  ;;  %s239_s8 = scalar_lea.vmem %s3201_s1, %s1863_s30 }
  0x12   : > { %s2262_s9 = scalar_lea.vmem %s239_s8, %s1737_s29  ;;  %s1733_s8 = sshll.u32 %s3281_s7, 1 }
  0x13   : > { %v261_v3 = vld [vmem:[%s2262_s9 + $0x30] sm:$0xff]  ;;  %v262_v4 = vld [vmem:[%s2262_s9 + $0x38] sm:$0xff]  ;;  %v263_v5 = vld [vmem:[%s2262_s9 + $0x40] sm:$0x3] }
  0x14   : > { %v293_v6 = vmul.f32 %v2264_v2, %v261_v3  ;;  %v294_v7 = vmul.f32 %v2264_v2, %v262_v4  ;;  %v295_v8 = vmul.f32 %v2264_v2, %v263_v5  ;;  %v267_v9 = vld [vmem:[%s2262_s9 + $0x60] sm:$0xff]  ;;  %v268_v10 = vld [vmem:[%s2262_s9 + $0x68] sm:$0xff]  ;;  %v269_v11 = vld [vmem:[%s2262_s9 + $0x70] sm:$0x3] }
  0x15   : > { %v2276_v12 = vmul.f32 %v2264_v2, %v267_v9  ;;  %v2279_v13 = vmul.f32 %v2264_v2, %v268_v10  ;;  %v2282_v14 = vmul.f32 %v2264_v2, %v269_v11  ;;  %v273_v51 = vld [vmem:[%s2262_s9 + $0x90] sm:$0xff]  ;;  %v274_v56 = vld [vmem:[%s2262_s9 + $0x98] sm:$0xff] }
  0x16   : > { %v1912_v15 = vand.u32 2147483647, %v293_v6  ;;  %v1914_v16 = vcvt.f32.s32 %v293_v6  ;;  %v1917_v17 = vand.u32 2147483648, %v293_v6  ;;  %v1920_v18 = vand.u32 2147483647, %v294_v7 }
  0x17   : > { %v1922_v19 = vcvt.f32.s32 %v294_v7  ;;  %v1925_v20 = vand.u32 2147483648, %v294_v7  ;;  %v1928_v21 = vand.u32 2147483647, %v295_v8  ;;  %v1930_v22 = vcvt.f32.s32 %v295_v8 }
  0x18   : > { %vm2284_vm1 = vcmp.lt.f32.partialorder %v1912_v15, 8388608.0  ;;  %v1915_v24 = vcvt.s32.f32 %v1914_v16  ;;  %vm2288_vm2 = vcmp.lt.f32.partialorder %v1920_v18, 8388608.0  ;;  %v1933_v26 = vand.u32 2147483648, %v295_v8 }
  0x19   : > { %v1923_v27 = vcvt.s32.f32 %v1922_v19  ;;  %vm2292_vm3 = vcmp.lt.f32.partialorder %v1928_v21, 8388608.0  ;;  %v1931_v29 = vcvt.s32.f32 %v1930_v22  ;;  %v1960_v30 = vand.u32 2147483647, %v2276_v12 }
  0x1a   : > { %v1916_v31 = vand.u32 2147483647, %v1915_v24  ;;  %v1962_v32 = vcvt.f32.s32 %v2276_v12  ;;  %v1965_v33 = vand.u32 2147483648, %v2276_v12  ;;  %v1968_v34 = vand.u32 2147483647, %v2279_v13 }
  0x1b   : > { %v1924_v35 = vand.u32 2147483647, %v1923_v27  ;;  %v1932_v36 = vand.u32 2147483647, %v1931_v29  ;;  %vm2300_vm4 = vcmp.lt.f32.partialorder %v1960_v30, 8388608.0  ;;  %v1970_v38 = vcvt.f32.s32 %v2279_v13 }
  0x1c   : > { %v1918_v39 = vor.u32 %v1917_v17, %v1916_v31  ;;  %v1963_v40 = vcvt.s32.f32 %v1962_v32  ;;  %vm2305_vm5 = vcmp.lt.f32.partialorder %v1968_v34, 8388608.0  ;;  %v1973_v42 = vand.u32 2147483648, %v2279_v13 }
  0x1d   : > { %v1926_v43 = vor.u32 %v1925_v20, %v1924_v35  ;;  %v1934_v44 = vor.u32 %v1933_v26, %v1932_v36  ;;  %v1971_v45 = vcvt.s32.f32 %v1970_v38  ;;  %v1976_v46 = vand.u32 2147483647, %v2282_v14 }
  0x1e   : > { %v1919_v47 = vsel %vm2284_vm1, %v1918_v39, %v293_v6  ;;  %v1964_v48 = vand.u32 2147483647, %v1963_v40  ;;  %v1978_v49 = vcvt.f32.s32 %v2282_v14  ;;  %v1981_v50 = vand.u32 2147483648, %v2282_v14 }
  0x1f   : > { %v1927_v52 = vsel %vm2288_vm2, %v1926_v43, %v294_v7  ;;  %v1935_v53 = vsel %vm2292_vm3, %v1934_v44, %v295_v8  ;;  %v1744_v54 = vclamps-f32 %v1919_v47, 127.0  ;;  %v1972_v55 = vand.u32 2147483647, %v1971_v45 }
  0x20   : > { %v1745_v57 = vclamps-f32 %v1927_v52, 127.0  ;;  %v1746_v58 = vclamps-f32 %v1935_v53, 127.0  ;;  %v1966_v59 = vor.u32 %v1965_v33, %v1964_v48  ;;  %vm2321_vm8 = vcmp.lt.f32.partialorder %v1976_v46, 8388608.0 }
  0x21   : > { %v2325_v61 = vpack.c.bf16 %v1744_v54, %v1744_v54  ;;  %v1974_v62 = vor.u32 %v1973_v42, %v1972_v55  ;;  %v1979_v63 = vcvt.s32.f32 %v1978_v49  ;;  %v2328_v0 = vmul.f32 %v2264_v2, %v273_v51 }
  0x22   : > { %v2330_v1 = vpack.c.bf16 %v1745_v57, %v1745_v57  ;;  %v2332_v3 = vpack.c.bf16 %v1746_v58, %v1746_v58  ;;  %v1967_v4 = vsel %vm2300_vm4, %v1966_v59, %v2276_v12  ;;  %v2338_v5 = vmul.f32 %v2264_v2, %v274_v56  ;;  %v275_v12 = vld [vmem:[%s2262_s9 + $0xa0] sm:$0x3] }
  0x23   : > { %v490_v6 = vshrl.u32 %v2325_v61, 16  ;;  %v493_v7 = vshll.u32 %v2325_v61, 16  ;;  %v1975_v8 = vsel %vm2305_vm5, %v1974_v62, %v2279_v13  ;;  %v1980_v9 = vand.u32 2147483647, %v1979_v63  ;;  %v1802_v62 = vld [vmem:[%s3202_s2 + $0xc] sm:$0xf] }
  0x24   : > { %v499_v10 = vshll.u32 %v2330_v1, 16  ;;  %v503_v11 = vshrl.u32 %v2330_v1, 16  ;;  %v509_v15 = vshll.u32 %v2332_v3, 16  ;;  %v1750_v16 = vclamps-f32 %v1967_v4, 127.0 }
  0x25   : > { %v492_v17 = vrot.slane %v490_v6, 4  ;;  %v495_v18 = vrot.slane %v493_v7, 5  ;;  %v1982_v19 = vor.u32 %v1981_v50, %v1980_v9  ;;  %v1751_v20 = vclamps-f32 %v1975_v8, 127.0  ;;  %v1793_v6 = vld [vmem:[%s3202_s2 + $0x8] sm:$0xf]  ;;  %v255_v7 = vld [vmem:[%s2262_s9] sm:$0xff] }
  0x26   : > { %v501_v21 = vrot.slane %v499_v10, 5  ;;  %v505_v22 = vrot.slane %v503_v11, 4  ;;  %v511_v23 = vrot.slane %v509_v15, 5  ;;  %v2349_v24 = vpack.c.bf16 %v1750_v16, %v1750_v16  ;;  %v256_v15 = vld [vmem:[%s2262_s9 + $0x8] sm:$0xff]  ;;  %v257_v16 = vld [vmem:[%s2262_s9 + $0x10] sm:$0x3] }
  0x27   : > { %v496_v13 = vor.u32 %v495_v18, %v492_v17  ;;  %v1983_v25 = vsel %vm2321_vm8, %v1982_v19, %v2282_v14  ;;  %v2354_v26 = vpack.c.bf16 %v1751_v20, %v1751_v20  ;;  %v2357_v27 = vmul.f32 %v2264_v2, %v275_v12 }
  0x28   : > { %v506_v29 = vor.u32 %v505_v22, %v501_v21  ;;  %v1752_v30 = vclamps-f32 %v1983_v25, 127.0  ;;  %v538_v31 = vshrl.u32 %v2349_v24, 16  ;;  %v541_v32 = vshll.u32 %v2349_v24, 16 }
  0x29   : > { %v497_v33 = vrot.slane %v496_v13, 4  ;;  %v547_v14 = vshll.u32 %v2354_v26, 16  ;;  %v551_v34 = vshrl.u32 %v2354_v26, 16  ;;  %v2008_v35 = vand.u32 2147483647, %v2328_v0 }
  0x2a   : > { %v507_v36 = vrot.slane %v506_v29, 4  ;;  %v2370_v37 = vpack.c.bf16 %v1752_v30, %v1752_v30  ;;  %v540_v38 = vrot.slane %v538_v31, 4  ;;  %v543_v39 = vrot.slane %v541_v32, 5 }
  0x2b   : > { %v502_v40 = vsel %vm2361_vm10, %v497_v33, %v501_v21  ;;  %v549_v41 = vrot.slane %v547_v14, 5  ;;  %v553_v42 = vrot.slane %v551_v34, 4  ;;  %vm2374_vm11 = vcmp.lt.f32.partialorder %v2008_v35, 8388608.0 }
  0x2c   : > { %v512_v44 = vsel %vm2361_vm10, %v507_v36, %v511_v23  ;;  %v639_v45 = vunpack.c.l.b16 %v502_v40  ;;  %v544_v46 = vor.u32 %v543_v39, %v540_v38  ;;  %v557_v47 = vshll.u32 %v2370_v37, 16 }
  0x2d   : > { %v640_v48 = vunpack.c.l.b16 %v512_v44  ;;  %v554_v49 = vor.u32 %v553_v42, %v549_v41  ;;  %v2010_v50 = vcvt.f32.s32 %v2328_v0  ;;  %v2013_v51 = vand.u32 2147483648, %v2328_v0 }
  0x2e   : > { %v545_v52 = vrot.slane %v544_v46, 4  ;;  %v559_v53 = vrot.slane %v557_v47, 5  ;;  %v2016_v54 = vand.u32 2147483647, %v2338_v5  ;;  %v2018_v55 = vcvt.f32.s32 %v2338_v5 }
  0x2f   : > { %v2385_v56 = vpack.c.b16 %v640_v48, %v639_v45  ;;  %v555_v57 = vrot.slane %v554_v49, 4  ;;  %v2011_v58 = vcvt.s32.f32 %v2010_v50  ;;  %v2021_v59 = vand.u32 2147483648, %v2338_v5 }
  0x30   : > { %v550_v60 = vsel %vm2361_vm10, %v545_v52, %v549_v41  ;;  %vm2390_vm12 = vcmp.lt.f32.partialorder %v2016_v54, 8388608.0  ;;  %v2019_v63 = vcvt.s32.f32 %v2018_v55  ;;  %v2024_v4 = vand.u32 2147483647, %v2357_v27 }
  0x31   : > { %1771 = vmatmul.msk.bf16.vlgmr.msra.gmra.mxu1 %vm659_vm9, %v2385_v56  ;;  %v560_v8 = vsel %vm2361_vm10, %v555_v57, %v559_v53  ;;  %v643_v9 = vunpack.c.l.b16 %v550_v60  ;;  %v2012_v10 = vand.u32 2147483647, %v2011_v58  ;;  %v2026_v11 = vcvt.f32.s32 %v2357_v27 }
  0x32   : > { %v644_v12 = vunpack.c.l.b16 %v560_v8  ;;  %v2020_v17 = vand.u32 2147483647, %v2019_v63  ;;  %vm2406_vm13 = vcmp.lt.f32.partialorder %v2024_v4, 8388608.0  ;;  %v2029_v19 = vand.u32 2147483648, %v2357_v27  ;;  %v437_v8 = vld [vmem:[%s3202_s2] sm:$0xf] }
  0x33   : > { %v2014_v20 = vor.u32 %v2013_v51, %v2012_v10  ;;  %v2027_v21 = vcvt.s32.f32 %v2026_v11  ;;  %v971_v22 = vsel %vm684_vm0, %v1793_v6, 0  ;;  %v287_v23 = vmul.f32 %v2264_v2, %v255_v7 }
  0x34   : > { %v2413_v13 = vpack.c.b16 %v644_v12, %v643_v9  ;;  %v2022_v25 = vor.u32 %v2021_v59, %v2020_v17  ;;  %980 = vmatpush.bf16.msrb.mxu2 %v971_v22  ;;  %v288_v29 = vmul.f32 %v2264_v2, %v256_v15  ;;  %v2417_v30 = vmul.f32 %v2264_v2, %v257_v16 }
  0x35   : > { %v2015_v31 = vsel %vm2374_vm11, %v2014_v20, %v2328_v0  ;;  %v2028_v32 = vand.u32 2147483647, %v2027_v21  ;;  %v1864_v33 = vand.u32 2147483647, %v287_v23  ;;  %v1866_v14 = vcvt.f32.s32 %v287_v23  ;;  %v264_v20 = vld [vmem:[%s2262_s9 + $0x48] sm:$0xff]  ;;  %v265_v21 = vld [vmem:[%s2262_s9 + $0x50] sm:$0xff] }
  0x36   : > { %1773 = vmatmul.msk.bf16.vlgmr.msra.gmra.mxu2 %vm659_vm9, %v2413_v13  ;;  %v2023_v34 = vsel %vm2390_vm12, %v2022_v25, %v2338_v5  ;;  %v1756_v35 = vclamps-f32 %v2015_v31, 127.0  ;;  %v1869_v36 = vand.u32 2147483648, %v287_v23  ;;  %v1872_v38 = vand.u32 2147483647, %v288_v29 }
  0x37   : > { %v2030_v39 = vor.u32 %v2029_v19, %v2028_v32  ;;  %v1757_v40 = vclamps-f32 %v2023_v34, 127.0  ;;  %vm2427_vm14 = vcmp.lt.f32.partialorder %v1864_v33, 8388608.0  ;;  %v1867_v0 = vcvt.s32.f32 %v1866_v14  ;;  %v1811_v19 = vld [vmem:[%s3202_s2 + $0x10] sm:$0xf] }
  0x38   : > { %v2431_v42 = vpack.c.bf16 %v1756_v35, %v1756_v35  ;;  %vm2433_vm15 = vcmp.lt.f32.partialorder %v1872_v38, 8388608.0  ;;  %v1874_v44 = vcvt.f32.s32 %v288_v29  ;;  %v1877_v45 = vand.u32 2147483648, %v288_v29  ;;  %v266_v35 = vld [vmem:[%s2262_s9 + $0x58] sm:$0x3] }
  0x39   : > { %v2031_v5 = vsel %vm2406_vm13, %v2030_v39, %v2357_v27  ;;  %v2440_v46 = vpack.c.bf16 %v1757_v40, %v1757_v40  ;;  %v1868_v47 = vand.u32 2147483647, %v1867_v0  ;;  %v1880_v48 = vand.u32 2147483647, %v2417_v30 }
  0x3a   : > { %v1758_v49 = vclamps-f32 %v2031_v5, 127.0  ;;  %v586_v50 = vshrl.u32 %v2431_v42, 16  ;;  %v589_v51 = vshll.u32 %v2431_v42, 16  ;;  %v1875_v52 = vcvt.s32.f32 %v1874_v44 }
  0x3b   : > { %v595_v53 = vshll.u32 %v2440_v46, 16  ;;  %v599_v54 = vshrl.u32 %v2440_v46, 16  ;;  %v1870_v55 = vor.u32 %v1869_v36, %v1868_v47  ;;  %vm2447_vm1 = vcmp.lt.f32.partialorder %v1880_v48, 8388608.0 }
  0x3c   : > { %v2451_v27 = vpack.c.bf16 %v1758_v49, %v1758_v49  ;;  %v588_v58 = vrot.slane %v586_v50, 4  ;;  %v591_v59 = vrot.slane %v589_v51, 5  ;;  %v1876_v60 = vand.u32 2147483647, %v1875_v52 }
  0x3d   : > { %v597_v63 = vrot.slane %v595_v53, 5  ;;  %v601_v4 = vrot.slane %v599_v54, 4  ;;  %v1871_v6 = vsel %vm2427_vm14, %v1870_v55, %v287_v23  ;;  %v1882_v7 = vcvt.f32.s32 %v2417_v30 }
  0x3e   : > { %v592_v9 = vor.u32 %v591_v59, %v588_v58  ;;  %v605_v10 = vshll.u32 %v2451_v27, 16  ;;  %v1878_v11 = vor.u32 %v1877_v45, %v1876_v60  ;;  %v1885_v15 = vand.u32 2147483648, %v2417_v30 }
  0x3f   : > { %v602_v16 = vor.u32 %v601_v4, %v597_v63  ;;  %v1883_v12 = vcvt.s32.f32 %v1882_v7  ;;  %v1738_v17 = vclamps-f32 %v1871_v6, 127.0  ;;  %v1049_v18 = vsel %vm684_vm0, %v1802_v62, 0 }
  0x40   : > { %v593_v22 = vrot.slane %v592_v9, 4  ;;  %v607_v23 = vrot.slane %v605_v10, 5  ;;  %v1879_v25 = vsel %vm2433_vm15, %v1878_v11, %v288_v29  ;;  %1058 = vmatpush.bf16.msrb.mxu3 %v1049_v18  ;;  %v802_v31 = vsel %vm684_vm0, %v437_v8, 0 }
  0x41   : > { %v603_v32 = vrot.slane %v602_v16, 4  ;;  %v1884_v33 = vand.u32 2147483647, %v1883_v12  ;;  %v1739_v14 = vclamps-f32 %v1879_v25, 127.0  ;;  %v2473_v34 = vpack.c.bf16 %v1738_v17, %v1738_v17  ;;  %811 = vmatpush.bf16.msrb.mxu1 %v802_v31  ;;  %v270_v12 = vld [vmem:[%s2262_s9 + $0x78] sm:$0xff] }
  0x42   : > { %v598_v36 = vsel %vm2361_vm10, %v593_v22, %v597_v63  ;;  %v1149_v38 = vsel %vm684_vm0, %v1811_v19, 0  ;;  %v296_v39 = vmul.f32 %v2264_v2, %v264_v20  ;;  %v2481_v40 = vmul.f32 %v2264_v2, %v265_v21  ;;  %v271_v21 = vld [vmem:[%s2262_s9 + $0x80] sm:$0xff]  ;;  %v272_v22 = vld [vmem:[%s2262_s9 + $0x88] sm:$0x3] }
  0x43   : > { %v608_v29 = vsel %vm2361_vm10, %v603_v32, %v607_v23  ;;  %v647_v41 = vunpack.c.l.b16 %v598_v36  ;;  %v1886_v0 = vor.u32 %v1885_v15, %v1884_v33  ;;  %v2485_v43 = vpack.c.bf16 %v1739_v14, %v1739_v14  ;;  %1158 = vmatpush.bf16.msrb.mxu0 %v1149_v38 }
  0x44   : > { %v648_v44 = vunpack.c.l.b16 %v608_v29  ;;  %v442_v45 = vshrl.u32 %v2473_v34, 16  ;;  %v445_v5 = vshll.u32 %v2473_v34, 16  ;;  %v2490_v47 = vmul.f32 %v2264_v2, %v266_v35 }
  0x45   : > { %v1887_v48 = vsel %vm2447_vm1, %v1886_v0, %v2417_v30  ;;  %v451_v49 = vshll.u32 %v2485_v43, 16  ;;  %v455_v50 = vshrl.u32 %v2485_v43, 16  ;;  %v1936_v51 = vand.u32 2147483647, %v296_v39 }
  0x46   : > { %v2497_v52 = vpack.c.b16 %v648_v44, %v647_v41  ;;  %v1740_v53 = vclamps-f32 %v1887_v48, 127.0  ;;  %v444_v54 = vrot.slane %v442_v45, 4  ;;  %v447_v55 = vrot.slane %v445_v5, 5 }
  0x47   : > { %v453_v58 = vrot.slane %v451_v49, 5  ;;  %v457_v59 = vrot.slane %v455_v50, 4  ;;  %vm2499_vm2 = vcmp.lt.f32.partialorder %v1936_v51, 8388608.0  ;;  %v1938_v62 = vcvt.f32.s32 %v296_v39 }
  0x48   : > { %1775 = vmatmul.msk.bf16.vlgmr.msra.gmra.mxu3 %vm659_vm9, %v2497_v52  ;;  %v2505_v30 = vpack.c.bf16 %v1740_v53, %v1740_v53  ;;  %v448_v57 = vor.u32 %v447_v55, %v444_v54  ;;  %v1941_v63 = vand.u32 2147483648, %v296_v39  ;;  %v1944_v4 = vand.u32 2147483647, %v2481_v40 }
  0x49   : > { %v458_v6 = vor.u32 %v457_v59, %v453_v58  ;;  %v1939_v7 = vcvt.s32.f32 %v1938_v62  ;;  %v1946_v8 = vcvt.f32.s32 %v2481_v40  ;;  %v1949_v9 = vand.u32 2147483648, %v2481_v40 }
  0x4a   : > { %v449_v10 = vrot.slane %v448_v57, 4  ;;  %v461_v11 = vshll.u32 %v2505_v30, 16  ;;  %vm2511_vm3 = vcmp.lt.f32.partialorder %v1944_v4, 8388608.0  ;;  %v1952_v16 = vand.u32 2147483647, %v2490_v47 }
  0x4b   : > { %v459_v17 = vrot.slane %v458_v6, 4  ;;  %v1940_v18 = vand.u32 2147483647, %v1939_v7  ;;  %v1947_v19 = vcvt.s32.f32 %v1946_v8  ;;  %v1954_v20 = vcvt.f32.s32 %v2490_v47 }
  0x4c   : > { %v454_v23 = vsel %vm2361_vm10, %v449_v10, %v453_v58  ;;  %v463_v25 = vrot.slane %v461_v11, 5  ;;  %vm2522_vm4 = vcmp.lt.f32.partialorder %v1952_v16, 8388608.0  ;;  %v1957_v32 = vand.u32 2147483648, %v2490_v47 }
  0x4d   : > { %v635_v33 = vunpack.c.l.b16 %v454_v23  ;;  %v1942_v14 = vor.u32 %v1941_v63, %v1940_v18  ;;  %v1948_v35 = vand.u32 2147483647, %v1947_v19  ;;  %v1955_v36 = vcvt.s32.f32 %v1954_v20 }
  0x4e   : > { %v464_v38 = vsel %vm2361_vm10, %v459_v17, %v463_v25  ;;  %v302_v29 = vmul.f32 %v2264_v2, %v270_v12  ;;  %v303_v41 = vmul.f32 %v2264_v2, %v271_v21  ;;  %v2532_v0 = vmul.f32 %v2264_v2, %v272_v22 }
  0x4f   : > { %v636_v44 = vunpack.c.l.b16 %v464_v38  ;;  %v1943_v45 = vsel %vm2499_vm2, %v1942_v14, %v296_v39  ;;  %v1950_v5 = vor.u32 %v1949_v9, %v1948_v35  ;;  %v1956_v48 = vand.u32 2147483647, %v1955_v36  ;;  %v276_v14 = vld [vmem:[%s2262_s9 + $0xa8] sm:$0xff]  ;;  %v277_v35 = vld [vmem:[%s2262_s9 + $0xb0] sm:$0xff] }
  0x50   : > { %v1747_v49 = vclamps-f32 %v1943_v45, 127.0  ;;  %v1984_v50 = vand.u32 2147483647, %v302_v29  ;;  %v1986_v51 = vcvt.f32.s32 %v302_v29  ;;  %v1989_v53 = vand.u32 2147483648, %v302_v29 }
  0x51   : > { %v651_v54 = vpack.c.b16 %v636_v44, %v635_v33  ;;  %v1951_v55 = vsel %vm2511_vm3, %v1950_v5, %v2481_v40  ;;  %v1958_v58 = vor.u32 %v1957_v32, %v1956_v48  ;;  %v1992_v59 = vand.u32 2147483647, %v303_v41  ;;  %v278_v5 = vld [vmem:[%s2262_s9 + $0xb8] sm:$0x3] }
  0x52   : > { %v1748_v62 = vclamps-f32 %v1951_v55, 127.0  ;;  %v2539_v57 = vpack.c.bf16 %v1747_v49, %v1747_v49  ;;  %vm2541_vm5 = vcmp.lt.f32.partialorder %v1984_v50, 8388608.0  ;;  %v1987_v39 = vcvt.s32.f32 %v1986_v51 }
  0x53   : > { %1769 = vmatmul.msk.bf16.vlgmr.msra.gmra.mxu0 %vm659_vm9, %v651_v54  ;;  %v1959_v60 = vsel %vm2522_vm4, %v1958_v58, %v2490_v47  ;;  %vm2549_vm6 = vcmp.lt.f32.partialorder %v1992_v59, 8388608.0  ;;  %v1994_v40 = vcvt.f32.s32 %v303_v41  ;;  %v1997_v6 = vand.u32 2147483648, %v303_v41 }
  0x54   : > { %v1749_v7 = vclamps-f32 %v1959_v60, 127.0  ;;  %v2553_v8 = vpack.c.bf16 %v1748_v62, %v1748_v62  ;;  %v514_v9 = vshrl.u32 %v2539_v57, 16  ;;  %v517_v10 = vshll.u32 %v2539_v57, 16 }
  0x55   : > { %v1988_v11 = vand.u32 2147483647, %v1987_v39  ;;  %v1995_v15 = vcvt.s32.f32 %v1994_v40  ;;  %v2000_v16 = vand.u32 2147483647, %v2532_v0  ;;  %v2002_v47 = vcvt.f32.s32 %v2532_v0 }
  0x56   : > { %v2559_v12 = vpack.c.bf16 %v1749_v7, %v1749_v7  ;;  %v516_v17 = vrot.slane %v514_v9, 4  ;;  %v519_v18 = vrot.slane %v517_v10, 5  ;;  %v523_v19 = vshll.u32 %v2553_v8, 16 }
  0x57   : > { %v527_v20 = vshrl.u32 %v2553_v8, 16  ;;  %v1990_v21 = vor.u32 %v1989_v53, %v1988_v11  ;;  %v1996_v22 = vand.u32 2147483647, %v1995_v15  ;;  %vm2563_vm7 = vcmp.lt.f32.partialorder %v2000_v16, 8388608.0 }
  0x58   : > { %v520_v25 = vor.u32 %v519_v18, %v516_v17  ;;  %v525_v31 = vrot.slane %v523_v19, 5  ;;  %v533_v32 = vshll.u32 %v2559_v12, 16  ;;  %v2003_v33 = vcvt.s32.f32 %v2002_v47 }
  0x59   : > { %v529_v36 = vrot.slane %v527_v20, 4  ;;  %v1991_v38 = vsel %vm2541_vm5, %v1990_v21, %v302_v29  ;;  %v1998_v44 = vor.u32 %v1997_v6, %v1996_v22  ;;  %v2005_v45 = vand.u32 2147483648, %v2532_v0 }
  0x5a   : > { %v521_v48 = vrot.slane %v520_v25, 4  ;;  %v535_v49 = vrot.slane %v533_v32, 5  ;;  %v2004_v50 = vand.u32 2147483647, %v2003_v33  ;;  %v1753_v51 = vclamps-f32 %v1991_v38, 127.0 }
  0x5b   : > { %v530_v53 = vor.u32 %v529_v36, %v525_v31  ;;  %v1999_v54 = vsel %vm2549_vm6, %v1998_v44, %v303_v41  ;;  %v308_v55 = vmul.f32 %v2264_v2, %v276_v14  ;;  %v2578_v58 = vmul.f32 %v2264_v2, %v277_v35 }
  0x5c   : > { %v526_v29 = vsel %vm2361_vm10, %v521_v48, %v525_v31  ;;  %v2006_v59 = vor.u32 %v2005_v45, %v2004_v50  ;;  %v1754_v62 = vclamps-f32 %v1999_v54, 127.0  ;;  %v2582_v63 = vpack.c.bf16 %v1753_v51, %v1753_v51  ;;  %v259_v54 = vld [vmem:[%s2262_s9 + $0x20] sm:$0xff] }
  0x5d   : > { %v531_v39 = vrot.slane %v530_v53, 4  ;;  %v641_v60 = vunpack.c.l.b16 %v526_v29  ;;  %v2585_v40 = vmul.f32 %v2264_v2, %v278_v5  ;;  %v2032_v6 = vand.u32 2147483647, %v308_v55  ;;  %v258_v53 = vld [vmem:[%s2262_s9 + $0x18] sm:$0xff] }
  0x5e   : > { %v2007_v41 = vsel %vm2563_vm7, %v2006_v59, %v2532_v0  ;;  %v2590_v4 = vpack.c.bf16 %v1754_v62, %v1754_v62  ;;  %v562_v7 = vshrl.u32 %v2582_v63, 16  ;;  %v565_v9 = vshll.u32 %v2582_v63, 16 }
  0x5f   : > { %v536_v10 = vsel %vm2361_vm10, %v531_v39, %v535_v49  ;;  %v1755_v11 = vclamps-f32 %v2007_v41, 127.0  ;;  %vm2596_vm8 = vcmp.lt.f32.partialorder %v2032_v6, 8388608.0  ;;  %v2034_v16 = vcvt.f32.s32 %v308_v55 }
  0x60   : > { %v642_v47 = vunpack.c.l.b16 %v536_v10  ;;  %v564_v17 = vrot.slane %v562_v7, 4  ;;  %v567_v18 = vrot.slane %v565_v9, 5  ;;  %v571_v0 = vshll.u32 %v2590_v4, 16 }
  0x61   : > { %v2601_v19 = vpack.c.bf16 %v1755_v11, %v1755_v11  ;;  %v575_v20 = vshrl.u32 %v2590_v4, 16  ;;  %v2035_v21 = vcvt.s32.f32 %v2034_v16  ;;  %v2037_v22 = vand.u32 2147483648, %v308_v55 }
  0x62   : > { %v2604_v23 = vpack.c.b16 %v642_v47, %v641_v60  ;;  %v568_v25 = vor.u32 %v567_v18, %v564_v17  ;;  %v573_v31 = vrot.slane %v571_v0, 5  ;;  %v2040_v32 = vand.u32 2147483647, %v2578_v58  ;;  %v260_v60 = vld [vmem:[%s2262_s9 + $0x28] sm:$0x3] }
  0x63   : > { %v577_v33 = vrot.slane %v575_v20, 4  ;;  %v581_v14 = vshll.u32 %v2601_v19, 16  ;;  %v2036_v35 = vand.u32 2147483647, %v2035_v21  ;;  %v2042_v36 = vcvt.f32.s32 %v2578_v58 }
  0x64   : > { %1772 = vmatmul.msk.bf16.gmra.mxu1 %vm659_vm9, %v2604_v23  ;;  %v569_v38 = vrot.slane %v568_v25, 4  ;;  %vm2611_vm11 = vcmp.lt.f32.partialorder %v2040_v32, 8388608.0  ;;  %v2045_v45 = vand.u32 2147483648, %v2578_v58  ;;  %v2048_v5 = vand.u32 2147483647, %v2585_v40 }
  0x65   : > { %v578_v48 = vor.u32 %v577_v33, %v573_v31  ;;  %v583_v49 = vrot.slane %v581_v14, 5  ;;  %v2038_v50 = vor.u32 %v2037_v22, %v2036_v35  ;;  %v2043_v51 = vcvt.s32.f32 %v2042_v36 }
  0x66   : > { %v574_v29 = vsel %vm2361_vm10, %v569_v38, %v573_v31  ;;  %vm2621_vm12 = vcmp.lt.f32.partialorder %v2048_v5, 8388608.0  ;;  %v2050_v62 = vcvt.f32.s32 %v2585_v40  ;;  %v2053_v39 = vand.u32 2147483648, %v2585_v40 }
  0x67   : > { %v579_v6 = vrot.slane %v578_v48, 4  ;;  %v645_v41 = vunpack.c.l.b16 %v574_v29  ;;  %v2039_v7 = vsel %vm2596_vm8, %v2038_v50, %v308_v55  ;;  %v2044_v9 = vand.u32 2147483647, %v2043_v51 }
  0x68   : > { %v2051_v10 = vcvt.s32.f32 %v2050_v62  ;;  %v1759_v11 = vclamps-f32 %v2039_v7, 127.0  ;;  %v290_v16 = vmul.f32 %v2264_v2, %v258_v53  ;;  %v291_v47 = vmul.f32 %v2264_v2, %v259_v54 }
  0x69   : > { %v584_v17 = vsel %vm2361_vm10, %v579_v6, %v583_v49  ;;  %v2046_v18 = vor.u32 %v2045_v45, %v2044_v9  ;;  %v2635_v0 = vmul.f32 %v2264_v2, %v260_v60  ;;  %v753_v20 = vunpack.c.l.b16 %v2473_v34 }
  0x6a   : > { %v646_v21 = vunpack.c.l.b16 %v584_v17  ;;  %v2052_v22 = vand.u32 2147483647, %v2051_v10  ;;  %v2638_v15 = vpack.c.bf16 %v1759_v11, %v1759_v11  ;;  %v1888_v55 = vand.u32 2147483647, %v290_v16 }
  0x6b   : > { %v2047_v25 = vsel %vm2611_vm11, %v2046_v18, %v2578_v58  ;;  %v1890_v31 = vcvt.f32.s32 %v290_v16  ;;  %v1893_v32 = vand.u32 2147483648, %v290_v16  ;;  %v1896_v33 = vand.u32 2147483647, %v291_v47 }
  0x6c   : > { %v2643_v14 = vpack.c.b16 %v646_v21, %v645_v41  ;;  %v2054_v35 = vor.u32 %v2053_v39, %v2052_v22  ;;  %v1760_v36 = vclamps-f32 %v2047_v25, 127.0  ;;  %v610_v38 = vshrl.u32 %v2638_v15, 16 }
  0x6d   : > { %v613_v45 = vshll.u32 %v2638_v15, 16  ;;  %vm2647_vm13 = vcmp.lt.f32.partialorder %v1888_v55, 8388608.0  ;;  %v1891_v48 = vcvt.s32.f32 %v1890_v31  ;;  %vm2651_vm14 = vcmp.lt.f32.partialorder %v1896_v33, 8388608.0 }
  0x6e   : > { %1774 = vmatmul.msk.bf16.gmra.mxu2 %vm659_vm9, %v2643_v14  ;;  %v2055_v58 = vsel %vm2621_vm12, %v2054_v35, %v2585_v40  ;;  %v2660_v44 = vpack.c.bf16 %v1760_v36, %v1760_v36  ;;  %v612_v50 = vrot.slane %v610_v38, 4  ;;  %v1898_v51 = vcvt.f32.s32 %v291_v47 }
  0x6f   : > { %v1761_v53 = vclamps-f32 %v2055_v58, 127.0  ;;  %v615_v54 = vrot.slane %v613_v45, 5  ;;  %v1892_v29 = vand.u32 2147483647, %v1891_v48  ;;  %v1901_v62 = vand.u32 2147483648, %v291_v47 }
  0x70   : > { %v619_v39 = vshll.u32 %v2660_v44, 16  ;;  %v623_v60 = vshrl.u32 %v2660_v44, 16  ;;  %v1899_v6 = vcvt.s32.f32 %v1898_v51  ;;  %v1904_v41 = vand.u32 2147483647, %v2635_v0 }
  0x71   : > { %v2665_v7 = vpack.c.bf16 %v1761_v53, %v1761_v53  ;;  %v616_v9 = vor.u32 %v615_v54, %v612_v50  ;;  %v1894_v59 = vor.u32 %v1893_v32, %v1892_v29  ;;  %v1906_v40 = vcvt.f32.s32 %v2635_v0 }
  0x72   : > { %v621_v10 = vrot.slane %v619_v39, 5  ;;  %v625_v11 = vrot.slane %v623_v60, 4  ;;  %v1900_v17 = vand.u32 2147483647, %v1899_v6  ;;  %vm2668_vm15 = vcmp.lt.f32.partialorder %v1904_v41, 8388608.0 }
  0x73   : > { %v617_v21 = vrot.slane %v616_v9, 4  ;;  %v629_v22 = vshll.u32 %v2665_v7, 16  ;;  %v1895_v55 = vsel %vm2647_vm13, %v1894_v59, %v290_v16  ;;  %v1907_v25 = vcvt.s32.f32 %v1906_v40 }
  0x74   : > { %v626_v31 = vor.u32 %v625_v11, %v621_v10  ;;  %v1902_v33 = vor.u32 %v1901_v62, %v1900_v17  ;;  %v1909_v32 = vand.u32 2147483648, %v2635_v0  ;;  %v1741_v35 = vclamps-f32 %v1895_v55, 127.0 }
  0x75   : > { %v622_v36 = vsel %vm2361_vm10, %v617_v21, %v621_v10  ;;  %v631_v38 = vrot.slane %v629_v22, 5  ;;  %v1908_v45 = vand.u32 2147483647, %v1907_v25  ;;  %v754_v48 = vunpack.c.l.b16 %v2485_v43 }
  0x76   : > { %v627_v58 = vrot.slane %v626_v31, 4  ;;  %v649_v50 = vunpack.c.l.b16 %v622_v36  ;;  %v1903_v51 = vsel %vm2651_vm14, %v1902_v33, %v291_v47  ;;  %v2681_v5 = vpack.c.bf16 %v1741_v35, %v1741_v35  ;;  %v1821_v33 = vld [vmem:[%s3202_s2 + $0x14] sm:$0xf] }
  0x77   : > { %v1910_v16 = vor.u32 %v1909_v32, %v1908_v45  ;;  %v1742_v53 = vclamps-f32 %v1903_v51, 127.0  ;;  %v769_v54 = vpack.c.b16 %v754_v48, %v753_v20  ;;  %vm861_vm1 = vcmask 1042432  }
  0x78   : > { %v632_v29 = vsel %vm2361_vm10, %v627_v58, %v631_v38  ;;  %v466_v62 = vshrl.u32 %v2681_v5, 16  ;;  %v469_v39 = vshll.u32 %v2681_v5, 16  ;;  %vm862_vm2 = vcmask 1046532   ;;  %v1849_v38 = vld [vmem:[%s3202_s2 + $0x20] sm:$0xf] }
  0x79   : > { %v650_v60 = vunpack.c.l.b16 %v632_v29  ;;  %v1911_v49 = vsel %vm2668_vm15, %v1910_v16, %v2635_v0  ;;  %v411_v47 = vpack.c.bf16 %v1742_v53, %v1742_v53  ;;  %1777 = vmatmul.msk.bf16.vlgmr.msrb.gmra.mxu1 %vm659_vm9, %v769_v54  ;;  %vm2691_vm3 = vmor %vm861_vm1, %vm862_vm2  ;;  %v1785_v20 = vrot.slane %v2473_v34, 9  ;;  %v1830_v34 = vld [vmem:[%s3202_s2 + $0x18] sm:$0xf] }
  0x7a   : > { %v1743_v41 = vclamps-f32 %v1911_v49, 127.0  ;;  %v468_v9 = vrot.slane %v466_v62, 4  ;;  %v471_v59 = vrot.slane %v469_v39, 5  ;;  %v866_v40 = vrot.slane %v2485_v43, 5  ;;  %v1839_v43 = vld [vmem:[%s3202_s2 + $0x1c] sm:$0xf] }
  0x7b   : > { %v2697_v10 = vpack.c.b16 %v650_v60, %v649_v50  ;;  %v475_v11 = vshll.u32 %v411_v47, 16  ;;  %v479_v17 = vshrl.u32 %v411_v47, 16  ;;  %v869_v0 = vrot.slane %v2505_v30, 5 }
  0x7c   : > { %v412_v18 = vpack.c.bf16 %v1743_v41, %v1743_v41  ;;  %v472_v21 = vor.u32 %v471_v59, %v468_v9  ;;  %v867_v22 = vsel %vm2691_vm3, %v1785_v20, %v866_v40  ;;  %v868_v55 = vrot.slane %v866_v40, 4 }
  0x7d   : > { %1776 = vmatmul.msk.bf16.gmra.mxu3 %vm659_vm9, %v2697_v10  ;;  %v477_v25 = vrot.slane %v475_v11, 5  ;;  %v481_v31 = vrot.slane %v479_v17, 4  ;;  %v922_v30 = vunpack.c.l.b16 %v867_v22  ;;  %v1311_v58 = vsel %vm684_vm0, %v1830_v34, 0 }
  0x7e   : > { %v473_v32 = vrot.slane %v472_v21, 4  ;;  %v485_v35 = vshll.u32 %v412_v18, 16  ;;  %v870_v36 = vsel %vm2691_vm3, %v868_v55, %v869_v0  ;;  %v1411_v50 = vsel %vm684_vm0, %v1839_v43, 0  ;;  %1320 = vmatpush.bf16.msra.mxu2 %v1311_v58 }
  0x7f   : > { %v482_v45 = vor.u32 %v481_v31, %v477_v25  ;;  %v923_v48 = vunpack.c.l.b16 %v870_v36  ;;  %1420 = vmatpush.bf16.msra.mxu3 %v1411_v50  ;;  %v1233_v53 = vsel %vm684_vm0, %v1821_v33, 0  ;;  %v1495_v62 = vsel %vm684_vm0, %v1849_v38, 0 }
  0x80   : > { %v478_v51 = vsel %vm2361_vm10, %v473_v32, %v477_v25  ;;  %v487_v16 = vrot.slane %v485_v35, 5  ;;  %1242 = vmatpush.bf16.msra.mxu1 %v1233_v53  ;;  %1504 = vmatpush.bf16.msra.mxu0 %v1495_v62  ;;  %v873_v60 = vrot.slane %v411_v47, 5  ;;  %v755_v20 = vunpack.c.l.b16 %v2681_v5 }
  0x81   : > { %v483_v54 = vrot.slane %v482_v45, 4  ;;  %v938_v29 = vpack.c.b16 %v923_v48, %v922_v30  ;;  %v637_v39 = vunpack.c.l.b16 %v478_v51  ;;  %v756_v41 = vunpack.c.l.b16 %v411_v47 }
  0x82   : > { %v1786_v59 = vrot.slane %v2681_v5, 9  ;;  %v875_v40 = vrot.slane %v873_v60, 4  ;;  %v876_v11 = vrot.slane %v412_v18, 5  ;;  %v880_v5 = vrot.slane %v2330_v1, 5 }
  0x83   : > { %v488_v49 = vsel %vm2361_vm10, %v483_v54, %v487_v16  ;;  %1794 = vmatmul.msk.bf16.vlgmr.msrb.gmra.mxu2 %vm659_vm9, %v938_v29  ;;  %v770_v0 = vpack.c.b16 %v756_v41, %v755_v20  ;;  %v757_v18 = vunpack.c.l.b16 %v2325_v61  ;;  %v758_v43 = vunpack.c.l.b16 %v2330_v1 }
  0x84   : > { %v638_v9 = vunpack.c.l.b16 %v488_v49  ;;  %v874_v21 = vsel %vm2691_vm3, %v1786_v59, %v873_v60  ;;  %v877_v22 = vsel %vm2691_vm3, %v875_v40, %v876_v11  ;;  %v1787_v25 = vrot.slane %v2325_v61, 9 }
  0x85   : > { %v924_v55 = vunpack.c.l.b16 %v874_v21  ;;  %v925_v34 = vunpack.c.l.b16 %v877_v22  ;;  %v882_v31 = vrot.slane %v880_v5, 4  ;;  %v883_v30 = vrot.slane %v2332_v3, 5 }
  0x86   : > { %v652_v17 = vpack.c.b16 %v638_v9, %v637_v39  ;;  %v2745_v33 = vpack.c.b16 %v758_v43, %v757_v18  ;;  %v881_v32 = vsel %vm2691_vm3, %v1787_v25, %v880_v5  ;;  %v887_v3 = vrot.slane %v2553_v8, 5  ;;  %v279_v5 = vld [vmem:[%s2262_s9 + $0xc0] sm:$0xff]  ;;  %v280_v18 = vld [vmem:[%s2262_s9 + $0xc8] sm:$0xff] }
  0x87   : > { %v2736_v47 = vpack.c.b16 %v925_v34, %v924_v55  ;;  %v884_v35 = vsel %vm2691_vm3, %v882_v31, %v883_v30  ;;  %v926_v36 = vunpack.c.l.b16 %v881_v32  ;;  %v759_v38 = vunpack.c.l.b16 %v2539_v57 }
  0x88   : > { %1770 = vmatmul.msk.bf16.gmra.mxu0 %vm659_vm9, %v652_v17  ;;  %v927_v1 = vunpack.c.l.b16 %v884_v35  ;;  %v760_v45 = vunpack.c.l.b16 %v2553_v8  ;;  %v1788_v48 = vrot.slane %v2539_v57, 9  ;;  %v889_v58 = vrot.slane %v887_v3, 4 }
  0x89   : > { %1778 = vmatmul.msk.bf16.gmra.mxu1 %vm659_vm9, %v770_v0  ;;  %v890_v50 = vrot.slane %v2559_v12, 5  ;;  %v894_v12 = vrot.slane %v2354_v26, 5  ;;  %v761_v29 = vunpack.c.l.b16 %v2349_v24  ;;  %v762_v62 = vunpack.c.l.b16 %v2354_v26 }
  0x8a   : > { %v2756_v61 = vpack.c.b16 %v927_v1, %v926_v36  ;;  %v2765_v51 = vpack.c.b16 %v760_v45, %v759_v38  ;;  %v888_v16 = vsel %vm2691_vm3, %v1788_v48, %v887_v3  ;;  %v1789_v39 = vrot.slane %v2349_v24, 9  ;;  %v281_v3 = vld [vmem:[%s2262_s9 + $0xd0] sm:$0x3] }
  0x8b   : > { %v891_v53 = vsel %vm2691_vm3, %v889_v58, %v890_v50  ;;  %v928_v8 = vunpack.c.l.b16 %v888_v16  ;;  %v896_v60 = vrot.slane %v894_v12, 4  ;;  %v897_v49 = vrot.slane %v2370_v37, 5 }
  0x8c   : > { %v929_v54 = vunpack.c.l.b16 %v891_v53  ;;  %v2786_v20 = vpack.c.b16 %v762_v62, %v761_v29  ;;  %v895_v41 = vsel %vm2691_vm3, %v1789_v39, %v894_v12  ;;  %v901_v37 = vrot.slane %v2590_v4, 5 }
  0x8d   : > { %1803 = vmatmul.msk.bf16.vlgmr.msrb.gmra.mxu3 %vm659_vm9, %v770_v0  ;;  %v898_v9 = vsel %vm2691_vm3, %v896_v60, %v897_v49  ;;  %v930_v26 = vunpack.c.l.b16 %v895_v41  ;;  %v763_v40 = vunpack.c.l.b16 %v2582_v63  ;;  %v764_v11 = vunpack.c.l.b16 %v2590_v4 }
  0x8e   : > { %v2777_v57 = vpack.c.b16 %v929_v54, %v928_v8  ;;  %v931_v59 = vunpack.c.l.b16 %v898_v9  ;;  %v903_v0 = vrot.slane %v901_v37, 4  ;;  %v904_v21 = vrot.slane %v2601_v19, 5 }
  0x8f   : > { %v2807_v22 = vpack.c.b16 %v764_v11, %v763_v40  ;;  %v311_v19 = vmul.f32 %v2264_v2, %v279_v5  ;;  %v312_v43 = vmul.f32 %v2264_v2, %v280_v18  ;;  %v908_v30 = vrot.slane %v2440_v46, 5 }
  0x90   : > { %v2798_v24 = vpack.c.b16 %v931_v59, %v930_v26  ;;  %v905_v34 = vsel %vm2691_vm3, %v903_v0, %v904_v21  ;;  %v765_v36 = vunpack.c.l.b16 %v2431_v42  ;;  %v766_v1 = vunpack.c.l.b16 %v2440_v46 }
  0x91   : > { %v2058_v32 = vcvt.f32.s32 %v311_v19  ;;  %v2066_v35 = vcvt.f32.s32 %v312_v43  ;;  %v1791_v38 = vrot.slane %v2431_v42, 9  ;;  %v910_v45 = vrot.slane %v908_v30, 4 }
  0x92   : > { %v911_v48 = vrot.slane %v2451_v27, 5  ;;  %v313_v16 = vmul.f32 %v2264_v2, %v281_v3  ;;  %v2836_v53 = vpack.c.b16 %v766_v1, %v765_v36  ;;  %v2061_v54 = vand.u32 2147483648, %v311_v19 }
  0x93   : > { %1795 = vmatmul.msk.bf16.gmra.mxu2 %vm659_vm9, %v2736_v47  ;;  %v2059_v58 = vcvt.s32.f32 %v2058_v32  ;;  %v2067_v50 = vcvt.s32.f32 %v2066_v35  ;;  %v909_v8 = vsel %vm2691_vm3, %v1791_v38, %v908_v30  ;;  %v2056_v12 = vand.u32 2147483647, %v311_v19 }
  0x94   : > { %v912_v46 = vsel %vm2691_vm3, %v910_v45, %v911_v48  ;;  %v2069_v62 = vand.u32 2147483648, %v312_v43  ;;  %v2074_v39 = vcvt.f32.s32 %v313_v16  ;;  %v934_v60 = vunpack.c.l.b16 %v909_v8 }
  0x95   : > { %v2060_v27 = vand.u32 2147483647, %v2059_v58  ;;  %v2068_v29 = vand.u32 2147483647, %v2067_v50  ;;  %v935_v49 = vunpack.c.l.b16 %v912_v46  ;;  %v2064_v41 = vand.u32 2147483647, %v312_v43 }
  0x96   : > { %vm2852_vm0 = vcmp.lt.f32.partialorder %v2056_v12, 8388608.0  ;;  %v2075_v40 = vcvt.s32.f32 %v2074_v39  ;;  %v768_v5 = vunpack.c.l.b16 %v2660_v44  ;;  %v2072_v18 = vand.u32 2147483647, %v313_v16 }
  0x97   : > { %v2062_v9 = vor.u32 %v2061_v54, %v2060_v27  ;;  %v2856_v11 = vpack.c.b16 %v935_v49, %v934_v60  ;;  %vm2065_vm4 = vcmp.lt.f32.partialorder %v2064_v41, 8388608.0  ;;  %v1792_v30 = vrot.slane %v2638_v15, 9 }
  0x98   : > { %1812 = vmatmul.msk.bf16.vlgmr.msrb.gmra.mxu0 %vm659_vm9, %v652_v17  ;;  %v1790_v17 = vrot.slane %v2582_v63, 9  ;;  %v933_v63 = vunpack.c.l.b16 %v905_v34  ;;  %v2076_v34 = vand.u32 2147483647, %v2075_v40  ;;  %v918_v35 = vrot.slane %v2665_v7, 5 }
  0x99   : > { %1779 = vmatmul.msk.bf16.gmra.mxu1 %vm659_vm9, %v2745_v33  ;;  %v2063_v0 = vsel %vm2852_vm0, %v2062_v9, %v311_v19  ;;  %vm2871_vm5 = vcmp.lt.f32.partialorder %v2072_v18, 8388608.0 }
  0x9a   : > { %v902_v55 = vsel %vm2691_vm3, %v1790_v17, %v901_v37  ;;  %v2070_v37 = vor.u32 %v2069_v62, %v2068_v29  ;;  %v915_v17 = vrot.slane %v2660_v44, 5  ;;  %v1762_v36 = vclamps-f32 %v2063_v0, 127.0 }
  0x9b   : > { %v932_v4 = vunpack.c.l.b16 %v902_v55 }
  0x9c   : > { %v2071_v55 = vsel %vm2065_vm4, %v2070_v37, %v312_v43  ;;  %v917_v32 = vrot.slane %v915_v17, 4  ;;  %v2883_v7 = vpack.c.bf16 %v1762_v36, %v1762_v36 }
  0x9d   : > { %1804 = vmatmul.msk.bf16.gmra.mxu3 %vm659_vm9, %v2745_v33  ;;  %v2823_v25 = vpack.c.b16 %v933_v63, %v932_v4  ;;  %v2077_v4 = vand.u32 2147483648, %v313_v16  ;;  %v767_v63 = vunpack.c.l.b16 %v2638_v15  ;;  %v1763_v19 = vclamps-f32 %v2071_v55, 127.0 }
  0x9e   : > { %v916_v15 = vsel %vm2691_vm3, %v1792_v30, %v915_v17  ;;  %v919_v44 = vsel %vm2691_vm3, %v917_v32, %v918_v35  ;;  %v1117_v46 = vshrl.u32 %v2883_v7, 16  ;;  %v1120_v27 = vshll.u32 %v2883_v7, 16 }
  0x9f   : > { %v2078_v1 = vor.u32 %v2077_v4, %v2076_v34  ;;  %v2869_v3 = vpack.c.b16 %v768_v5, %v767_v63  ;;  %v2887_v45 = vpack.c.bf16 %v1763_v19, %v1763_v19  ;;  %v936_v58 = vunpack.c.l.b16 %v916_v15 }
  0xa0   : > { %v937_v50 = vunpack.c.l.b16 %v919_v44  ;;  %v1122_v60 = vrot.slane %v1120_v27, 5  ;;  %v1042_v17 = vunpack.c.l.b16 %v2883_v7 }
  0xa1   : > { %v2079_v48 = vsel %vm2871_vm5, %v2078_v1, %v313_v16  ;;  %v1126_v29 = vshll.u32 %v2887_v45, 16  ;;  %v1130_v62 = vshrl.u32 %v2887_v45, 16  ;;  %v1119_v16 = vrot.slane %v1117_v46, 4 }
  0xa2   : > { %v1764_v12 = vclamps-f32 %v2079_v48, 127.0  ;;  %v2901_v39 = vpack.c.b16 %v937_v50, %v936_v58  ;;  %v1043_v0 = vunpack.c.l.b16 %v2887_v45 }
  0xa3   : > { %1796 = vmatmul.msk.bf16.gmra.mxu2 %vm659_vm9, %v2756_v61  ;;  %v1128_v9 = vrot.slane %v1126_v29, 5  ;;  %v1132_v59 = vrot.slane %v1130_v62, 4  ;;  %v1123_v40 = vor.u32 %v1122_v60, %v1119_v16 }
  0xa4   : > { %v2903_v41 = vpack.c.bf16 %v1764_v12, %v1764_v12  ;;  %v2916_v18 = vpack.c.b16 %v1043_v0, %v1042_v17 }
  0xa5   : > { %v1133_v55 = vor.u32 %v1132_v59, %v1128_v9  ;;  %v1124_v30 = vrot.slane %v1123_v40, 4 }
  0xa6   : > { %v1136_v34 = vshll.u32 %v2903_v41, 16 }
  0xa7   : > { %v1134_v32 = vrot.slane %v1133_v55, 4  ;;  %v1129_v1 = vsel %vm2361_vm10, %v1124_v30, %v1128_v9 }
  0xa8   : > { %1813 = vmatmul.msk.bf16.gmra.mxu0 %vm659_vm9, %v2385_v56  ;;  %v1138_v35 = vrot.slane %v1136_v34, 5  ;;  %v1142_v48 = vunpack.c.l.b16 %v1129_v1 }
  0xa9   : > { %1780 = vmatmul.msk.bf16.gmra.mxu1 %vm659_vm9, %v2765_v51 }
  0xaa   : > { %v1139_v43 = vsel %vm2361_vm10, %v1134_v32, %v1138_v35 }
  0xab   : > { %v1143_v58 = vunpack.c.l.b16 %v1139_v43 }
  0xad   : > { %1805 = vmatmul.msk.bf16.gmra.mxu3 %vm659_vm9, %v2765_v51 }
  0xae   : > { %v2825_v31 = vpop.f32.mrf.mxu1 }
  0xb3   : > { %1797 = vmatmul.msk.bf16.gmra.mxu2 %vm659_vm9, %v2777_v57 }
  0xb6   : > { %v2846_v42 = vpop.f32.mrf.mxu1 }
  0xb8   : > { %1814 = vmatmul.msk.bf16.gmra.mxu0 %vm659_vm9, %v2604_v23 }
  0xb9   : > { %1781 = vmatmul.msk.bf16.gmra.mxu1 %vm659_vm9, %v2786_v20  ;;  %v2850_v26 = vpop.f32.mrf.mxu2 }
  0xbd   : > { %1806 = vmatmul.msk.bf16.gmra.mxu3 %vm659_vm9, %v2786_v20 }
  0xc1   : > { %v2877_v38 = vpop.f32.mrf.mxu2 }
  0xc3   : > { %1798 = vmatmul.msk.bf16.gmra.mxu2 %vm659_vm9, %v2798_v24 }
  0xc8   : > { %1815 = vmatmul.msk.bf16.gmra.mxu0 %vm659_vm9, %v2413_v13 }
  0xc9   : > { %1782 = vmatmul.msk.bf16.gmra.mxu1 %vm659_vm9, %v2807_v22 }
  0xcb   : > { %v2891_v8 = vpop.f32.mrf.mxu3 }
  0xcd   : > { %1807 = vmatmul.msk.bf16.gmra.mxu3 %vm659_vm9, %v2807_v22 }
  0xd0   : > { %v697_v49 = vpop.f32.mrf.mxu0 }
  0xd3   : > { %1799 = vmatmul.msk.bf16.gmra.mxu2 %vm659_vm9, %v2823_v25  ;;  %v2912_v4 = vpop.f32.mrf.mxu3 }
  0xd8   : > { %1816 = vmatmul.msk.bf16.gmra.mxu0 %vm659_vm9, %v2643_v14  ;;  %v699_v36 = vpop.f32.mrf.mxu0 }
  0xd9   : > { %1783 = vmatmul.msk.bf16.gmra.mxu1 %vm659_vm9, %v2836_v53 }
  0xdd   : > { %1808 = vmatmul.msk.bf16.gmra.mxu3 %vm659_vm9, %v2836_v53 }
  0xe1   : > { %v2861_v21 = vpop.f32.mrf.mxu1 }
  0xe3   : > { %1800 = vmatmul.msk.bf16.gmra.mxu2 %vm659_vm9, %v2856_v11 }
  0xe8   : > { %1817 = vmatmul.msk.bf16.gmra.mxu0 %vm659_vm9, %v2497_v52 }
  0xe9   : > { %1784 = vmatmul.msk.bf16.gmra.mxu1 %vm659_vm9, %v2869_v3  ;;  %v2895_v54 = vpop.f32.mrf.mxu1 }
  0xed   : > { %1809 = vmatmul.msk.bf16.gmra.mxu3 %vm659_vm9, %v2869_v3 }
  0xf1   : > { %v2905_v37 = vpop.f32.mrf.mxu2 }
  0xf3   : > { %1801 = vmatmul.msk.bf16.gmra.mxu2 %vm659_vm9, %v2901_v39 }
  0xf6   : > { %v813_v63 = vpop.f32.mrf.mxu1 }
  0xf7   : > { %v814_v5 = vadd.f32 %v813_v63, %v697_v49 }
  0xf8   : > { %1818 = vmatmul.msk.bf16.gmra.mxu0 %vm659_vm9, %v2697_v10 }
  0xf9   : > { %1822 = vmatmul.msk.bf16.vlgmr.msra.gmra.mxu1 %vm659_vm9, %v2736_v47  ;;  %v2920_v19 = vpop.f32.mrf.mxu2  ;;  %v2932_v47 = vpack.c.b16 %v1143_v58, %v1142_v48 }
  0xfd   : > { %1810 = vmatmul.msk.bf16.gmra.mxu3 %vm659_vm9, %v2916_v18 }
  0xfe   : > { %v815_v15 = vpop.f32.mrf.mxu1 }
  0xff   : > { %v816_v44 = vadd.f32 %v815_v15, %v699_v36 }
 0x100   : > { %v2928_v50 = vpop.f32.mrf.mxu3 }
 0x103   : > { %1831 = vmatmul.msk.bf16.vlgmr.msra.gmra.mxu2 %vm659_vm9, %v2745_v33 }
 0x105   : > { %v702_v46 = vpop.f32.mrf.mxu0 }
 0x106   : > { %v982_v27 = vpop.f32.mrf.mxu2  ;;  %v818_v12 = vpop.f32.mrf.mxu1 }
 0x107   : > { %v1022_v29 = vadd.f32 %v982_v27, %v814_v5  ;;  %v819_v62 = vadd.f32 %v818_v12, %v702_v46 }
 0x108   : > { %1819 = vmatmul.msk.bf16.gmra.mxu0 %vm659_vm9, %v2932_v47  ;;  %v2936_v16 = vpop.f32.mrf.mxu3 }
 0x109   : > { %1823 = vmatmul.msk.bf16.gmra.mxu1 %vm659_vm9, %v2756_v61 }
 0x10d   : > { %v704_v60 = vpop.f32.mrf.mxu0  ;;  %1840 = vmatmul.msk.bf16.vlgmr.msra.gmra.mxu3 %vm659_vm9, %v2385_v56 }
 0x10e   : > { %v984_v33 = vpop.f32.mrf.mxu2  ;;  %v820_v49 = vpop.f32.mrf.mxu1 }
 0x10f   : > { %v1023_v9 = vadd.f32 %v984_v33, %v816_v44  ;;  %v821_v59 = vadd.f32 %v820_v49, %v704_v60 }
 0x110   : > { %v1060_v40 = vpop.f32.mrf.mxu3 }
 0x111   : > { %v1100_v17 = vadd.f32 %v1060_v40, %v1022_v29 }
 0x113   : > { %1832 = vmatmul.msk.bf16.gmra.mxu2 %vm659_vm9, %v2765_v51 }
 0x115   : > { %v1160_v0 = vpop.f32.mrf.mxu0 }
 0x116   : > { %v987_v55 = vpop.f32.mrf.mxu2  ;;  %v823_v34 = vpop.f32.mrf.mxu1  ;;  %v2944_v63 = vadd.f32 %v1160_v0, %v1100_v17 }
 0x117   : > { %v1024_v5 = vadd.f32 %v987_v55, %v819_v62  ;;  %v824_v30 = vadd.f32 %v823_v34, %v2825_v31 }
 0x118   : > { %1850 = vmatmul.msk.bf16.vlgmr.msra.gmra.mxu0 %vm659_vm9, %v2756_v61  ;;  %v1062_v56 = vpop.f32.mrf.mxu3 }
 0x119   : > { %v1101_v32 = vadd.f32 %v1062_v56, %v1023_v9  ;;  %1824 = vmatmul.msk.bf16.gmra.mxu1 %vm659_vm9, %v2777_v57 }
 0x11d   : > { %v1162_v35 = vpop.f32.mrf.mxu0  ;;  %1841 = vmatmul.msk.bf16.gmra.mxu3 %vm659_vm9, %v2604_v23 }
 0x11e   : > { %v989_v51 = vpop.f32.mrf.mxu2  ;;  %v825_v36 = vpop.f32.mrf.mxu1  ;;  %v2953_v1 = vadd.f32 %v1162_v35, %v1101_v32 }
 0x11f   : > { %v1025_v43 = vadd.f32 %v989_v51, %v821_v59  ;;  %v826_v15 = vadd.f32 %v825_v36, %v2846_v42 }
 0x120   : > { %v1065_v31 = vpop.f32.mrf.mxu3 }
 0x121   : > { %v1102_v44 = vadd.f32 %v1065_v31, %v1024_v5 }
 0x123   : > { %1833 = vmatmul.msk.bf16.gmra.mxu2 %vm659_vm9, %v2786_v20 }
 0x125   : > { %v1165_v61 = vpop.f32.mrf.mxu0 }
 0x126   : > { %v992_v48 = vpop.f32.mrf.mxu2  ;;  %v828_v58 = vpop.f32.mrf.mxu1  ;;  %v2958_v46 = vadd.f32 %v1165_v61, %v1102_v44  ;;  %v282_v44 = vld [vmem:[%s2262_s9 + $0xd8] sm:$0xff]  ;;  %v283_v61 = vld [vmem:[%s2262_s9 + $0xe0] sm:$0xff] }
 0x127   : > { %v1026_v27 = vadd.f32 %v992_v48, %v824_v30  ;;  %v829_v23 = vadd.f32 %v828_v58, %v2861_v21 }
 0x128   : > { %1851 = vmatmul.msk.bf16.gmra.mxu0 %vm659_vm9, %v2777_v57  ;;  %v1067_v12 = vpop.f32.mrf.mxu3 }
 0x129   : > { %v1103_v29 = vadd.f32 %v1067_v12, %v1025_v43  ;;  %1825 = vmatmul.msk.bf16.gmra.mxu1 %vm659_vm9, %v2798_v24 }
 0x12d   : > { %v1167_v42 = vpop.f32.mrf.mxu0  ;;  %1842 = vmatmul.msk.bf16.gmra.mxu3 %vm659_vm9, %v2413_v13 }
 0x12e   : > { %v994_v20 = vpop.f32.mrf.mxu2  ;;  %v830_v62 = vpop.f32.mrf.mxu1  ;;  %v2967_v60 = vadd.f32 %v1167_v42, %v1103_v29 }
 0x12f   : > { %v1027_v33 = vadd.f32 %v994_v20, %v826_v15  ;;  %v831_v49 = vadd.f32 %v830_v62, %v2895_v54 }
 0x130   : > { %v1070_v21 = vpop.f32.mrf.mxu3 }
 0x131   : > { %v1104_v9 = vadd.f32 %v1070_v21, %v1026_v27 }
 0x133   : > { %1834 = vmatmul.msk.bf16.gmra.mxu2 %vm659_vm9, %v2807_v22 }
 0x135   : > { %v1170_v57 = vpop.f32.mrf.mxu0 }
 0x136   : > { %v997_v59 = vpop.f32.mrf.mxu2  ;;  %v833_v40 = vpop.f32.mrf.mxu1  ;;  %v2972_v17 = vadd.f32 %v1170_v57, %v1104_v9 }
 0x137   : > { %v1028_v0 = vadd.f32 %v997_v59, %v829_v23  ;;  %v834_v35 = vadd.f32 %v833_v40, %v2850_v26  ;;  %v315_v26 = vmul.f32 %v2264_v2, %v283_v61 }
 0x138   : > { %1852 = vmatmul.msk.bf16.gmra.mxu0 %vm659_vm9, %v2798_v24  ;;  %v1072_v13 = vpop.f32.mrf.mxu3 }
 0x139   : > { %v1105_v55 = vadd.f32 %v1072_v13, %v1027_v33  ;;  %1826 = vmatmul.msk.bf16.gmra.mxu1 %vm659_vm9, %v2823_v25  ;;  %v2090_v58 = vcvt.f32.s32 %v315_v26  ;;  %v2093_v40 = vand.u32 2147483648, %v315_v26 }
 0x13b   : > { %v2091_v20 = vcvt.s32.f32 %v2090_v58 }
 0x13d   : > { %v1172_v54 = vpop.f32.mrf.mxu0  ;;  %1843 = vmatmul.msk.bf16.gmra.mxu3 %vm659_vm9, %v2643_v14  ;;  %v2092_v59 = vand.u32 2147483647, %v2091_v20 }
 0x13e   : > { %v999_v34 = vpop.f32.mrf.mxu2  ;;  %v835_v22 = vpop.f32.mrf.mxu1  ;;  %v2980_v5 = vadd.f32 %v1172_v54, %v1105_v55  ;;  %v2088_v55 = vand.u32 2147483647, %v315_v26 }
 0x13f   : > { %v1029_v30 = vadd.f32 %v999_v34, %v831_v49  ;;  %v836_v23 = vadd.f32 %v835_v22, %v2877_v38  ;;  %v2094_v38 = vor.u32 %v2093_v40, %v2092_v59 }
 0x140   : > { %v1075_v56 = vpop.f32.mrf.mxu3  ;;  %vm3008_vm7 = vcmp.lt.f32.partialorder %v2088_v55, 8388608.0 }
 0x141   : > { %v1106_v32 = vadd.f32 %v1075_v56, %v1028_v0 }
 0x143   : > { %1835 = vmatmul.msk.bf16.gmra.mxu2 %vm659_vm9, %v2836_v53  ;;  %v314_v53 = vmul.f32 %v2264_v2, %v282_v44  ;;  %v1219_v44 = vrot.slane %v2887_v45, 5 }
 0x145   : > { %v1175_v24 = vpop.f32.mrf.mxu0  ;;  %v2082_v48 = vcvt.f32.s32 %v314_v53  ;;  %v2085_v57 = vand.u32 2147483648, %v314_v53  ;;  %v2080_v13 = vand.u32 2147483647, %v314_v53 }
 0x146   : > { %v1002_v51 = vpop.f32.mrf.mxu2  ;;  %v838_v36 = vpop.f32.mrf.mxu1  ;;  %v2985_v43 = vadd.f32 %v1175_v24, %v1106_v32 }
 0x147   : > { %v1030_v14 = vadd.f32 %v1002_v51, %v834_v35  ;;  %v2083_v42 = vcvt.s32.f32 %v2082_v48  ;;  %vm3004_vm6 = vcmp.lt.f32.partialorder %v2080_v13, 8388608.0  ;;  %v2095_v51 = vsel %vm3008_vm7, %v2094_v38, %v315_v26 }
 0x148   : > { %1853 = vmatmul.msk.bf16.gmra.mxu0 %vm659_vm9, %v2823_v25  ;;  %v1077_v15 = vpop.f32.mrf.mxu3  ;;  %v284_v25 = vld [vmem:[%s2262_s9 + $0xe8] sm:$0x3]  ;;  %v1766_v48 = vclamps-f32 %v2095_v51, 127.0  ;;  %v1820_v26 = vrot.slane %v2883_v7, 9  ;;  %s1734_s9 = sshll.u32 %s3279_s21, 5 }
 0x149   : > { %v1107_v31 = vadd.f32 %v1077_v15, %v1029_v30  ;;  %1827 = vmatmul.msk.bf16.gmra.mxu1 %vm659_vm9, %v2856_v11  ;;  %v316_v49 = vmul.f32 %v2264_v2, %v284_v25  ;;  %v2084_v9 = vand.u32 2147483647, %v2083_v42  ;;  %v839_v30 = vadd.f32 %v838_v36, %v2905_v37  ;;  %s247_s11 = sadd.s32 %s1734_s9, %s1733_s8 }
 0x14a   : > { %s1735_s21 = sshll.u32 %s247_s11, 3 }
 0x14b   : > { %v2098_v54 = vcvt.f32.s32 %v316_v49  ;;  %v2101_v15 = vand.u32 2147483648, %v316_v49  ;;  %v2096_v61 = vand.u32 2147483647, %v316_v49  ;;  %s3107_s16 = scalar_lea.vmem %s3205_s5, %s1735_s21 }
 0x14d   : > { %v1177_v27 = vpop.f32.mrf.mxu0  ;;  %1844 = vmatmul.msk.bf16.gmra.mxu3 %vm659_vm9, %v2497_v52  ;;  %v2086_v52 = vor.u32 %v2085_v57, %v2084_v9  ;;  %v2099_v56 = vcvt.s32.f32 %v2098_v54  ;;  %vm3026_vm8 = vcmp.lt.f32.partialorder %v2096_v61, 8388608.0  ;;  %v1220_v57 = vsel %vm2691_vm3, %v1820_v26, %v1219_v44 }
 0x14e   : > { %v1004_v12 = vpop.f32.mrf.mxu2  ;;  %v840_v29 = vpop.f32.mrf.mxu1  ;;  %v2999_v62 = vadd.f32 %v1177_v27, %v1107_v31  ;;  %v1221_v27 = vrot.slane %v1219_v44, 4 }
 0x14f   : > { %v1031_v33 = vadd.f32 %v1004_v12, %v836_v23  ;;  %v2087_v35 = vsel %vm3004_vm6, %v2086_v52, %v314_v53  ;;  %v1222_v23 = vrot.slane %v2903_v41, 5  ;;  %v841_v25 = vadd.f32 %v840_v29, %v2920_v19 }
 0x150   : > { %v1080_v21 = vpop.f32.mrf.mxu3  ;;  %v1765_v53 = vclamps-f32 %v2087_v35, 127.0 }
 0x151   : > { %v1108_v0 = vadd.f32 %v1080_v21, %v1030_v14  ;;  %v2100_v14 = vand.u32 2147483647, %v2099_v56 }
 0x152   : > { %v3033_v12 = vpack.c.bf16 %v1765_v53, %v1765_v53 }
 0x153   : > { %1836 = vmatmul.msk.bf16.gmra.mxu2 %vm659_vm9, %v2869_v3  ;;  %v2102_v58 = vor.u32 %v2101_v15, %v2100_v14 }
 0x154   : > { %v1379_v29 = vshrl.u32 %v3033_v12, 16  ;;  %v1382_v59 = vshll.u32 %v3033_v12, 16  ;;  %v1848_v28 = vrot.slane %v3033_v12, 9 }
 0x155   : > { %v1180_v22 = vpop.f32.mrf.mxu0  ;;  %v2103_v41 = vsel %vm3026_vm8, %v2102_v58, %v316_v49  ;;  %v1226_v49 = vunpack.c.l.b16 %v1220_v57 }
 0x156   : > { %v1007_v32 = vpop.f32.mrf.mxu2  ;;  %v843_v24 = vpop.f32.mrf.mxu1  ;;  %v3020_v37 = vadd.f32 %v1180_v22, %v1108_v0  ;;  %v1767_v40 = vclamps-f32 %v2103_v41, 127.0  ;;  %v1381_v54 = vrot.slane %v1379_v29, 4  ;;  %v1384_v34 = vrot.slane %v1382_v59, 5 }
 0x157   : > { %v1032_v3 = vadd.f32 %v1007_v32, %v839_v30  ;;  %v844_v38 = vadd.f32 %v843_v24, %v2891_v8 }
 0x158   : > { %1854 = vmatmul.msk.bf16.gmra.mxu0 %vm659_vm9, %v2856_v11  ;;  %v1082_v31 = vpop.f32.mrf.mxu3  ;;  %v436_v30 = vpack.c.bf16 %v1767_v40, %v1767_v40  ;;  %v1385_v15 = vor.u32 %v1384_v34, %v1381_v54 }
 0x159   : > { %v1109_v36 = vadd.f32 %v1082_v31, %v1031_v33  ;;  %1828 = vmatmul.msk.bf16.gmra.mxu1 %vm659_vm9, %v2901_v39  ;;  %v3035_v33 = vpack.c.bf16 %v1766_v48, %v1766_v48  ;;  %v1304_v31 = vunpack.c.l.b16 %v3033_v12 }
 0x15a   : > { %v1398_v24 = vshll.u32 %v436_v30, 16  ;;  %v1386_v48 = vrot.slane %v1385_v15, 4 }
 0x15b   : > { %v1388_v0 = vshll.u32 %v3035_v33, 16  ;;  %v1392_v13 = vshrl.u32 %v3035_v33, 16  ;;  %v1305_v44 = vunpack.c.l.b16 %v3035_v33 }
 0x15c   : > { %v1400_v58 = vrot.slane %v1398_v24, 5 }
 0x15d   : > { %v1182_v45 = vpop.f32.mrf.mxu0  ;;  %1845 = vmatmul.msk.bf16.gmra.mxu3 %vm659_vm9, %v2697_v10  ;;  %v1223_v10 = vsel %vm2691_vm3, %v1221_v27, %v1222_v23  ;;  %v1390_v56 = vrot.slane %v1388_v0, 5  ;;  %v1394_v32 = vrot.slane %v1392_v13, 4  ;;  %v1306_v11 = vpack.c.b16 %v1305_v44, %v1304_v31 }
 0x15e   : > { %v1009_v42 = vpop.f32.mrf.mxu2  ;;  %v845_v20 = vpop.f32.mrf.mxu1  ;;  %v3037_v7 = vadd.f32 %v1182_v45, %v1109_v36  ;;  %v1227_v52 = vunpack.c.l.b16 %v1223_v10 }
 0x15f   : > { %v1033_v21 = vadd.f32 %v1009_v42, %v841_v25  ;;  %v1395_v8 = vor.u32 %v1394_v32, %v1390_v56  ;;  %v846_v36 = vadd.f32 %v845_v20, %v2912_v4  ;;  %v1391_v42 = vsel %vm2361_vm10, %v1386_v48, %v1390_v56  ;;  %v3094_v48 = vld [vmem:[%s3203_s3] ss:$0 sm:$0xff] }
 0x160   : > { %v1085_v9 = vpop.f32.mrf.mxu3  ;;  %v1404_v20 = vunpack.c.l.b16 %v1391_v42 }
 0x161   : > { %v1110_v19 = vadd.f32 %v1085_v9, %v1032_v3  ;;  %v1228_v3 = vpack.c.b16 %v1227_v52, %v1226_v49  ;;  %v1481_v9 = vrot.slane %v3035_v33, 5  ;;  %v1484_v49 = vrot.slane %v436_v30, 5 }
 0x163   : > { %1837 = vmatmul.msk.bf16.gmra.mxu2 %vm659_vm9, %v2916_v18  ;;  %v1483_v13 = vrot.slane %v1481_v9, 4 }
 0x165   : > { %v1185_v55 = vpop.f32.mrf.mxu0  ;;  %v1485_v33 = vsel %vm2691_vm3, %v1483_v13, %v1484_v49 }
 0x166   : > { %v1012_v2 = vpop.f32.mrf.mxu2  ;;  %v848_v22 = vpop.f32.mrf.mxu1  ;;  %v3052_v35 = vadd.f32 %v1185_v55, %v1110_v19 }
 0x167   : > { %v1034_v51 = vadd.f32 %v1012_v2, %v844_v38 }
 0x168   : > { %1855 = vmatmul.msk.bf16.gmra.mxu0 %vm659_vm9, %v2901_v39  ;;  %v1087_v18 = vpop.f32.mrf.mxu3  ;;  %v1396_v39 = vrot.slane %v1395_v8, 4 }
 0x169   : > { %v1111_v14 = vadd.f32 %v1087_v18, %v1033_v21  ;;  %1829 = vmatmul.msk.bf16.gmra.mxu1 %vm659_vm9, %v1228_v3 }
 0x16a   : > { %v1401_v21 = vsel %vm2361_vm10, %v1396_v39, %v1400_v58 }
 0x16b   : > { %v1405_v41 = vunpack.c.l.b16 %v1401_v21 }
 0x16d   : > { %v1187_v61 = vpop.f32.mrf.mxu0  ;;  %1846 = vmatmul.msk.bf16.gmra.mxu3 %vm659_vm9, %v2932_v47  ;;  %v849_v47 = vadd.f32 %v848_v22, %v2928_v50  ;;  %v1406_v0 = vpack.c.b16 %v1405_v41, %v1404_v20  ;;  %v1482_v50 = vsel %vm2691_vm3, %v1848_v28, %v1481_v9  ;;  %v1489_v22 = vunpack.c.l.b16 %v1485_v33 }
 0x16e   : > { %v1014_v53 = vpop.f32.mrf.mxu2  ;;  %v850_v26 = vpop.f32.mrf.mxu1  ;;  %v3062_v27 = vadd.f32 %v1187_v61, %v1111_v14  ;;  %v1488_v2 = vunpack.c.l.b16 %v1482_v50 }
 0x16f   : > { %v1035_v23 = vadd.f32 %v1014_v53, %v846_v36  ;;  %v851_v55 = vadd.f32 %v850_v26, %v2936_v16  ;;  %v3100_v26 = vld [vmem:[%s3204_s4] ss:$0 sm:$0xff] }
 0x170   : > { %v1090_v45 = vpop.f32.mrf.mxu3  ;;  %v1490_v32 = vpack.c.b16 %v1489_v22, %v1488_v2 }
 0x171   : > { %v1112_v25 = vadd.f32 %v1090_v45, %v1034_v51 }
 0x173   : > { %1838 = vmatmul.msk.bf16.gmra.mxu2 %vm659_vm9, %v1306_v11 }
 0x175   : > { %v1190_v4 = vpop.f32.mrf.mxu0 }
 0x176   : > { %v1017_v57 = vpop.f32.mrf.mxu2  ;;  %v1244_v10 = vpop.f32.mrf.mxu1  ;;  %v3071_v19 = vadd.f32 %v1190_v4, %v1112_v25 }
 0x177   : > { %v1036_v29 = vadd.f32 %v1017_v57, %v849_v47  ;;  %v1284_v15 = vadd.f32 %v1244_v10, %v2944_v63 }
 0x178   : > { %1856 = vmatmul.msk.bf16.gmra.mxu0 %vm659_vm9, %v1228_v3  ;;  %v1092_v59 = vpop.f32.mrf.mxu3 }
 0x179   : > { %v1113_v40 = vadd.f32 %v1092_v59, %v1035_v23 }
 0x17d   : > { %v1192_v52 = vpop.f32.mrf.mxu0  ;;  %1847 = vmatmul.msk.bf16.gmra.mxu3 %vm659_vm9, %v1406_v0 }
 0x17e   : > { %v1019_v38 = vpop.f32.mrf.mxu2  ;;  %v1246_v54 = vpop.f32.mrf.mxu1  ;;  %v3081_v34 = vadd.f32 %v1192_v52, %v1113_v40 }
 0x17f   : > { %v1037_v12 = vadd.f32 %v1019_v38, %v851_v55  ;;  %v1285_v39 = vadd.f32 %v1246_v54, %v2953_v1 }
 0x180   : > { %v1095_v30 = vpop.f32.mrf.mxu3 }
 0x181   : > { %v1114_v56 = vadd.f32 %v1095_v30, %v1036_v29 }
 0x185   : > { %v1195_v3 = vpop.f32.mrf.mxu0 }
 0x186   : > { %v1322_v51 = vpop.f32.mrf.mxu2  ;;  %v1249_v18 = vpop.f32.mrf.mxu1  ;;  %v3083_v14 = vadd.f32 %v1195_v3, %v1114_v56 }
 0x187   : > { %v1362_v24 = vadd.f32 %v1322_v51, %v1284_v15  ;;  %v1286_v47 = vadd.f32 %v1249_v18, %v2958_v46 }
 0x188   : > { %1857 = vmatmul.msk.bf16.gmra.mxu0 %vm659_vm9, %v1490_v32  ;;  %v1097_v6 = vpop.f32.mrf.mxu3 }
 0x189   : > { %v1115_v16 = vadd.f32 %v1097_v6, %v1037_v12 }
 0x18d   : > { %v1197_v8 = vpop.f32.mrf.mxu0 }
 0x18e   : > { %v1324_v31 = vpop.f32.mrf.mxu2  ;;  %v1251_v44 = vpop.f32.mrf.mxu1  ;;  %v3088_v61 = vadd.f32 %v1197_v8, %v1115_v16 }
 0x18f   : > { %v1363_v23 = vadd.f32 %v1324_v31, %v1285_v39  ;;  %v1287_v13 = vadd.f32 %v1251_v44, %v2967_v60 }
 0x190   : > { %v1422_v36 = vpop.f32.mrf.mxu3 }
 0x191   : > { %v1462_v53 = vadd.f32 %v1422_v36, %v1362_v24 }
 0x195   : > { %v1506_v58 = vpop.f32.mrf.mxu0 }
 0x196   : > { %v1546_v63 = vadd.f32 %v1506_v58, %v1462_v53  ;;  %v1327_v11 = vpop.f32.mrf.mxu2  ;;  %v1254_v45 = vpop.f32.mrf.mxu1 }
 0x197   : > { %v1364_v9 = vadd.f32 %v1327_v11, %v1286_v47  ;;  %v1288_v22 = vadd.f32 %v1254_v45, %v2972_v17 }
 0x198   : > { %v1566_v25 = vmul.f32 %v3094_v48, %v1546_v63  ;;  %v1424_v42 = vpop.f32.mrf.mxu3 }
 0x199   : > { %v1463_v4 = vadd.f32 %v1424_v42, %v1363_v23 }
 0x19a   : > { %v1586_v21 = vadd.f32 %v3100_v26, %v1566_v25 }
 0x19c   : > { %v1602_v1 = vmax.f32 %v1586_v21, 0.0 }
 0x19d   : > { %v1508_v20 = vpop.f32.mrf.mxu0 }
 0x19e   : > { %1618 = vst.msk [vmem:[%s3107_s16] sm:$0xff] %vm659_vm9, %v1602_v1  ;;  %v1547_v41 = vadd.f32 %v1508_v20, %v1463_v4  ;;  %v1329_v57 = vpop.f32.mrf.mxu2  ;;  %v1256_v10 = vpop.f32.mrf.mxu1 }
 0x19f   : > { %v1365_v52 = vadd.f32 %v1329_v57, %v1287_v13  ;;  %v1289_v8 = vadd.f32 %v1256_v10, %v2980_v5 }
 0x1a0   : > { %v1567_v29 = vmul.f32 %v3094_v48, %v1547_v41  ;;  %v1427_v59 = vpop.f32.mrf.mxu3 }
 0x1a1   : > { %v1464_v40 = vadd.f32 %v1427_v59, %v1364_v9 }
 0x1a2   : > { %v1587_v28 = vadd.f32 %v3100_v26, %v1567_v29 }
 0x1a4   : > { %v1603_v0 = vmax.f32 %v1587_v28, 0.0 }
 0x1a5   : > { %v1511_v49 = vpop.f32.mrf.mxu0 }
 0x1a6   : > { %1619 = vst.msk [vmem:[%s3107_s16 + $0x8] sm:$0xff] %vm659_vm9, %v1603_v0  ;;  %v1548_v46 = vadd.f32 %v1511_v49, %v1464_v40  ;;  %v1332_v50 = vpop.f32.mrf.mxu2  ;;  %v1259_v33 = vpop.f32.mrf.mxu1 }
 0x1a7   : > { %v1366_v56 = vadd.f32 %v1332_v50, %v1288_v22  ;;  %v1290_v11 = vadd.f32 %v1259_v33, %v2985_v43 }
 0x1a8   : > { %v1568_v55 = vmul.f32 %v3094_v48, %v1548_v46  ;;  %v1429_v38 = vpop.f32.mrf.mxu3 }
 0x1a9   : > { %v1465_v12 = vadd.f32 %v1429_v38, %v1365_v52 }
 0x1aa   : > { %v1588_v54 = vadd.f32 %v3100_v26, %v1568_v55 }
 0x1ac   : > { %v1604_v2 = vmax.f32 %v1588_v54, 0.0 }
 0x1ad   : > { %v1513_v30 = vpop.f32.mrf.mxu0 }
 0x1ae   : > { %1620 = vst.msk [vmem:[%s3107_s16 + $0x10] sm:$0xff] %vm659_vm9, %v1604_v2  ;;  %v1549_v60 = vadd.f32 %v1513_v30, %v1465_v12  ;;  %v1334_v32 = vpop.f32.mrf.mxu2  ;;  %v1261_v18 = vpop.f32.mrf.mxu1 }
 0x1af   : > { %v1367_v31 = vadd.f32 %v1334_v32, %v1289_v8  ;;  %v1291_v41 = vadd.f32 %v1261_v18, %v2999_v62 }
 0x1b0   : > { %v1569_v3 = vmul.f32 %v3094_v48, %v1549_v60  ;;  %v1432_v51 = vpop.f32.mrf.mxu3 }
 0x1b1   : > { %v1466_v16 = vadd.f32 %v1432_v51, %v1366_v56 }
 0x1b2   : > { %v1589_v6 = vadd.f32 %v3100_v26, %v1569_v3 }
 0x1b4   : > { %v1605_v15 = vmax.f32 %v1589_v6, 0.0 }
 0x1b5   : > { %v1516_v24 = vpop.f32.mrf.mxu0 }
 0x1b6   : > { %1621 = vst.msk [vmem:[%s3107_s16 + $0x18] sm:$0xff] %vm659_vm9, %v1605_v15  ;;  %v1550_v17 = vadd.f32 %v1516_v24, %v1466_v16  ;;  %v1337_v44 = vpop.f32.mrf.mxu2  ;;  %v1264_v63 = vpop.f32.mrf.mxu1 }
 0x1b7   : > { %v1368_v25 = vadd.f32 %v1337_v44, %v1290_v11  ;;  %v1292_v49 = vadd.f32 %v1264_v63, %v3020_v37 }
 0x1b8   : > { %v1570_v36 = vmul.f32 %v3094_v48, %v1550_v17  ;;  %v1434_v53 = vpop.f32.mrf.mxu3 }
 0x1b9   : > { %v1467_v58 = vadd.f32 %v1434_v53, %v1367_v31 }
 0x1ba   : > { %v1590_v39 = vadd.f32 %v3100_v26, %v1570_v36 }
 0x1bc   : > { %v1606_v23 = vmax.f32 %v1590_v39, 0.0 }
 0x1bd   : > { %v1518_v45 = vpop.f32.mrf.mxu0 }
 0x1be   : > { %1622 = vst.msk [vmem:[%s3107_s16 + $0x20] sm:$0xff] %vm659_vm9, %v1606_v23  ;;  %v1551_v5 = vadd.f32 %v1518_v45, %v1467_v58  ;;  %v1339_v42 = vpop.f32.mrf.mxu2  ;;  %v1266_v57 = vpop.f32.mrf.mxu1 }
 0x1bf   : > { %v1369_v10 = vadd.f32 %v1339_v42, %v1291_v41  ;;  %v1293_v22 = vadd.f32 %v1266_v57, %v3037_v7 }
 0x1c0   : > { %v1571_v21 = vmul.f32 %v3094_v48, %v1551_v5  ;;  %v1437_v4 = vpop.f32.mrf.mxu3 }
 0x1c1   : > { %v1468_v47 = vadd.f32 %v1437_v4, %v1368_v25 }
 0x1c2   : > { %v1591_v1 = vadd.f32 %v3100_v26, %v1571_v21 }
 0x1c4   : > { %v1607_v20 = vmax.f32 %v1591_v1, 0.0 }
 0x1c5   : > { %v1521_v9 = vpop.f32.mrf.mxu0 }
 0x1c6   : > { %1623 = vst.msk [vmem:[%s3107_s16 + $0x28] sm:$0xff] %vm659_vm9, %v1607_v20  ;;  %v1552_v43 = vadd.f32 %v1521_v9, %v1468_v47  ;;  %v1342_v29 = vpop.f32.mrf.mxu2  ;;  %v1269_v33 = vpop.f32.mrf.mxu1 }
 0x1c7   : > { %v1370_v52 = vadd.f32 %v1342_v29, %v1292_v49  ;;  %v1294_v15 = vadd.f32 %v1269_v33, %v3052_v35 }
 0x1c8   : > { %v1572_v59 = vmul.f32 %v3094_v48, %v1552_v43  ;;  %v1439_v28 = vpop.f32.mrf.mxu3 }
 0x1c9   : > { %v1469_v0 = vadd.f32 %v1439_v28, %v1369_v10 }
 0x1ca   : > { %v1592_v40 = vadd.f32 %v3100_v26, %v1572_v59 }
 0x1cc   : > { %v1608_v13 = vmax.f32 %v1592_v40, 0.0 }
 0x1cd   : > { %v1523_v46 = vpop.f32.mrf.mxu0 }
 0x1ce   : > { %1624 = vst.msk [vmem:[%s3107_s16 + $0x30] sm:$0xff] %vm659_vm9, %v1608_v13  ;;  %v1553_v62 = vadd.f32 %v1523_v46, %v1469_v0  ;;  %v1344_v50 = vpop.f32.mrf.mxu2  ;;  %v1271_v51 = vpop.f32.mrf.mxu1 }
 0x1cf   : > { %v1371_v60 = vadd.f32 %v1344_v50, %v1293_v22  ;;  %v1295_v63 = vadd.f32 %v1271_v51, %v3062_v27 }
 0x1d0   : > { %v1573_v55 = vmul.f32 %v3094_v48, %v1553_v62  ;;  %v1442_v38 = vpop.f32.mrf.mxu3 }
 0x1d1   : > { %v1470_v12 = vadd.f32 %v1442_v38, %v1370_v52 }
 0x1d2   : > { %v1593_v54 = vadd.f32 %v3100_v26, %v1573_v55 }
 0x1d4   : > { %v1609_v2 = vmax.f32 %v1593_v54, 0.0 }
 0x1d5   : > { %v1526_v30 = vpop.f32.mrf.mxu0 }
 0x1d6   : > { %1625 = vst.msk [vmem:[%s3107_s16 + $0x38] sm:$0xff] %vm659_vm9, %v1609_v2  ;;  %v1554_v37 = vadd.f32 %v1526_v30, %v1470_v12  ;;  %v1347_v56 = vpop.f32.mrf.mxu2  ;;  %v1274_v39 = vpop.f32.mrf.mxu1 }
 0x1d7   : > { %v1372_v24 = vadd.f32 %v1347_v56, %v1294_v15  ;;  %v1296_v1 = vadd.f32 %v1274_v39, %v3071_v19 }
 0x1d8   : > { %v1574_v32 = vmul.f32 %v3094_v48, %v1554_v37  ;;  %v1444_v3 = vpop.f32.mrf.mxu3 }
 0x1d9   : > { %v1471_v6 = vadd.f32 %v1444_v3, %v1371_v60 }
 0x1da   : > { %v1594_v18 = vadd.f32 %v3100_v26, %v1574_v32 }
 0x1dc   : > { %v1610_v16 = vmax.f32 %v1594_v18, 0.0 }
 0x1dd   : > { %v1528_v8 = vpop.f32.mrf.mxu0 }
 0x1de   : > { %1626 = vst.msk [vmem:[%s3107_s16 + $0x40] sm:$0xff] %vm659_vm9, %v1610_v16  ;;  %v1555_v7 = vadd.f32 %v1528_v8, %v1471_v6  ;;  %v1349_v17 = vpop.f32.mrf.mxu2  ;;  %v1276_v20 = vpop.f32.mrf.mxu1 }
 0x1df   : > { %v1373_v11 = vadd.f32 %v1349_v17, %v1295_v63  ;;  %v1297_v28 = vadd.f32 %v1276_v20, %v3081_v34 }
 0x1e0   : > { %v1575_v31 = vmul.f32 %v3094_v48, %v1555_v7  ;;  %v1447_v44 = vpop.f32.mrf.mxu3 }
 0x1e1   : > { %v1472_v53 = vadd.f32 %v1447_v44, %v1372_v24 }
 0x1e2   : > { %v1595_v36 = vadd.f32 %v3100_v26, %v1575_v31 }
 0x1e4   : > { %v1611_v58 = vmax.f32 %v1595_v36, 0.0 }
 0x1e5   : > { %v1531_v23 = vpop.f32.mrf.mxu0 }
 0x1e6   : > { %1627 = vst.msk [vmem:[%s3107_s16 + $0x48] sm:$0xff] %vm659_vm9, %v1611_v58  ;;  %v1556_v35 = vadd.f32 %v1531_v23, %v1472_v53  ;;  %v1352_v45 = vpop.f32.mrf.mxu2  ;;  %v1279_v13 = vpop.f32.mrf.mxu1 }
 0x1e7   : > { %v1374_v41 = vadd.f32 %v1352_v45, %v1296_v1  ;;  %v1298_v55 = vadd.f32 %v1279_v13, %v3083_v14 }
 0x1e8   : > { %v1576_v5 = vmul.f32 %v3094_v48, %v1556_v35  ;;  %v1449_v25 = vpop.f32.mrf.mxu3 }
 0x1e9   : > { %v1473_v21 = vadd.f32 %v1449_v25, %v1373_v11 }
 0x1ea   : > { %v1596_v42 = vadd.f32 %v3100_v26, %v1576_v5 }
 0x1ec   : > { %v1612_v4 = vmax.f32 %v1596_v42, 0.0 }
 0x1ed   : > { %v1533_v47 = vpop.f32.mrf.mxu0 }
 0x1ee   : > { %1628 = vst.msk [vmem:[%s3107_s16 + $0x50] sm:$0xff] %vm659_vm9, %v1612_v4  ;;  %v1557_v27 = vadd.f32 %v1533_v47, %v1473_v21  ;;  %v1354_v9 = vpop.f32.mrf.mxu2  ;;  %v1281_v22 = vpop.f32.mrf.mxu1 }
 0x1ef   : > { %v1375_v0 = vadd.f32 %v1354_v9, %v1297_v28  ;;  %v1299_v32 = vadd.f32 %v1281_v22, %v3088_v61 }
 0x1f0   : > { %v1577_v57 = vmul.f32 %v3094_v48, %v1557_v27  ;;  %v1452_v43 = vpop.f32.mrf.mxu3 }
 0x1f1   : > { %v1474_v29 = vadd.f32 %v1452_v43, %v1374_v41 }
 0x1f2   : > { %v1597_v10 = vadd.f32 %v3100_v26, %v1577_v57 }
 0x1f4   : > { %v1613_v59 = vmax.f32 %v1597_v10, 0.0 }
 0x1f5   : > { %v1536_v40 = vpop.f32.mrf.mxu0 }
 0x1f6   : > { %1629 = vst.msk [vmem:[%s3107_s16 + $0x58] sm:$0xff] %vm659_vm9, %v1613_v59  ;;  %v1558_v19 = vadd.f32 %v1536_v40, %v1474_v29  ;;  %v1357_v62 = vpop.f32.mrf.mxu2 }
 0x1f7   : > { %v1376_v54 = vadd.f32 %v1357_v62, %v1298_v55 }
 0x1f8   : > { %v1578_v49 = vmul.f32 %v3094_v48, %v1558_v19  ;;  %v1454_v46 = vpop.f32.mrf.mxu3 }
 0x1f9   : > { %v1475_v50 = vadd.f32 %v1454_v46, %v1375_v0 }
 0x1fa   : > { %v1598_v52 = vadd.f32 %v3100_v26, %v1578_v49 }
 0x1fc   : > { %v1614_v33 = vmax.f32 %v1598_v52, 0.0 }
 0x1fd   : > { %v1538_v38 = vpop.f32.mrf.mxu0 }
 0x1fe   : > { %1630 = vst.msk [vmem:[%s3107_s16 + $0x60] sm:$0xff] %vm659_vm9, %v1614_v33  ;;  %v1559_v34 = vadd.f32 %v1538_v38, %v1475_v50  ;;  %v1359_v60 = vpop.f32.mrf.mxu2 }
 0x1ff   : > { %v1377_v51 = vadd.f32 %v1359_v60, %v1299_v32 }
 0x200   : > { %v1579_v12 = vmul.f32 %v3094_v48, %v1559_v34  ;;  %v1457_v2 = vpop.f32.mrf.mxu3 }
 0x201   : > { %v1476_v37 = vadd.f32 %v1457_v2, %v1376_v54 }
 0x202   : > { %v1599_v30 = vadd.f32 %v3100_v26, %v1579_v12 }
 0x204   : > { %v1615_v56 = vmax.f32 %v1599_v30, 0.0 }
 0x205   : > { %v1541_v3 = vpop.f32.mrf.mxu0 }
 0x206   : > { %1631 = vst.msk [vmem:[%s3107_s16 + $0x68] sm:$0xff] %vm659_vm9, %v1615_v56  ;;  %v1560_v14 = vadd.f32 %v1541_v3, %v1476_v37 }
 0x208   : > { %v1580_v18 = vmul.f32 %v3094_v48, %v1560_v14  ;;  %v1459_v6 = vpop.f32.mrf.mxu3 }
 0x209   : > { %v1477_v15 = vadd.f32 %v1459_v6, %v1377_v51 }
 0x20a   : > { %v1600_v16 = vadd.f32 %v3100_v26, %v1580_v18 }
 0x20c   : > { %v1616_v8 = vmax.f32 %v1600_v16, 0.0 }
 0x20d   : > { %v1543_v7 = vpop.f32.mrf.mxu0 }
 0x20e   : > { %1632 = vst.msk [vmem:[%s3107_s16 + $0x70] sm:$0xff] %vm659_vm9, %v1616_v8  ;;  %v1561_v24 = vadd.f32 %v1543_v7, %v1477_v15 }
 0x210   : > { %v1581_v17 = vmul.f32 %v3094_v48, %v1561_v24 }
 0x212   : > { %v1601_v61 = vadd.f32 %v3100_v26, %v1581_v17 }
 0x214   : > { %v1617_v31 = vmax.f32 %v1601_v61, 0.0 }
 0x216   : > { %1633 = vst.msk [vmem:[%s3107_s16 + $0x78] sm:$0xff] %vm659_vm9, %v1617_v31 }
 0x217 PF: > { %s16_s24 = sadd.s32 1, %s2184_s24   ;;  %s3268_s20 = smov %s2176_s22 }
 0x218   : > { %p13_p7 = scmp.ge.s32.totalorder %s16_s24, 6   ;;  %s3269_s21 = smov %s2180_s23 }
 0x219   : > { %s3270_s22 = smov %s3273_s0  ;;  %s3271_s23 = smov %s3277_s25 }
 0x21a   :  { %15 = sbr.rel (!%p13_p7) target bundleno = 3 (0x3), region = 79 }

// kernel: _lambda_.6
= control target key start
LH: loop header
LB: loop body
LE: loop exit
PB: predicated region body
PF: predicated region fallthrough
CT: control target
= control target key end

     0   :  { %s2189_s11 = smov 0   ;;  %s2191_s12 = smov 0   ;;  %s3047_s0 = inlined_call_operand.<no memory space> [shape: f32[1], index: 0, kind: input, shape index: {}]   ;;  %s3048_s1 = inlined_call_operand.vmem [shape: f32[2,18,18,8], index: 1, kind: input, shape index: {}]   ;;  %s3049_s2 = inlined_call_operand.vmem [shape: bf16[3,8,8], index: 2, kind: input, shape index: {}]   ;;  %s3050_s3 = inlined_call_operand.vmem [shape: bf16[3,8,8], index: 3, kind: input, shape index: {}]   ;;  %s3051_s4 = inlined_call_operand.vmem [shape: f32[1,8], index: 4, kind: input, shape index: {}]   ;;  %s3052_s5 = inlined_call_operand.vmem [shape: f32[1,8], index: 5, kind: input, shape index: {}]   ;;  %s3053_s6 = inlined_call_operand.vmem [shape: f32[1,8], index: 6, kind: input, shape index: {}]   ;;  %s3054_s7 = inlined_call_operand.vmem [shape: f32[1,8], index: 7, kind: input, shape index: {}]   ;;  %s3055_s8 = inlined_call_operand.vmem [shape: f32[2,16,16,8], index: 8, kind: output, shape index: {0}]   ;;  %s3056_s9 = inlined_call_operand.vmem [shape: f32[2,16,16,8], index: 9, kind: output, shape index: {1}]  }
   0x1   :  { %15 = sst [smem:[#allocation2]] %s3047_s0  ;;  %s2193_s13 = smov 0  }
   0x2   :  { %s2195_s14 = smov 0   ;;  %s2197_s15 = smov 0  }
   0x3 LB: > { %s30_s0 = sadd.s32 1, %s2126_s13  ;;  %s33_s16 = sadd.s32 1, %s2130_s14  ;;  %s2134_s15 = sphi %s2197_s15, %s21_s15   ;;  %s2130_s14 = sphi %s2195_s14, %s3112_s14   ;;  %s2126_s13 = sphi %s2193_s13, %s3111_s13   ;;  %s2122_s12 = sphi %s2191_s12, %s3110_s12   ;;  %s2118_s11 = sphi %s2189_s11, %s3109_s11  }
   0x4   : > { %p31_p0 = scmp.ge.s32.totalorder %s30_s0, 2  ;;  %p1705_p1 = scmp.ge.s32.totalorder %s2134_s15, 1 }
   0x5   : > { %p307_p2 = scmp.lt.s32.totalorder %s2134_s15, 5 }
   0x6   : > { %s3114_s0 = smov (%p31_p0, %s30_s0), 0  ;;  %s3116_s16 = smov (!%p31_p0, %s33_s16), %s2130_s14 }
   0x7   : > { %p308_p3 = pnand %p1705_p1, %p307_p2  ;;  %p35_p4 = scmp.ge.s32.totalorder %s3116_s16, 2 }
   0x8   : > { %p358_p5 = scmp.lt.s32.totalorder (!%p308_p3), %s2122_s12, 1  ;;  %s419_s19 = sld [smem:[#allocation2]] (!%p308_p3) }
   0x9   : > { %s3118_s16 = smov (%p35_p4, %s3116_s16), 0  ;;  %311 = sbr.rel (%p308_p3) target bundleno = 416 (0x1a0), region = 52 }
   0xa   : > { %s1716_s24 = smul.u32 (!%p308_p3), 192, %s2118_s11  ;;  %s1707_s21 = sshll.u32 (!%p308_p3), %s2118_s11, 3 }
   0xb   : > { %p366_p6 = scmp.lt.s32.totalorder (!%p308_p3), %s1707_s21, 15 }
   0xe   : > { %v571_v0 = vld [vmem:[%s3049_s2] sm:$0xf]  ;;  %vm818_vm0 = vcmask 1043456   ;;  %v1747_v2 = vld [vmem:[%s3049_s2 + $0x4] sm:$0xf]  ;;  %s3120_s12 = smov (!%p358_p5, %s2122_s12), 1  ;;  %v2242_v6 = vstv %s419_s19 }
   0xf   : > { %v936_v1 = vsel %vm818_vm0, %v571_v0, 0  ;;  %v820_v3 = vsel %vm818_vm0, %v1747_v2, 0  ;;  %v1781_v4 = vld [vmem:[%s3050_s3 + $0x4] sm:$0xf]  ;;  %s1811_s25 = smul.u32 432, %s3120_s12  ;;  %vm793_vm6 = vcmask 64512  }
  0x10   : > { %1810 = vmatpush.bf16.msra.mxu3 %v936_v1  ;;  %945 = vmatpush.bf16.msra.mxu1 %v936_v1  ;;  %v1200_v5 = vsel %vm818_vm0, %v1781_v4, 0  ;;  %v1772_v55 = vld [vmem:[%s3049_s2 + $0x8] sm:$0xf]  ;;  %vm572_vm7 = vsmask.f32 3328  ;;  %s3122_s21 = smov (!%p366_p6, %s1707_s21), 15 }
  0x11   : > { %829 = vmatpush.bf16.msra.mxu0 %v820_v3  ;;  %1809 = vmatpush.bf16.msra.mxu2 %v820_v3  ;;  %s362_s28 = scalar_lea.vmem %s3048_s1, %s1811_s25  ;;  %vm573_vm8 = vsmask.f32 7440  ;;  %v1196_v60 = vld [vmem:[%s3050_s3] sm:$0xf]  ;;  %v1105_v4 = vsel %vm818_vm0, %v1772_v55, 0  ;;  %s1708_s22 = sshll.u32 %s3122_s21, 1 }
  0x12   : > { %s2240_s29 = scalar_lea.vmem %s362_s28, %s1716_s24  ;;  %vm2340_vm10 = vmor %vm572_vm7, %vm573_vm8  ;;  %s1709_s23 = sshll.u32 %s3120_s12, 5 }
  0x13   : > { %v404_v7 = vld [vmem:[%s2240_s29 + $0x78] sm:$0xff]  ;;  %v405_v8 = vld [vmem:[%s2240_s29 + $0x80] sm:$0xff]  ;;  %v394_v14 = vld [vmem:[%s2240_s29 + $0x28] sm:$0x3]  ;;  %s370_s25 = sadd.s32 %s1709_s23, %s1708_s22 }
  0x14   : > { %1209 = vmatpush.bf16.msrb.mxu3 %v1200_v5  ;;  %v392_v9 = vld [vmem:[%s2240_s29 + $0x18] sm:$0xff]  ;;  %v436_v10 = vmul.f32 %v2242_v6, %v404_v7  ;;  %v437_v11 = vmul.f32 %v2242_v6, %v405_v8  ;;  %v393_v12 = vld [vmem:[%s2240_s29 + $0x20] sm:$0xff]  ;;  %v406_v15 = vld [vmem:[%s2240_s29 + $0x88] sm:$0x3]  ;;  %v2255_v17 = vmul.f32 %v2242_v6, %v394_v14 }
  0x15   : > { %v424_v13 = vmul.f32 %v2242_v6, %v392_v9  ;;  %v425_v16 = vmul.f32 %v2242_v6, %v393_v12  ;;  %v2258_v18 = vmul.f32 %v2242_v6, %v406_v15  ;;  %1114 = vmatpush.bf16.msrb.mxu2 %v1105_v4  ;;  %v1258_v9 = vsel %vm818_vm0, %v1196_v60, 0  ;;  %v408_v45 = vld [vmem:[%s2240_s29 + $0x98] sm:$0xff] }
  0x16   : > { %v1932_v19 = vand.u32 2147483647, %v436_v10  ;;  %v1934_v20 = vcvt.f32.s32 %v436_v10  ;;  %v1937_v21 = vand.u32 2147483648, %v436_v10  ;;  %v1940_v22 = vand.u32 2147483647, %v437_v11  ;;  %1267 = vmatpush.bf16.msrb.mxu0 %v1258_v9  ;;  %v396_v4 = vld [vmem:[%s2240_s29 + $0x38] sm:$0xff] }
  0x17   : > { %v1942_v23 = vcvt.f32.s32 %v437_v11  ;;  %v1945_v24 = vand.u32 2147483648, %v437_v11  ;;  %v1836_v25 = vand.u32 2147483647, %v424_v13  ;;  %v1838_v26 = vcvt.f32.s32 %v424_v13 }
  0x18   : > { %vm2260_vm1 = vcmp.lt.f32.partialorder %v1932_v19, 8388608.0  ;;  %v1935_v28 = vcvt.s32.f32 %v1934_v20  ;;  %vm2264_vm2 = vcmp.lt.f32.partialorder %v1940_v22, 8388608.0  ;;  %v1841_v30 = vand.u32 2147483648, %v424_v13 }
  0x19   : > { %v1943_v31 = vcvt.s32.f32 %v1942_v23  ;;  %vm2268_vm3 = vcmp.lt.f32.partialorder %v1836_v25, 8388608.0  ;;  %v1839_v33 = vcvt.s32.f32 %v1838_v26  ;;  %v1844_v34 = vand.u32 2147483647, %v425_v16 }
  0x1a   : > { %v1936_v35 = vand.u32 2147483647, %v1935_v28  ;;  %v1846_v36 = vcvt.f32.s32 %v425_v16  ;;  %v1849_v37 = vand.u32 2147483648, %v425_v16  ;;  %v1852_v38 = vand.u32 2147483647, %v2255_v17 }
  0x1b   : > { %v1944_v39 = vand.u32 2147483647, %v1943_v31  ;;  %v1840_v40 = vand.u32 2147483647, %v1839_v33  ;;  %vm2273_vm4 = vcmp.lt.f32.partialorder %v1844_v34, 8388608.0  ;;  %v1854_v42 = vcvt.f32.s32 %v2255_v17 }
  0x1c   : > { %v1938_v43 = vor.u32 %v1937_v21, %v1936_v35  ;;  %v1847_v44 = vcvt.s32.f32 %v1846_v36  ;;  %vm2278_vm5 = vcmp.lt.f32.partialorder %v1852_v38, 8388608.0  ;;  %v1857_v46 = vand.u32 2147483648, %v2255_v17  ;;  %v1798_v35 = vld [vmem:[%s3050_s3 + $0x8] sm:$0xf] }
  0x1d   : > { %v1946_v47 = vor.u32 %v1945_v24, %v1944_v39  ;;  %v1842_v48 = vor.u32 %v1841_v30, %v1840_v40  ;;  %v1855_v49 = vcvt.s32.f32 %v1854_v42  ;;  %v1948_v50 = vand.u32 2147483647, %v2258_v18  ;;  %v407_v40 = vld [vmem:[%s2240_s29 + $0x90] sm:$0xff] }
  0x1e   : > { %v1939_v51 = vsel %vm2260_vm1, %v1938_v43, %v436_v10  ;;  %v1848_v52 = vand.u32 2147483647, %v1847_v44  ;;  %v1950_v53 = vcvt.f32.s32 %v2258_v18  ;;  %v1953_v54 = vand.u32 2147483648, %v2258_v18 }
  0x1f   : > { %v1947_v56 = vsel %vm2264_vm2, %v1946_v47, %v437_v11  ;;  %v1732_v57 = vclamps-f32 %v1939_v51, 127.0  ;;  %v1843_v58 = vsel %vm2268_vm3, %v1842_v48, %v424_v13  ;;  %v1856_v59 = vand.u32 2147483647, %v1855_v49 }
  0x20   : > { %v1733_v61 = vclamps-f32 %v1947_v56, 127.0  ;;  %v1850_v62 = vor.u32 %v1849_v37, %v1848_v52  ;;  %v1720_v63 = vclamps-f32 %v1843_v58, 127.0  ;;  %vm2298_vm9 = vcmp.lt.f32.partialorder %v1948_v50, 8388608.0 }
  0x21   : > { %v2302_v1 = vpack.c.bf16 %v1732_v57, %v1732_v57  ;;  %v1858_v2 = vor.u32 %v1857_v46, %v1856_v59  ;;  %v1951_v3 = vcvt.s32.f32 %v1950_v53  ;;  %v1342_v49 = vsel %vm818_vm0, %v1798_v35, 0 }
  0x22   : > { %v2305_v5 = vpack.c.bf16 %v1733_v61, %v1733_v61  ;;  %v1851_v7 = vsel %vm2273_vm4, %v1850_v62, %v425_v16  ;;  %v2309_v8 = vpack.c.bf16 %v1720_v63, %v1720_v63  ;;  %1351 = vmatpush.bf16.msrb.mxu1 %v1342_v49  ;;  %v439_v53 = vmul.f32 %v2242_v6, %v407_v40 }
  0x23   : > { %v895_v10 = vunpack.c.l.b16 %v2302_v1  ;;  %v1721_v11 = vclamps-f32 %v1851_v7, 127.0  ;;  %v1859_v12 = vsel %vm2278_vm5, %v1858_v2, %v2255_v17  ;;  %v1952_v13 = vand.u32 2147483647, %v1951_v3  ;;  %v395_v3 = vld [vmem:[%s2240_s29 + $0x30] sm:$0xff] }
  0x24   : > { %v896_v14 = vunpack.c.l.b16 %v2305_v5  ;;  %v887_v15 = vunpack.c.l.b16 %v2309_v8  ;;  %v1722_v19 = vclamps-f32 %v1859_v12, 127.0  ;;  %v576_v16 = vshrl.u32 %v2309_v8, 16 }
  0x25   : > { %v2319_v20 = vpack.c.bf16 %v1721_v11, %v1721_v11  ;;  %v579_v21 = vshll.u32 %v2309_v8, 16  ;;  %v1954_v22 = vor.u32 %v1953_v54, %v1952_v13  ;;  %v672_v23 = vshrl.u32 %v2302_v1, 16 }
  0x26   : > { %v907_v24 = vpack.c.b16 %v896_v14, %v895_v10  ;;  %v2323_v25 = vpack.c.bf16 %v1722_v19, %v1722_v19  ;;  %v578_v17 = vrot.slane %v576_v16, 4  ;;  %v675_v26 = vshll.u32 %v2302_v1, 16 }
  0x27   : > { %v888_v27 = vunpack.c.l.b16 %v2319_v20  ;;  %v581_v28 = vrot.slane %v579_v21, 5  ;;  %v585_v29 = vshll.u32 %v2319_v20, 16  ;;  %v589_v30 = vshrl.u32 %v2319_v20, 16 }
  0x28   : > { %1760 = vmatmul.msk.bf16.vlgmr.msra.gmra.mxu3 %vm793_vm6, %v907_v24  ;;  %v595_v31 = vshll.u32 %v2323_v25, 16  ;;  %v1955_v32 = vsel %vm2298_vm9, %v1954_v22, %v2258_v18  ;;  %v674_v33 = vrot.slane %v672_v23, 4  ;;  %v677_v34 = vrot.slane %v675_v26, 5 }
  0x29   : > { %v903_v36 = vpack.c.b16 %v888_v27, %v887_v15  ;;  %v582_v37 = vor.u32 %v581_v28, %v578_v17  ;;  %v587_v38 = vrot.slane %v585_v29, 5  ;;  %v591_v39 = vrot.slane %v589_v30, 4 }
  0x2a   : > { %v597_v42 = vrot.slane %v595_v31, 5  ;;  %v1734_v43 = vclamps-f32 %v1955_v32, 127.0  ;;  %v678_v18 = vor.u32 %v677_v34, %v674_v33  ;;  %v681_v44 = vshll.u32 %v2305_v5, 16  ;;  %v397_v31 = vld [vmem:[%s2240_s29 + $0x40] sm:$0x3] }
  0x2b   : > { %1756 = vmatmul.msk.bf16.vlgmr.msra.gmra.mxu1 %vm793_vm6, %v903_v36  ;;  %v583_v46 = vrot.slane %v582_v37, 4  ;;  %v592_v47 = vor.u32 %v591_v39, %v587_v38  ;;  %v685_v48 = vshrl.u32 %v2305_v5, 16  ;;  %v440_v57 = vmul.f32 %v2242_v6, %v408_v45  ;;  %v409_v36 = vld [vmem:[%s2240_s29 + $0xa0] sm:$0x3] }
  0x2c   : > { %v2349_v50 = vpack.c.bf16 %v1734_v43, %v1734_v43  ;;  %v679_v51 = vrot.slane %v678_v18, 4  ;;  %v683_v52 = vrot.slane %v681_v44, 5  ;;  %v1956_v61 = vand.u32 2147483647, %v439_v53  ;;  %v411_v43 = vld [vmem:[%s2240_s29 + $0xb0] sm:$0xff] }
  0x2d   : > { %v588_v54 = vsel %vm2340_vm10, %v583_v46, %v587_v38  ;;  %v593_v55 = vrot.slane %v592_v47, 4  ;;  %v687_v56 = vrot.slane %v685_v48, 4  ;;  %v1958_v2 = vcvt.f32.s32 %v439_v53 }
  0x2e   : > { %v769_v58 = vunpack.c.l.b16 %v588_v54  ;;  %v684_v59 = vsel %vm2340_vm10, %v679_v51, %v683_v52  ;;  %v691_v60 = vshll.u32 %v2349_v50, 16  ;;  %vm2362_vm11 = vcmp.lt.f32.partialorder %v1956_v61, 8388608.0 }
  0x2f   : > { %v598_v62 = vsel %vm2340_vm10, %v593_v55, %v597_v42  ;;  %v688_v63 = vor.u32 %v687_v56, %v683_v52  ;;  %v777_v0 = vunpack.c.l.b16 %v684_v59  ;;  %v1961_v11 = vand.u32 2147483648, %v439_v53  ;;  %v410_v42 = vld [vmem:[%s2240_s29 + $0xa8] sm:$0xff] }
  0x30   : > { %v770_v7 = vunpack.c.l.b16 %v598_v62  ;;  %v693_v9 = vrot.slane %v691_v60, 5  ;;  %v1959_v13 = vcvt.s32.f32 %v1958_v2  ;;  %v1964_v14 = vand.u32 2147483647, %v440_v57 }
  0x31   : > { %v689_v12 = vrot.slane %v688_v63, 4  ;;  %v1966_v15 = vcvt.f32.s32 %v440_v57  ;;  %v1969_v16 = vand.u32 2147483648, %v440_v57  ;;  %v427_v21 = vmul.f32 %v2242_v6, %v395_v3 }
  0x32   : > { %v2366_v19 = vpack.c.b16 %v770_v7, %v769_v58  ;;  %v428_v22 = vmul.f32 %v2242_v6, %v396_v4  ;;  %v1960_v24 = vand.u32 2147483647, %v1959_v13  ;;  %vm2372_vm12 = vcmp.lt.f32.partialorder %v1964_v14, 8388608.0 }
  0x33   : > { %v694_v23 = vsel %vm2340_vm10, %v689_v12, %v693_v9  ;;  %v1967_v26 = vcvt.s32.f32 %v1966_v15  ;;  %v1860_v28 = vand.u32 2147483647, %v427_v21  ;;  %v1862_v29 = vcvt.f32.s32 %v427_v21 }
  0x34   : > { %1748 = vmatmul.msk.bf16.vlgmr.msra.gmra.mxu0 %vm793_vm6, %v2366_v19  ;;  %v778_v27 = vunpack.c.l.b16 %v694_v23  ;;  %v1865_v30 = vand.u32 2147483648, %v427_v21  ;;  %v1962_v32 = vor.u32 %v1961_v11, %v1960_v24  ;;  %v1868_v34 = vand.u32 2147483647, %v428_v22 }
  0x35   : > { %v1968_v33 = vand.u32 2147483647, %v1967_v26  ;;  %v1870_v35 = vcvt.f32.s32 %v428_v22  ;;  %vm2382_vm13 = vcmp.lt.f32.partialorder %v1860_v28, 8388608.0  ;;  %v1863_v39 = vcvt.s32.f32 %v1862_v29 }
  0x36   : > { %v2380_v37 = vpack.c.b16 %v778_v27, %v777_v0  ;;  %v1873_v40 = vand.u32 2147483648, %v428_v22  ;;  %v1963_v18 = vsel %vm2362_vm11, %v1962_v32, %v439_v53  ;;  %vm2390_vm14 = vcmp.lt.f32.partialorder %v1868_v34, 8388608.0 }
  0x37   : > { %v1970_v44 = vor.u32 %v1969_v16, %v1968_v33  ;;  %v1871_v46 = vcvt.s32.f32 %v1870_v35  ;;  %v1735_v47 = vclamps-f32 %v1963_v18, 127.0  ;;  %v1864_v48 = vand.u32 2147483647, %v1863_v39 }
  0x38   : > { %1752 = vmatmul.msk.bf16.vlgmr.msra.gmra.mxu2 %vm793_vm6, %v2380_v37  ;;  %v429_v49 = vmul.f32 %v2242_v6, %v397_v31  ;;  %v2398_v51 = vmul.f32 %v2242_v6, %v409_v36  ;;  %v2403_v54 = vmul.f32 %v2242_v6, %v410_v42  ;;  %v2406_v55 = vmul.f32 %v2242_v6, %v411_v43 }
  0x39   : > { %v1971_v52 = vsel %vm2372_vm12, %v1970_v44, %v440_v57  ;;  %v1872_v53 = vand.u32 2147483647, %v1871_v46  ;;  %v2408_v58 = vpack.c.bf16 %v1735_v47, %v1735_v47  ;;  %v1866_v59 = vor.u32 %v1865_v30, %v1864_v48 }
  0x3a   : > { %v1736_v56 = vclamps-f32 %v1971_v52, 127.0  ;;  %v1876_v60 = vand.u32 2147483647, %v429_v49  ;;  %v1878_v62 = vcvt.f32.s32 %v429_v49  ;;  %v1881_v63 = vand.u32 2147483648, %v429_v49 }
  0x3b   : > { %v1874_v61 = vor.u32 %v1873_v40, %v1872_v53  ;;  %v1972_v0 = vand.u32 2147483647, %v2398_v51  ;;  %v897_v57 = vunpack.c.l.b16 %v2408_v58  ;;  %v1867_v3 = vsel %vm2382_vm13, %v1866_v59, %v427_v21 }
  0x3c   : > { %v2411_v2 = vpack.c.bf16 %v1736_v56, %v1736_v56  ;;  %vm2416_vm15 = vcmp.lt.f32.partialorder %v1876_v60, 8388608.0  ;;  %v1723_v9 = vclamps-f32 %v1867_v3, 127.0  ;;  %v1879_v10 = vcvt.s32.f32 %v1878_v62 }
  0x3d   : > { %v1875_v7 = vsel %vm2390_vm14, %v1874_v61, %v428_v22  ;;  %vm2422_vm0 = vcmp.lt.f32.partialorder %v1972_v0, 8388608.0  ;;  %v1974_v14 = vcvt.f32.s32 %v2398_v51  ;;  %v1977_v15 = vand.u32 2147483648, %v2398_v51 }
  0x3e   : > { %v898_v12 = vunpack.c.l.b16 %v2411_v2  ;;  %v1724_v13 = vclamps-f32 %v1875_v7, 127.0  ;;  %v2429_v16 = vpack.c.bf16 %v1723_v9, %v1723_v9  ;;  %v1880_v21 = vand.u32 2147483647, %v1879_v10 }
  0x3f   : > { %v696_v23 = vshrl.u32 %v2408_v58, 16  ;;  %v699_v22 = vshll.u32 %v2408_v58, 16  ;;  %v1975_v26 = vcvt.s32.f32 %v1974_v14  ;;  %v705_v27 = vshll.u32 %v2411_v2, 16  ;;  %v398_v14 = vld [vmem:[%s2240_s29 + $0x48] sm:$0xff] }
  0x40   : > { %v908_v24 = vpack.c.b16 %v898_v12, %v897_v57  ;;  %v2433_v17 = vpack.c.bf16 %v1724_v13, %v1724_v13  ;;  %v889_v28 = vunpack.c.l.b16 %v2429_v16  ;;  %v1882_v29 = vor.u32 %v1881_v63, %v1880_v21 }
  0x41   : > { %v600_v30 = vshrl.u32 %v2429_v16, 16  ;;  %v603_v31 = vshll.u32 %v2429_v16, 16  ;;  %v1976_v35 = vand.u32 2147483647, %v1975_v26  ;;  %v698_v40 = vrot.slane %v696_v23, 4 }
  0x42   : > { %1761 = vmatmul.msk.bf16.gmra.mxu3 %vm793_vm6, %v908_v24  ;;  %v890_v32 = vunpack.c.l.b16 %v2433_v17  ;;  %v609_v33 = vshll.u32 %v2433_v17, 16  ;;  %v613_v34 = vshrl.u32 %v2433_v17, 16  ;;  %v1883_v36 = vsel %vm2416_vm15, %v1882_v29, %v429_v49  ;;  %v399_v24 = vld [vmem:[%s2240_s29 + $0x50] sm:$0xff] }
  0x43   : > { %v602_v38 = vrot.slane %v600_v30, 4  ;;  %v605_v39 = vrot.slane %v603_v31, 5  ;;  %v1725_v43 = vclamps-f32 %v1883_v36, 127.0  ;;  %v1978_v46 = vor.u32 %v1977_v15, %v1976_v35  ;;  %v400_v30 = vld [vmem:[%s2240_s29 + $0x58] sm:$0x3] }
  0x44   : > { %v904_v42 = vpack.c.b16 %v890_v32, %v889_v28  ;;  %v611_v18 = vrot.slane %v609_v33, 5  ;;  %v615_v44 = vrot.slane %v613_v34, 4  ;;  %v701_v47 = vrot.slane %v699_v22, 5 }
  0x45   : > { %v606_v45 = vor.u32 %v605_v39, %v602_v38  ;;  %v707_v48 = vrot.slane %v705_v27, 5  ;;  %v2446_v52 = vpack.c.bf16 %v1725_v43, %v1725_v43  ;;  %v709_v56 = vshrl.u32 %v2411_v2, 16 }
  0x46   : > { %1757 = vmatmul.msk.bf16.gmra.mxu1 %vm793_vm6, %v904_v42  ;;  %v616_v53 = vor.u32 %v615_v44, %v611_v18  ;;  %v1980_v49 = vand.u32 2147483647, %v2403_v54  ;;  %v1979_v60 = vsel %vm2422_vm0, %v1978_v46, %v2398_v51  ;;  %v702_v61 = vor.u32 %v701_v47, %v698_v40 }
  0x47   : > { %v607_v59 = vrot.slane %v606_v45, 4  ;;  %v1982_v62 = vcvt.f32.s32 %v2403_v54  ;;  %v619_v0 = vshll.u32 %v2446_v52, 16  ;;  %v1737_v57 = vclamps-f32 %v1979_v60, 127.0 }
  0x48   : > { %v617_v63 = vrot.slane %v616_v53, 4  ;;  %v711_v3 = vrot.slane %v709_v56, 4  ;;  %v703_v7 = vrot.slane %v702_v61, 4  ;;  %vm2457_vm1 = vcmp.lt.f32.partialorder %v1980_v49, 8388608.0 }
  0x49   : > { %v612_v4 = vsel %vm2340_vm10, %v607_v59, %v611_v18  ;;  %v1983_v10 = vcvt.s32.f32 %v1982_v62  ;;  %v621_v51 = vrot.slane %v619_v0, 5  ;;  %v2461_v12 = vpack.c.bf16 %v1737_v57, %v1737_v57  ;;  %v412_v62 = vld [vmem:[%s2240_s29 + $0xb8] sm:$0x3] }
  0x4a   : > { %v771_v11 = vunpack.c.l.b16 %v612_v4  ;;  %v712_v13 = vor.u32 %v711_v3, %v707_v48  ;;  %v708_v15 = vsel %vm2340_vm10, %v703_v7, %v707_v48  ;;  %v1985_v23 = vand.u32 2147483648, %v2403_v54 }
  0x4b   : > { %v1984_v21 = vand.u32 2147483647, %v1983_v10  ;;  %v1988_v22 = vand.u32 2147483647, %v2406_v55  ;;  %v622_v26 = vsel %vm2340_vm10, %v617_v63, %v621_v51  ;;  %v715_v28 = vshll.u32 %v2461_v12, 16 }
  0x4c   : > { %v713_v27 = vrot.slane %v712_v13, 4  ;;  %v779_v29 = vunpack.c.l.b16 %v708_v15  ;;  %v772_v31 = vunpack.c.l.b16 %v622_v26  ;;  %v1990_v34 = vcvt.f32.s32 %v2406_v55 }
  0x4d   : > { %v1986_v32 = vor.u32 %v1985_v23, %v1984_v21  ;;  %vm2473_vm2 = vcmp.lt.f32.partialorder %v1988_v22, 8388608.0  ;;  %v717_v35 = vrot.slane %v715_v28, 5  ;;  %v1993_v36 = vand.u32 2147483648, %v2406_v55 }
  0x4e   : > { %v430_v38 = vmul.f32 %v2242_v6, %v398_v14  ;;  %v431_v39 = vmul.f32 %v2242_v6, %v399_v24  ;;  %v2481_v40 = vpack.c.b16 %v772_v31, %v771_v11  ;;  %v1991_v43 = vcvt.s32.f32 %v1990_v34 }
  0x4f   : > { %v1987_v42 = vsel %vm2457_vm1, %v1986_v32, %v2403_v54  ;;  %v432_v18 = vmul.f32 %v2242_v6, %v400_v30  ;;  %v718_v44 = vsel %vm2340_vm10, %v713_v27, %v717_v35  ;;  %v444_v14 = vmul.f32 %v2242_v6, %v412_v62 }
  0x50   : > { %v1738_v45 = vclamps-f32 %v1987_v42, 127.0  ;;  %v1884_v46 = vand.u32 2147483647, %v430_v38  ;;  %v1886_v47 = vcvt.f32.s32 %v430_v38  ;;  %1749 = vmatmul.msk.bf16.gmra.mxu0 %vm793_vm6, %v2481_v40  ;;  %v780_v48 = vunpack.c.l.b16 %v718_v44 }
  0x51   : > { %v1992_v53 = vand.u32 2147483647, %v1991_v43  ;;  %v1889_v56 = vand.u32 2147483648, %v430_v38  ;;  %v1892_v49 = vand.u32 2147483647, %v431_v39  ;;  %v1894_v61 = vcvt.f32.s32 %v431_v39 }
  0x52   : > { %v2491_v59 = vpack.c.bf16 %v1738_v45, %v1738_v45  ;;  %vm2493_vm3 = vcmp.lt.f32.partialorder %v1884_v46, 8388608.0  ;;  %v1887_v60 = vcvt.s32.f32 %v1886_v47  ;;  %v2498_v63 = vpack.c.b16 %v780_v48, %v779_v29 }
  0x53   : > { %v1994_v0 = vor.u32 %v1993_v36, %v1992_v53  ;;  %vm2500_vm4 = vcmp.lt.f32.partialorder %v1892_v49, 8388608.0  ;;  %v1897_v3 = vand.u32 2147483648, %v431_v39  ;;  %v1895_v9 = vcvt.s32.f32 %v1894_v61 }
  0x54   : > { %v899_v4 = vunpack.c.l.b16 %v2491_v59  ;;  %v1888_v7 = vand.u32 2147483647, %v1887_v60  ;;  %v1900_v10 = vand.u32 2147483647, %v432_v18  ;;  %1753 = vmatmul.msk.bf16.gmra.mxu2 %vm793_vm6, %v2498_v63  ;;  %v1902_v11 = vcvt.f32.s32 %v432_v18 }
  0x55   : > { %v1995_v51 = vsel %vm2473_vm2, %v1994_v0, %v2406_v55  ;;  %v1905_v13 = vand.u32 2147483648, %v432_v18  ;;  %v1896_v23 = vand.u32 2147483647, %v1895_v9  ;;  %v1996_v26 = vand.u32 2147483647, %v444_v14 }
  0x56   : > { %v1739_v15 = vclamps-f32 %v1995_v51, 127.0  ;;  %v1890_v21 = vor.u32 %v1889_v56, %v1888_v7  ;;  %vm2511_vm5 = vcmp.lt.f32.partialorder %v1900_v10, 8388608.0  ;;  %v1903_v24 = vcvt.s32.f32 %v1902_v11 }
  0x57   : > { %v1998_v27 = vcvt.f32.s32 %v444_v14  ;;  %v2001_v28 = vand.u32 2147483648, %v444_v14  ;;  %v1898_v30 = vor.u32 %v1897_v3, %v1896_v23  ;;  %v720_v31 = vshrl.u32 %v2491_v59, 16 }
  0x58   : > { %v2515_v29 = vpack.c.bf16 %v1739_v15, %v1739_v15  ;;  %v1891_v55 = vsel %vm2493_vm3, %v1890_v21, %v430_v38  ;;  %v1904_v33 = vand.u32 2147483647, %v1903_v24  ;;  %vm2520_vm7 = vcmp.lt.f32.partialorder %v1996_v26, 8388608.0  ;;  %v413_v15 = vld [vmem:[%s2240_s29 + $0xc0] sm:$0xff]  ;;  %v414_v21 = vld [vmem:[%s2240_s29 + $0xc8] sm:$0xff] }
  0x59   : > { %v1726_v32 = vclamps-f32 %v1891_v55, 127.0  ;;  %v1999_v35 = vcvt.s32.f32 %v1998_v27  ;;  %v1899_v42 = vsel %vm2500_vm4, %v1898_v30, %v431_v39  ;;  %v722_v43 = vrot.slane %v720_v31, 4 }
  0x5a   : > { %v900_v36 = vunpack.c.l.b16 %v2515_v29  ;;  %v723_v44 = vshll.u32 %v2491_v59, 16  ;;  %v1727_v45 = vclamps-f32 %v1899_v42, 127.0  ;;  %v1906_v46 = vor.u32 %v1905_v13, %v1904_v33 }
  0x5b   : > { %v2528_v38 = vpack.c.bf16 %v1726_v32, %v1726_v32  ;;  %v2000_v47 = vand.u32 2147483647, %v1999_v35  ;;  %v729_v56 = vshll.u32 %v2515_v29, 16  ;;  %v733_v49 = vshrl.u32 %v2515_v29, 16 }
  0x5c   : > { %v909_v48 = vpack.c.b16 %v900_v36, %v899_v4  ;;  %v725_v53 = vrot.slane %v723_v44, 5  ;;  %v2532_v54 = vpack.c.bf16 %v1727_v45, %v1727_v45  ;;  %v1907_v39 = vsel %vm2511_vm5, %v1906_v46, %v432_v18 }
  0x5d   : > { %v891_v60 = vunpack.c.l.b16 %v2528_v38  ;;  %v624_v61 = vshrl.u32 %v2528_v38, 16  ;;  %v1728_v62 = vclamps-f32 %v1907_v39, 127.0  ;;  %v627_v0 = vshll.u32 %v2528_v38, 16 }
  0x5e   : > { %1762 = vmatmul.msk.bf16.gmra.mxu3 %vm793_vm6, %v909_v48  ;;  %v2002_v57 = vor.u32 %v2001_v28, %v2000_v47  ;;  %v726_v3 = vor.u32 %v725_v53, %v722_v43  ;;  %v892_v4 = vunpack.c.l.b16 %v2532_v54  ;;  %v633_v9 = vshll.u32 %v2532_v54, 16 }
  0x5f   : > { %v626_v7 = vrot.slane %v624_v61, 4  ;;  %v637_v10 = vshrl.u32 %v2532_v54, 16  ;;  %v2543_v51 = vpack.c.bf16 %v1728_v62, %v1728_v62  ;;  %v629_v18 = vrot.slane %v627_v0, 5 }
  0x60   : > { %v2003_v11 = vsel %vm2520_vm7, %v2002_v57, %v444_v14  ;;  %v727_v13 = vrot.slane %v726_v3, 4  ;;  %v905_v23 = vpack.c.b16 %v892_v4, %v891_v60  ;;  %v635_v22 = vrot.slane %v633_v9, 5  ;;  %v402_v60 = vld [vmem:[%s2240_s29 + $0x68] sm:$0xff] }
  0x61   : > { %v639_v24 = vrot.slane %v637_v10, 4  ;;  %v1740_v26 = vclamps-f32 %v2003_v11, 127.0  ;;  %v630_v27 = vor.u32 %v629_v18, %v626_v7  ;;  %v643_v28 = vshll.u32 %v2543_v51, 16 }
  0x62   : > { %v731_v55 = vrot.slane %v729_v56, 5  ;;  %v735_v30 = vrot.slane %v733_v49, 4  ;;  %1758 = vmatmul.msk.bf16.gmra.mxu1 %vm793_vm6, %v905_v23  ;;  %v445_v14 = vmul.f32 %v2242_v6, %v413_v15  ;;  %v2555_v33 = vmul.f32 %v2242_v6, %v414_v21  ;;  %v401_v49 = vld [vmem:[%s2240_s29 + $0x60] sm:$0xff] }
  0x63   : > { %v640_v31 = vor.u32 %v639_v24, %v635_v22  ;;  %v2551_v32 = vpack.c.bf16 %v1740_v26, %v1740_v26  ;;  %v631_v34 = vrot.slane %v630_v27, 4  ;;  %v645_v35 = vrot.slane %v643_v28, 5  ;;  %v403_v28 = vld [vmem:[%s2240_s29 + $0x70] sm:$0x3] }
  0x64   : > { %v732_v36 = vsel %vm2340_vm10, %v727_v13, %v731_v55  ;;  %v736_v42 = vor.u32 %v735_v30, %v731_v55  ;;  %v2004_v46 = vand.u32 2147483647, %v445_v14  ;;  %v2006_v53 = vcvt.f32.s32 %v445_v14 }
  0x65   : > { %v641_v43 = vrot.slane %v640_v31, 4  ;;  %v739_v44 = vshll.u32 %v2551_v32, 16  ;;  %v781_v45 = vunpack.c.l.b16 %v732_v36  ;;  %v636_v47 = vsel %vm2340_vm10, %v631_v34, %v635_v22 }
  0x66   : > { %v737_v48 = vrot.slane %v736_v42, 4  ;;  %v2009_v56 = vand.u32 2147483648, %v445_v14  ;;  %v773_v61 = vunpack.c.l.b16 %v636_v47  ;;  %vm2566_vm8 = vcmp.lt.f32.partialorder %v2004_v46, 8388608.0 }
  0x67   : > { %v646_v39 = vsel %vm2340_vm10, %v641_v43, %v645_v35  ;;  %v741_v62 = vrot.slane %v739_v44, 5  ;;  %v2007_v3 = vcvt.s32.f32 %v2006_v53  ;;  %v2012_v4 = vand.u32 2147483647, %v2555_v33  ;;  %v415_v35 = vld [vmem:[%s2240_s29 + $0xd0] sm:$0x3] }
  0x68   : > { %v774_v57 = vunpack.c.l.b16 %v646_v39  ;;  %v2014_v7 = vcvt.f32.s32 %v2555_v33  ;;  %v2017_v10 = vand.u32 2147483648, %v2555_v33  ;;  %v433_v18 = vmul.f32 %v2242_v6, %v401_v49 }
  0x69   : > { %v742_v9 = vsel %vm2340_vm10, %v737_v48, %v741_v62  ;;  %v434_v11 = vmul.f32 %v2242_v6, %v402_v60  ;;  %v2008_v21 = vand.u32 2147483647, %v2007_v3  ;;  %vm2579_vm9 = vcmp.lt.f32.partialorder %v2012_v4, 8388608.0 }
  0x6a   : > { %v2577_v13 = vpack.c.b16 %v774_v57, %v773_v61  ;;  %v782_v15 = vunpack.c.l.b16 %v742_v9  ;;  %v2015_v22 = vcvt.s32.f32 %v2014_v7  ;;  %v1908_v24 = vand.u32 2147483647, %v433_v18 }
  0x6b   : > { %v1910_v26 = vcvt.f32.s32 %v433_v18  ;;  %v1913_v27 = vand.u32 2147483648, %v433_v18  ;;  %v2010_v30 = vor.u32 %v2009_v56, %v2008_v21  ;;  %v1916_v31 = vand.u32 2147483647, %v434_v11 }
  0x6c   : > { %1750 = vmatmul.msk.bf16.gmra.mxu0 %vm793_vm6, %v2577_v13  ;;  %v2586_v55 = vpack.c.b16 %v782_v15, %v781_v45  ;;  %v1918_v34 = vcvt.f32.s32 %v434_v11  ;;  %v2016_v36 = vand.u32 2147483647, %v2015_v22  ;;  %vm2589_vm11 = vcmp.lt.f32.partialorder %v1908_v24, 8388608.0 }
  0x6d   : > { %v1911_v43 = vcvt.s32.f32 %v1910_v26  ;;  %v1921_v44 = vand.u32 2147483648, %v434_v11  ;;  %v2011_v46 = vsel %vm2566_vm8, %v2010_v30, %v445_v14  ;;  %vm2597_vm12 = vcmp.lt.f32.partialorder %v1916_v31, 8388608.0 }
  0x6e   : > { %1754 = vmatmul.msk.bf16.gmra.mxu2 %vm793_vm6, %v2586_v55  ;;  %v1919_v47 = vcvt.s32.f32 %v1918_v34  ;;  %v435_v48 = vmul.f32 %v2242_v6, %v403_v28  ;;  %v2018_v53 = vor.u32 %v2017_v10, %v2016_v36  ;;  %v1741_v56 = vclamps-f32 %v2011_v46, 127.0 }
  0x6f   : > { %v1912_v49 = vand.u32 2147483647, %v1911_v43  ;;  %v447_v60 = vmul.f32 %v2242_v6, %v415_v35  ;;  %vm995_vm15 = vcmask 1042432   ;;  %vm996_vm0 = vcmask 1046532  }
  0x70   : > { %v1920_v39 = vand.u32 2147483647, %v1919_v47  ;;  %v1924_v61 = vand.u32 2147483647, %v435_v48  ;;  %v1926_v62 = vcvt.f32.s32 %v435_v48  ;;  %v1929_v57 = vand.u32 2147483648, %v435_v48  ;;  %vm2676_vm1 = vmor %vm995_vm15, %vm996_vm0 }
  0x71   : > { %v2019_v14 = vsel %vm2579_vm9, %v2018_v53, %v2555_v33  ;;  %v2606_v0 = vpack.c.bf16 %v1741_v56, %v1741_v56  ;;  %v1914_v3 = vor.u32 %v1913_v27, %v1912_v49  ;;  %v2020_v4 = vand.u32 2147483647, %v447_v60 }
  0x72   : > { %v1742_v7 = vclamps-f32 %v2019_v14, 127.0  ;;  %v1922_v9 = vor.u32 %v1921_v44, %v1920_v39  ;;  %vm2608_vm13 = vcmp.lt.f32.partialorder %v1924_v61, 8388608.0  ;;  %v1927_v15 = vcvt.s32.f32 %v1926_v62 }
  0x73   : > { %v901_v21 = vunpack.c.l.b16 %v2606_v0  ;;  %v1915_v22 = vsel %vm2589_vm11, %v1914_v3, %v433_v18  ;;  %vm2615_vm14 = vcmp.lt.f32.partialorder %v2020_v4, 8388608.0  ;;  %v2022_v33 = vcvt.f32.s32 %v447_v60 }
  0x74   : > { %v2619_v23 = vpack.c.bf16 %v1742_v7, %v1742_v7  ;;  %v1923_v26 = vsel %vm2597_vm12, %v1922_v9, %v434_v11  ;;  %v1729_v27 = vclamps-f32 %v1915_v22, 127.0  ;;  %v1928_v28 = vand.u32 2147483647, %v1927_v15 }
  0x75   : > { %v1730_v30 = vclamps-f32 %v1923_v26, 127.0  ;;  %v2023_v31 = vcvt.s32.f32 %v2022_v33  ;;  %v2025_v34 = vand.u32 2147483648, %v447_v60  ;;  %v744_v35 = vshrl.u32 %v2606_v0, 16 }
  0x76   : > { %v902_v36 = vunpack.c.l.b16 %v2619_v23  ;;  %v2625_v18 = vpack.c.bf16 %v1729_v27, %v1729_v27  ;;  %v1930_v42 = vor.u32 %v1929_v57, %v1928_v28  ;;  %v747_v43 = vshll.u32 %v2606_v0, 16 }
  0x77   : > { %v2628_v44 = vpack.c.bf16 %v1730_v30, %v1730_v30  ;;  %v2024_v46 = vand.u32 2147483647, %v2023_v31  ;;  %v746_v47 = vrot.slane %v744_v35, 4  ;;  %v753_v11 = vshll.u32 %v2619_v23, 16 }
  0x78   : > { %v910_v45 = vpack.c.b16 %v902_v36, %v901_v21  ;;  %v893_v53 = vunpack.c.l.b16 %v2625_v18  ;;  %v1931_v56 = vsel %vm2608_vm13, %v1930_v42, %v435_v48  ;;  %v648_v49 = vshrl.u32 %v2625_v18, 16 }
  0x79   : > { %v894_v39 = vunpack.c.l.b16 %v2628_v44  ;;  %v1731_v61 = vclamps-f32 %v1931_v56, 127.0  ;;  %v651_v62 = vshll.u32 %v2625_v18, 16  ;;  %v657_v57 = vshll.u32 %v2628_v44, 16  ;;  %v390_v56 = vld [vmem:[%s2240_s29 + $0x8] sm:$0xff] }
  0x7a   : > { %1763 = vmatmul.msk.bf16.gmra.mxu3 %vm793_vm6, %v910_v45  ;;  %v650_v14 = vrot.slane %v648_v49, 4  ;;  %v661_v3 = vshrl.u32 %v2628_v44, 16  ;;  %v2026_v4 = vor.u32 %v2025_v34, %v2024_v46  ;;  %v749_v7 = vrot.slane %v747_v43, 5 }
  0x7b   : > { %v906_v9 = vpack.c.b16 %v894_v39, %v893_v53  ;;  %v2640_v15 = vpack.c.bf16 %v1731_v61, %v1731_v61  ;;  %v653_v48 = vrot.slane %v651_v62, 5  ;;  %v659_v10 = vrot.slane %v657_v57, 5  ;;  %v389_v53 = vld [vmem:[%s2240_s29] sm:$0xff]  ;;  %v391_v61 = vld [vmem:[%s2240_s29 + $0x10] sm:$0x3] }
  0x7c   : > { %v663_v21 = vrot.slane %v661_v3, 4  ;;  %v2027_v22 = vsel %vm2615_vm14, %v2026_v4, %v447_v60  ;;  %v750_v33 = vor.u32 %v749_v7, %v746_v47  ;;  %v755_v26 = vrot.slane %v753_v11, 5 }
  0x7d   : > { %1759 = vmatmul.msk.bf16.gmra.mxu1 %vm793_vm6, %v906_v9  ;;  %v654_v27 = vor.u32 %v653_v48, %v650_v14  ;;  %v667_v28 = vshll.u32 %v2640_v15, 16  ;;  %v1743_v30 = vclamps-f32 %v2027_v22, 127.0  ;;  %v757_v31 = vshrl.u32 %v2619_v23, 16 }
  0x7e   : > { %v664_v34 = vor.u32 %v663_v21, %v659_v10  ;;  %v751_v35 = vrot.slane %v750_v33, 4  ;;  %v421_v4 = vmul.f32 %v2242_v6, %v389_v53  ;;  %v422_v7 = vmul.f32 %v2242_v6, %v390_v56 }
  0x7f   : > { %v655_v36 = vrot.slane %v654_v27, 4  ;;  %v669_v42 = vrot.slane %v667_v28, 5  ;;  %v2647_v43 = vpack.c.bf16 %v1743_v30, %v1743_v30  ;;  %v759_v60 = vrot.slane %v757_v31, 4 }
  0x80   : > { %v665_v24 = vrot.slane %v664_v34, 4  ;;  %v756_v47 = vsel %vm2340_vm10, %v751_v35, %v755_v26  ;;  %v1000_v22 = vrot.slane %v2319_v20, 5  ;;  %v1814_v33 = vcvt.f32.s32 %v421_v4 }
  0x81   : > { %v660_v46 = vsel %vm2340_vm10, %v655_v36, %v659_v10  ;;  %v760_v11 = vor.u32 %v759_v60, %v755_v26  ;;  %v763_v45 = vshll.u32 %v2647_v43, 16  ;;  %v783_v3 = vunpack.c.l.b16 %v756_v47 }
  0x82   : > { %v670_v49 = vsel %vm2340_vm10, %v665_v24, %v669_v42  ;;  %v775_v39 = vunpack.c.l.b16 %v660_v46  ;;  %v423_v10 = vmul.f32 %v2242_v6, %v391_v61  ;;  %v1812_v26 = vand.u32 2147483647, %v421_v4 }
  0x83   : > { %v776_v62 = vunpack.c.l.b16 %v670_v49  ;;  %v761_v57 = vrot.slane %v760_v11, 4  ;;  %v765_v14 = vrot.slane %v763_v45, 5  ;;  %v1822_v27 = vcvt.f32.s32 %v422_v7 }
  0x84   : > { %v1815_v30 = vcvt.s32.f32 %v1814_v33  ;;  %v1817_v31 = vand.u32 2147483648, %v421_v4  ;;  %v1820_v34 = vand.u32 2147483647, %v422_v7  ;;  %v1764_v35 = vrot.slane %v2309_v8, 9 }
  0x85   : > { %v2661_v9 = vpack.c.b16 %v776_v62, %v775_v39  ;;  %v766_v48 = vsel %vm2340_vm10, %v761_v57, %v765_v14  ;;  %v1823_v36 = vcvt.s32.f32 %v1822_v27  ;;  %v1825_v42 = vand.u32 2147483648, %v422_v7 }
  0x86   : > { %v784_v21 = vunpack.c.l.b16 %v766_v48  ;;  %v1830_v60 = vcvt.f32.s32 %v423_v10  ;;  %v1002_v24 = vrot.slane %v1000_v22, 4  ;;  %v1003_v46 = vrot.slane %v2323_v25, 5 }
  0x87   : > { %1751 = vmatmul.msk.bf16.gmra.mxu0 %vm793_vm6, %v2661_v9  ;;  %v1816_v47 = vand.u32 2147483647, %v1815_v30  ;;  %v1828_v11 = vand.u32 2147483647, %v423_v10  ;;  %vm1813_vm2 = vcmp.lt.f32.partialorder %v1812_v26, 8388608.0  ;;  %v1833_v53 = vand.u32 2147483648, %v423_v10 }
  0x88   : > { %v2669_v28 = vpack.c.b16 %v784_v21, %v783_v3  ;;  %v1824_v8 = vand.u32 2147483647, %v1823_v36  ;;  %v1831_v45 = vcvt.s32.f32 %v1830_v60  ;;  %vm1821_vm3 = vcmp.lt.f32.partialorder %v1820_v34, 8388608.0 }
  0x89   : > { %v1818_v56 = vor.u32 %v1817_v31, %v1816_v47  ;;  %v1001_v49 = vsel %vm2676_vm1, %v1764_v35, %v1000_v22  ;;  %v1004_v62 = vsel %vm2676_vm1, %v1002_v24, %v1003_v46  ;;  %vm1829_vm4 = vcmp.lt.f32.partialorder %v1828_v11, 8388608.0 }
  0x8a   : > { %1755 = vmatmul.msk.bf16.gmra.mxu2 %vm793_vm6, %v2669_v28  ;;  %1782 = vmatmul.msk.bf16.vlgmr.msrb.gmra.mxu3 %vm793_vm6, %v2366_v19  ;;  %v1826_v39 = vor.u32 %v1825_v42, %v1824_v8  ;;  %v1832_v61 = vand.u32 2147483647, %v1831_v45  ;;  %v1056_v48 = vunpack.c.l.b16 %v1001_v49  ;;  %v1057_v33 = vunpack.c.l.b16 %v1004_v62 }
  0x8b   : > { %v1819_v25 = vsel %vm1813_vm2, %v1818_v56, %v421_v4  ;;  %v1766_v30 = vrot.slane %v2528_v38, 9  ;;  %v1014_v22 = vrot.slane %v2532_v54, 5  ;;  %v1017_v42 = vrot.slane %v2543_v51, 5 }
  0x8c   : > { %v1827_v57 = vsel %vm1821_vm3, %v1826_v39, %v422_v7  ;;  %v1834_v14 = vor.u32 %v1833_v53, %v1832_v61  ;;  %v1717_v3 = vclamps-f32 %v1819_v25, 127.0  ;;  %v1072_v46 = vpack.c.b16 %v1057_v33, %v1056_v48 }
  0x8d   : > { %1799 = vmatmul.msk.bf16.vlgmr.msrb.gmra.mxu1 %vm793_vm6, %v2481_v40  ;;  %v1718_v21 = vclamps-f32 %v1827_v57, 127.0  ;;  %v1015_v24 = vsel %vm2676_vm1, %v1766_v30, %v1014_v22  ;;  %v1016_v11 = vrot.slane %v1014_v22, 4  ;;  %v1007_v54 = vrot.slane %v2433_v17, 5 }
  0x8e   : > { %v1835_v26 = vsel %vm1829_vm4, %v1834_v14, %v423_v10  ;;  %v541_v27 = vpack.c.bf16 %v1717_v3, %v1717_v3  ;;  %v1060_v53 = vunpack.c.l.b16 %v1015_v24  ;;  %v1765_v3 = vrot.slane %v2429_v16, 9 }
  0x8f   : > { %v1719_v31 = vclamps-f32 %v1835_v26, 127.0  ;;  %v542_v34 = vpack.c.bf16 %v1718_v21, %v1718_v21  ;;  %v1018_v51 = vsel %vm2676_vm1, %v1016_v11, %v1017_v42  ;;  %v1009_v17 = vrot.slane %v1007_v54, 4 }
  0x90   : > { %v1173_v35 = vshrl.u32 %v541_v27, 16  ;;  %v1176_v36 = vshll.u32 %v541_v27, 16  ;;  %v1061_v61 = vunpack.c.l.b16 %v1018_v51  ;;  %v1010_v48 = vrot.slane %v2446_v52, 5 }
  0x91   : > { %v543_v4 = vpack.c.bf16 %v1719_v31, %v1719_v31  ;;  %v1182_v60 = vshll.u32 %v542_v34, 16  ;;  %v1186_v7 = vshrl.u32 %v542_v34, 16  ;;  %v1008_v30 = vsel %vm2676_vm1, %v1765_v3, %v1007_v54 }
  0x92   : > { %v1175_v47 = vrot.slane %v1173_v35, 4  ;;  %v1178_v10 = vrot.slane %v1176_v36, 5  ;;  %v1074_v57 = vpack.c.b16 %v1061_v61, %v1060_v53  ;;  %v1011_v31 = vsel %vm2676_vm1, %v1009_v17, %v1010_v48  ;;  %v418_v48 = vld [vmem:[%s2240_s29 + $0xe8] sm:$0x3] }
  0x93   : > { %v1184_v8 = vrot.slane %v1182_v60, 5  ;;  %v1188_v38 = vrot.slane %v1186_v7, 4  ;;  %v1192_v45 = vshll.u32 %v543_v4, 16  ;;  %v1767_v16 = vrot.slane %v2625_v18, 9 }
  0x94   : > { %v1179_v56 = vor.u32 %v1178_v10, %v1175_v47  ;;  %v1021_v52 = vrot.slane %v2628_v44, 5  ;;  %v1024_v34 = vrot.slane %v2640_v15, 5  ;;  %v1058_v22 = vunpack.c.l.b16 %v1008_v30 }
  0x95   : > { %v1189_v49 = vor.u32 %v1188_v38, %v1184_v8  ;;  %v1194_v39 = vrot.slane %v1192_v45, 5  ;;  %v1059_v35 = vunpack.c.l.b16 %v1011_v31  ;;  %v1028_v10 = vrot.slane %v2305_v5, 5 }
  0x96   : > { %v1180_v62 = vrot.slane %v1179_v56, 4  ;;  %v1022_v36 = vsel %vm2676_vm1, %v1767_v16, %v1021_v52  ;;  %v1023_v42 = vrot.slane %v1021_v52, 4  ;;  %v1031_v53 = vrot.slane %v2349_v50, 5  ;;  %v416_v50 = vld [vmem:[%s2240_s29 + $0xd8] sm:$0xff] }
  0x97   : > { %v1190_v25 = vrot.slane %v1189_v49, 4  ;;  %v1062_v4 = vunpack.c.l.b16 %v1022_v36  ;;  %v1073_v7 = vpack.c.b16 %v1059_v35, %v1058_v22  ;;  %v1030_v45 = vrot.slane %v1028_v10, 4 }
  0x98   : > { %v1185_v14 = vsel %vm2340_vm10, %v1180_v62, %v1184_v8  ;;  %v1025_v60 = vsel %vm2676_vm1, %v1023_v42, %v1024_v34  ;;  %v448_v61 = vmul.f32 %v2242_v6, %v416_v50  ;;  %v1038_v31 = vrot.slane %v2461_v12, 5 }
  0x99   : > { %v1195_v21 = vsel %vm2340_vm10, %v1190_v25, %v1194_v39  ;;  %v1251_v33 = vunpack.c.l.b16 %v1185_v14  ;;  %v1063_v24 = vunpack.c.l.b16 %v1025_v60  ;;  %v1032_v54 = vsel %vm2676_vm1, %v1030_v45, %v1031_v53  ;;  %v417_v39 = vld [vmem:[%s2240_s29 + $0xe0] sm:$0xff]  ;;  %s1710_s29 = sshll.u32 %s370_s25, 3 }
  0x9a   : > { %1773 = vmatmul.msk.bf16.vlgmr.msrb.gmra.mxu2 %vm793_vm6, %v1072_v46  ;;  %1783 = vmatmul.msk.bf16.gmra.mxu3 %vm793_vm6, %v2481_v40  ;;  %v1252_v26 = vunpack.c.l.b16 %v1195_v21  ;;  %v449_v62 = vmul.f32 %v2242_v6, %v417_v39  ;;  %v1035_v25 = vrot.slane %v2411_v2, 5  ;;  %v2030_v14 = vcvt.f32.s32 %v448_v61  ;;  %s2878_s19 = scalar_lea.vmem %s3055_s8, %s1710_s29  ;;  %s2886_s22 = scalar_lea.vmem %s3056_s9, %s1710_s29 }
  0x9b   : > { %v1075_v46 = vpack.c.b16 %v1063_v24, %v1062_v4  ;;  %v450_v21 = vmul.f32 %v2242_v6, %v418_v48  ;;  %v2033_v34 = vand.u32 2147483648, %v448_v61  ;;  %v2028_v6 = vand.u32 2147483647, %v448_v61 }
  0x9c   : > { %v1253_v27 = vpack.c.b16 %v1252_v26, %v1251_v33  ;;  %v2038_v3 = vcvt.f32.s32 %v449_v62  ;;  %v1037_v30 = vrot.slane %v1035_v25, 4  ;;  %v2036_v35 = vand.u32 2147483647, %v449_v62 }
  0x9d   : > { %1800 = vmatmul.msk.bf16.gmra.mxu1 %vm793_vm6, %v2577_v13  ;;  %v2041_v36 = vand.u32 2147483648, %v449_v62  ;;  %v2046_v42 = vcvt.f32.s32 %v450_v21  ;;  %vm2029_vm5 = vcmp.lt.f32.partialorder %v2028_v6, 8388608.0  ;;  %v1771_v41 = vrot.slane %v2606_v0, 9 }
  0x9e   : > { %1790 = vmatmul.msk.bf16.vlgmr.msrb.gmra.mxu0 %vm793_vm6, %v1253_v27  ;;  %v2039_v33 = vcvt.s32.f32 %v2038_v3  ;;  %v1769_v27 = vrot.slane %v2408_v58, 9  ;;  %vm2037_vm7 = vcmp.lt.f32.partialorder %v2036_v35, 8388608.0  ;;  %v1039_v24 = vsel %vm2676_vm1, %v1037_v30, %v1038_v31 }
  0x9f   : > { %v2047_v60 = vcvt.s32.f32 %v2046_v42 }
  0xa0   : > { %v2040_v22 = vand.u32 2147483647, %v2039_v33 }
  0xa2   : > { %v2042_v12 = vor.u32 %v2041_v36, %v2040_v22  ;;  %v1045_v36 = vrot.slane %v2551_v32, 5 }
  0xa8   : > { %v2730_v18 = vpop.f32.mrf.mxu1 }
  0xaa   : > { %1774 = vmatmul.msk.bf16.gmra.mxu2 %vm793_vm6, %v1073_v7  ;;  %1784 = vmatmul.msk.bf16.gmra.mxu3 %vm793_vm6, %v2577_v13  ;;  %v1036_v7 = vsel %vm2676_vm1, %v1769_v27, %v1035_v25 }
  0xab   : > { %v967_v44 = vpop.f32.mrf.mxu3 }
  0xad   : > { %1801 = vmatmul.msk.bf16.gmra.mxu1 %vm793_vm6, %v2661_v9 }
  0xae   : > { %1791 = vmatmul.msk.bf16.gmra.mxu0 %vm793_vm6, %v2366_v19 }
  0xb0   : > { %v2737_v19 = vpop.f32.mrf.mxu1 }
  0xb1   : > { %v2748_v5 = vpop.f32.mrf.mxu0 }
  0xb3   : > { %v969_v11 = vpop.f32.mrf.mxu3 }
  0xb9   : > { %v2765_v26 = vpop.f32.mrf.mxu0 }
  0xba   : > { %1775 = vmatmul.msk.bf16.gmra.mxu2 %vm793_vm6, %v1074_v57  ;;  %1785 = vmatmul.msk.bf16.gmra.mxu3 %vm793_vm6, %v2661_v9 }
  0xbb   : > { %v851_v15 = vpop.f32.mrf.mxu2 }
  0xbc   : > { %v2734_v47 = vadd.f32 %v967_v44, %v851_v15  ;;  %v2049_v44 = vand.u32 2147483648, %v450_v21  ;;  %v2043_v15 = vsel %vm2037_vm7, %v2042_v12, %v449_v62 }
  0xbd   : > { %1802 = vmatmul.msk.bf16.gmra.mxu1 %vm793_vm6, %v2380_v37  ;;  %v1745_v45 = vclamps-f32 %v2043_v15, 127.0 }
  0xbe   : > { %1792 = vmatmul.msk.bf16.gmra.mxu0 %vm793_vm6, %v2481_v40  ;;  %v1768_v40 = vrot.slane %v2302_v1, 9  ;;  %v1065_v1 = vunpack.c.l.b16 %v1032_v54 }
  0xbf   : > { %v569_v39 = vpack.c.bf16 %v1745_v45, %v1745_v45 }
  0xc0   : > { %v1029_v56 = vsel %vm2676_vm1, %v1768_v40, %v1028_v10  ;;  %v2044_v10 = vand.u32 2147483647, %v450_v21 }
  0xc1   : > { %v1064_v51 = vunpack.c.l.b16 %v1029_v56  ;;  %v1319_v3 = vshll.u32 %v569_v39, 16 }
  0xc2   : > { %vm2045_vm8 = vcmp.lt.f32.partialorder %v2044_v10, 8388608.0 }
  0xc3   : > { %v853_v8 = vpop.f32.mrf.mxu2  ;;  %v2756_v49 = vpop.f32.mrf.mxu1  ;;  %v1076_v17 = vpack.c.b16 %v1065_v1, %v1064_v51  ;;  %v1066_v51 = vunpack.c.l.b16 %v1036_v7  ;;  %v1067_v1 = vunpack.c.l.b16 %v1039_v24 }
  0xc4   : > { %v2742_v38 = vadd.f32 %v969_v11, %v853_v8  ;;  %v2048_v11 = vand.u32 2147483647, %v2047_v60 }
  0xc5   : > { %v972_v57 = vpop.f32.mrf.mxu3  ;;  %v1077_v48 = vpack.c.b16 %v1067_v1, %v1066_v51 }
  0xc6   : > { %v2050_v56 = vor.u32 %v2049_v44, %v2048_v11 }
  0xc8   : > { %v2051_v62 = vsel %vm2045_vm8, %v2050_v56, %v450_v21  ;;  %v1770_v21 = vrot.slane %v2491_v59, 9  ;;  %v1049_v56 = vrot.slane %v2619_v23, 5 }
  0xca   : > { %1776 = vmatmul.msk.bf16.gmra.mxu2 %vm793_vm6, %v1075_v46  ;;  %1786 = vmatmul.msk.bf16.gmra.mxu3 %vm793_vm6, %v2380_v37  ;;  %v1050_v23 = vsel %vm2676_vm1, %v1771_v41, %v1049_v56 }
  0xcb   : > { %v2774_v58 = vpop.f32.mrf.mxu1 }
  0xcd   : > { %1803 = vmatmul.msk.bf16.gmra.mxu1 %vm793_vm6, %v2498_v63  ;;  %v974_v40 = vpop.f32.mrf.mxu3 }
  0xce   : > { %1793 = vmatmul.msk.bf16.gmra.mxu0 %vm793_vm6, %v2577_v13  ;;  %v2031_v13 = vcvt.s32.f32 %v2030_v14  ;;  %v1746_v14 = vclamps-f32 %v2051_v62, 127.0  ;;  %v1052_v62 = vrot.slane %v2647_v43, 5 }
  0xd0   : > { %v2032_v2 = vand.u32 2147483647, %v2031_v13  ;;  %v570_v27 = vpack.c.bf16 %v1746_v14, %v1746_v14  ;;  %v1070_v14 = vunpack.c.l.b16 %v1050_v23 }
  0xd2   : > { %v2034_v4 = vor.u32 %v2033_v34, %v2032_v2  ;;  %v1329_v6 = vshll.u32 %v570_v27, 16 }
  0xd4   : > { %v2035_v46 = vsel %vm2029_vm5, %v2034_v4, %v448_v61  ;;  %v2786_v61 = vpop.f32.mrf.mxu0  ;;  %v1331_v60 = vrot.slane %v1329_v6, 5 }
  0xd5   : > { %v1744_v8 = vclamps-f32 %v2035_v46, 127.0 }
  0xd7   : > { %v856_v16 = vpop.f32.mrf.mxu2  ;;  %v568_v54 = vpack.c.bf16 %v1744_v8, %v1744_v8 }
  0xd8   : > { %v2769_v52 = vadd.f32 %v972_v57, %v856_v16  ;;  %v1042_v16 = vrot.slane %v2515_v29, 5 }
  0xd9   : > { %v1310_v25 = vshrl.u32 %v568_v54, 16  ;;  %v1313_v57 = vshll.u32 %v568_v54, 16 }
  0xda   : > { %1777 = vmatmul.msk.bf16.gmra.mxu2 %vm793_vm6, %v1076_v17  ;;  %1787 = vmatmul.msk.bf16.gmra.mxu3 %vm793_vm6, %v2498_v63  ;;  %v1323_v17 = vshrl.u32 %v569_v39, 16  ;;  %v1044_v35 = vrot.slane %v1042_v16, 4  ;;  %v1043_v29 = vsel %vm2676_vm1, %v1770_v21, %v1042_v16  ;;  %v1051_v39 = vrot.slane %v1049_v56, 4 }
  0xdb   : > { %v1312_v13 = vrot.slane %v1310_v25, 4  ;;  %v1315_v30 = vrot.slane %v1313_v57, 5  ;;  %v1068_v32 = vunpack.c.l.b16 %v1043_v29  ;;  %v2860_v29 = vld [vmem:[%s3052_s5] ss:$0 sm:$0xff] }
  0xdc   : > { %v1325_v31 = vrot.slane %v1323_v17, 4  ;;  %v2796_v42 = vpop.f32.mrf.mxu0  ;;  %v1046_v59 = vsel %vm2676_vm1, %v1044_v35, %v1045_v36  ;;  %v1053_v57 = vsel %vm2676_vm1, %v1051_v39, %v1052_v62  ;;  %v953_v62 = vadd.f32 %v2756_v49, %v2786_v61 }
  0xdd   : > { %1804 = vmatmul.msk.bf16.gmra.mxu1 %vm793_vm6, %v2586_v55  ;;  %v1316_v34 = vor.u32 %v1315_v30, %v1312_v13  ;;  %v1069_v46 = vunpack.c.l.b16 %v1046_v59  ;;  %v1071_v0 = vunpack.c.l.b16 %v1053_v57 }
  0xde   : > { %1794 = vmatmul.msk.bf16.gmra.mxu0 %vm793_vm6, %v2661_v9  ;;  %v1321_v9 = vrot.slane %v1319_v3, 5 }
  0xdf   : > { %v858_v53 = vpop.f32.mrf.mxu2  ;;  %v2788_v33 = vpop.f32.mrf.mxu1  ;;  %v1317_v4 = vrot.slane %v1316_v34, 4  ;;  %v1079_v17 = vpack.c.b16 %v1071_v0, %v1070_v14  ;;  %v948_v34 = vadd.f32 %v2730_v18, %v2748_v5  ;;  %v2865_v18 = vld [vmem:[%s3053_s6] ss:$0 sm:$0xff] }
  0xe0   : > { %v2784_v50 = vadd.f32 %v974_v40, %v858_v53  ;;  %v1326_v22 = vor.u32 %v1325_v31, %v1321_v9  ;;  %v1078_v53 = vpack.c.b16 %v1069_v46, %v1068_v32  ;;  %v950_v46 = vadd.f32 %v2737_v19, %v2765_v26 }
  0xe1   : > { %v977_v2 = vpop.f32.mrf.mxu3  ;;  %v1322_v15 = vsel %vm2340_vm10, %v1317_v4, %v1321_v9 }
  0xe2   : > { %v1327_v12 = vrot.slane %v1326_v22, 4  ;;  %v1335_v8 = vunpack.c.l.b16 %v1322_v15  ;;  %v2855_v22 = vld [vmem:[%s3051_s4] ss:$0 sm:$0xff] }
  0xe4   : > { %v1332_v10 = vsel %vm2340_vm10, %v1327_v12, %v1331_v60  ;;  %v2871_v60 = vld [vmem:[%s3054_s7] ss:$0 sm:$0xff] }
  0xe5   : > { %v1336_v40 = vunpack.c.l.b16 %v1332_v10 }
  0xe7   : > { %v2804_v7 = vpop.f32.mrf.mxu1  ;;  %v1337_v54 = vpack.c.b16 %v1336_v40, %v1335_v8 }
  0xe9   : > { %v979_v11 = vpop.f32.mrf.mxu3  ;;  %v2814_v45 = vpop.f32.mrf.mxu0 }
  0xea   : > { %1778 = vmatmul.msk.bf16.gmra.mxu2 %vm793_vm6, %v1077_v48  ;;  %1788 = vmatmul.msk.bf16.gmra.mxu3 %vm793_vm6, %v2586_v55 }
  0xed   : > { %1805 = vmatmul.msk.bf16.gmra.mxu1 %vm793_vm6, %v2669_v28 }
  0xee   : > { %1795 = vmatmul.msk.bf16.gmra.mxu0 %vm793_vm6, %v2380_v37 }
  0xf1   : > { %v861_v24 = vpop.f32.mrf.mxu2 }
  0xf2   : > { %v2808_v44 = vadd.f32 %v977_v2, %v861_v24 }
  0xf9   : > { %v863_v37 = vpop.f32.mrf.mxu2 }
  0xfa   : > { %1779 = vmatmul.msk.bf16.gmra.mxu2 %vm793_vm6, %v1078_v53  ;;  %1789 = vmatmul.msk.bf16.gmra.mxu3 %vm793_vm6, %v2669_v28  ;;  %v2820_v51 = vadd.f32 %v979_v11, %v863_v37  ;;  %v2822_v1 = vpop.f32.mrf.mxu1  ;;  %v2831_v28 = vpop.f32.mrf.mxu0 }
  0xfd   : > { %v982_v25 = vpop.f32.mrf.mxu3  ;;  %1806 = vmatmul.msk.bf16.gmra.mxu1 %vm793_vm6, %v1337_v54 }
  0xfe   : > { %1796 = vmatmul.msk.bf16.gmra.mxu0 %vm793_vm6, %v2498_v63 }
 0x102   : > { %v2835_v3 = vpop.f32.mrf.mxu1 }
 0x104   : > { %v2837_v48 = vpop.f32.mrf.mxu0 }
 0x105   : > { %v984_v43 = vpop.f32.mrf.mxu3 }
 0x10a   : > { %1780 = vmatmul.msk.bf16.gmra.mxu2 %vm793_vm6, %v1079_v17  ;;  %v1353_v13 = vpop.f32.mrf.mxu1 }
 0x10c   : > { %v2845_v9 = vpop.f32.mrf.mxu0 }
 0x10d   : > { %v866_v27 = vpop.f32.mrf.mxu2  ;;  %v1211_v20 = vpop.f32.mrf.mxu3 }
 0x10e   : > { %v2840_v30 = vadd.f32 %v982_v25, %v866_v27  ;;  %1797 = vmatmul.msk.bf16.gmra.mxu0 %vm793_vm6, %v2586_v55 }
 0x112   : > { %v1355_v63 = vpop.f32.mrf.mxu1 }
 0x115   : > { %v868_v31 = vpop.f32.mrf.mxu2  ;;  %v1213_v16 = vpop.f32.mrf.mxu3 }
 0x116   : > { %v2847_v2 = vadd.f32 %v984_v43, %v868_v31 }
 0x11a   : > { %v1358_v21 = vpop.f32.mrf.mxu1 }
 0x11b   : > { %v1269_v35 = vpop.f32.mrf.mxu0 }
 0x11c   : > { %v1270_v4 = vadd.f32 %v1269_v35, %v1211_v20 }
 0x11d   : > { %v1116_v55 = vpop.f32.mrf.mxu2  ;;  %v1216_v6 = vpop.f32.mrf.mxu3 }
 0x11e   : > { %v1156_v36 = vadd.f32 %v1116_v55, %v948_v34  ;;  %v1393_v12 = vadd.f32 %v1353_v13, %v1270_v4 }
 0x120   : > { %v1413_v5 = vmul.f32 %v2855_v22, %v1156_v36  ;;  %v1469_v24 = vmul.f32 %v2865_v18, %v1393_v12 }
 0x122   : > { %v1433_v59 = vadd.f32 %v2860_v29, %v1413_v5  ;;  %v1360_v32 = vpop.f32.mrf.mxu1  ;;  %v1489_v10 = vadd.f32 %v2871_v60, %v1469_v24 }
 0x123   : > { %v1271_v40 = vpop.f32.mrf.mxu0 }
 0x124   : > { %v1449_v15 = vmax.f32 %v1433_v59, 0.0  ;;  %v1505_v56 = vmax.f32 %v1489_v10, 0.0  ;;  %v1272_v37 = vadd.f32 %v1271_v40, %v1213_v16  ;;  %v958_v59 = vadd.f32 %v2788_v33, %v2814_v45 }
 0x125   : > { %v1118_v11 = vpop.f32.mrf.mxu2  ;;  %v1218_v8 = vpop.f32.mrf.mxu3 }
 0x126   : > { %1521 = vst.msk [vmem:[%s2878_s19] sm:$0xff] %vm793_vm6, %v1449_v15  ;;  %v1157_v53 = vadd.f32 %v1118_v11, %v950_v46  ;;  %v1394_v26 = vadd.f32 %v1355_v63, %v1272_v37  ;;  %v955_v63 = vadd.f32 %v2774_v58, %v2796_v42 }
 0x127   : > { %1537 = vst.msk [vmem:[%s2886_s22] sm:$0xff] %vm793_vm6, %v1505_v56 }
 0x128   : > { %v1414_v19 = vmul.f32 %v2855_v22, %v1157_v53  ;;  %v1470_v39 = vmul.f32 %v2865_v18, %v1394_v26 }
 0x12a   : > { %v1434_v54 = vadd.f32 %v2860_v29, %v1414_v19  ;;  %v1363_v41 = vpop.f32.mrf.mxu1  ;;  %v1490_v23 = vadd.f32 %v2871_v60, %v1470_v39  ;;  %v960_v19 = vadd.f32 %v2804_v7, %v2831_v28 }
 0x12b   : > { %v1274_v0 = vpop.f32.mrf.mxu0 }
 0x12c   : > { %v1450_v25 = vmax.f32 %v1434_v54, 0.0  ;;  %v1506_v17 = vmax.f32 %v1490_v23, 0.0  ;;  %v1275_v13 = vadd.f32 %v1274_v0, %v1216_v6 }
 0x12d   : > { %v1121_v57 = vpop.f32.mrf.mxu2  ;;  %v1221_v14 = vpop.f32.mrf.mxu3 }
 0x12e   : > { %1522 = vst.msk [vmem:[%s2878_s19 + $0x8] sm:$0xff] %vm793_vm6, %v1450_v25  ;;  %v1158_v43 = vadd.f32 %v1121_v57, %v953_v62  ;;  %v1395_v20 = vadd.f32 %v1358_v21, %v1275_v13 }
 0x12f   : > { %1538 = vst.msk [vmem:[%s2886_s22 + $0x8] sm:$0xff] %vm793_vm6, %v1506_v17  ;;  %v963_v17 = vadd.f32 %v2822_v1, %v2837_v48 }
 0x130   : > { %v1415_v27 = vmul.f32 %v2855_v22, %v1158_v43  ;;  %v1471_v61 = vmul.f32 %v2865_v18, %v1395_v20 }
 0x132   : > { %v1435_v49 = vadd.f32 %v2860_v29, %v1415_v27  ;;  %v1365_v16 = vpop.f32.mrf.mxu1  ;;  %v1491_v34 = vadd.f32 %v2871_v60, %v1471_v61 }
 0x133   : > { %v1276_v6 = vpop.f32.mrf.mxu0 }
 0x134   : > { %v1451_v31 = vmax.f32 %v1435_v49, 0.0  ;;  %v1507_v4 = vmax.f32 %v1491_v34, 0.0  ;;  %v1277_v21 = vadd.f32 %v1276_v6, %v1218_v8  ;;  %v965_v6 = vadd.f32 %v2835_v3, %v2845_v9 }
 0x135   : > { %v1123_v55 = vpop.f32.mrf.mxu2  ;;  %v1223_v35 = vpop.f32.mrf.mxu3 }
 0x136   : > { %1523 = vst.msk [vmem:[%s2878_s19 + $0x10] sm:$0xff] %vm793_vm6, %v1451_v31  ;;  %v1159_v36 = vadd.f32 %v1123_v55, %v955_v63  ;;  %v1396_v12 = vadd.f32 %v1360_v32, %v1277_v21 }
 0x137   : > { %1539 = vst.msk [vmem:[%s2886_s22 + $0x10] sm:$0xff] %vm793_vm6, %v1507_v4 }
 0x138   : > { %v1416_v5 = vmul.f32 %v2855_v22, %v1159_v36  ;;  %v1472_v42 = vmul.f32 %v2865_v18, %v1396_v12 }
 0x13a   : > { %v1436_v58 = vadd.f32 %v2860_v29, %v1416_v5  ;;  %v1492_v46 = vadd.f32 %v2871_v60, %v1472_v42  ;;  %v1368_v40 = vpop.f32.mrf.mxu1 }
 0x13b   : > { %v1279_v11 = vpop.f32.mrf.mxu0 }
 0x13c   : > { %v1452_v24 = vmax.f32 %v1436_v58, 0.0  ;;  %v1508_v53 = vmax.f32 %v1492_v46, 0.0  ;;  %v1280_v32 = vadd.f32 %v1279_v11, %v1221_v14 }
 0x13d   : > { %v1126_v15 = vpop.f32.mrf.mxu2  ;;  %v1226_v10 = vpop.f32.mrf.mxu3 }
 0x13e   : > { %1524 = vst.msk [vmem:[%s2878_s19 + $0x18] sm:$0xff] %vm793_vm6, %v1452_v24  ;;  %v1160_v8 = vadd.f32 %v1126_v15, %v958_v59  ;;  %v1397_v37 = vadd.f32 %v1363_v41, %v1280_v32 }
 0x13f   : > { %1540 = vst.msk [vmem:[%s2886_s22 + $0x18] sm:$0xff] %vm793_vm6, %v1508_v53 }
 0x140   : > { %v1417_v56 = vmul.f32 %v2855_v22, %v1160_v8  ;;  %v1473_v45 = vmul.f32 %v2865_v18, %v1397_v37 }
 0x142   : > { %v1437_v33 = vadd.f32 %v2860_v29, %v1417_v56  ;;  %v1493_v54 = vadd.f32 %v2871_v60, %v1473_v45  ;;  %v1370_v0 = vpop.f32.mrf.mxu1 }
 0x143   : > { %v1281_v62 = vpop.f32.mrf.mxu0 }
 0x144   : > { %v1453_v26 = vmax.f32 %v1437_v33, 0.0  ;;  %v1509_v57 = vmax.f32 %v1493_v54, 0.0  ;;  %v1282_v14 = vadd.f32 %v1281_v62, %v1223_v35 }
 0x145   : > { %v1128_v39 = vpop.f32.mrf.mxu2  ;;  %v1228_v23 = vpop.f32.mrf.mxu3 }
 0x146   : > { %1525 = vst.msk [vmem:[%s2878_s19 + $0x20] sm:$0xff] %vm793_vm6, %v1453_v26  ;;  %v1161_v25 = vadd.f32 %v1128_v39, %v960_v19  ;;  %v1398_v43 = vadd.f32 %v1365_v16, %v1282_v14 }
 0x147   : > { %1541 = vst.msk [vmem:[%s2886_s22 + $0x20] sm:$0xff] %vm793_vm6, %v1509_v57 }
 0x148   : > { %v1418_v41 = vmul.f32 %v2855_v22, %v1161_v25  ;;  %v1474_v28 = vmul.f32 %v2865_v18, %v1398_v43 }
 0x14a   : > { %v1438_v7 = vadd.f32 %v2860_v29, %v1418_v41  ;;  %v1494_v27 = vadd.f32 %v2871_v60, %v1474_v28  ;;  %v1373_v48 = vpop.f32.mrf.mxu1 }
 0x14b   : > { %v1284_v49 = vpop.f32.mrf.mxu0 }
 0x14c   : > { %v1454_v13 = vmax.f32 %v1438_v7, 0.0  ;;  %v1510_v63 = vmax.f32 %v1494_v27, 0.0  ;;  %v1285_v31 = vadd.f32 %v1284_v49, %v1226_v10 }
 0x14d   : > { %v1131_v20 = vpop.f32.mrf.mxu2  ;;  %v1231_v34 = vpop.f32.mrf.mxu3 }
 0x14e   : > { %1526 = vst.msk [vmem:[%s2878_s19 + $0x28] sm:$0xff] %vm793_vm6, %v1454_v13  ;;  %v1162_v61 = vadd.f32 %v1131_v20, %v963_v17  ;;  %v1399_v55 = vadd.f32 %v1368_v40, %v1285_v31 }
 0x14f   : > { %1542 = vst.msk [vmem:[%s2886_s22 + $0x28] sm:$0xff] %vm793_vm6, %v1510_v63 }
 0x150   : > { %v1419_v16 = vmul.f32 %v2855_v22, %v1162_v61  ;;  %v1475_v35 = vmul.f32 %v2865_v18, %v1399_v55 }
 0x152   : > { %v1439_v1 = vadd.f32 %v2860_v29, %v1419_v16  ;;  %v1495_v4 = vadd.f32 %v2871_v60, %v1475_v35  ;;  %v1375_v10 = vpop.f32.mrf.mxu1 }
 0x153   : > { %v1286_v5 = vpop.f32.mrf.mxu0 }
 0x154   : > { %v1455_v36 = vmax.f32 %v1439_v1, 0.0  ;;  %v1511_v58 = vmax.f32 %v1495_v4, 0.0  ;;  %v1287_v42 = vadd.f32 %v1286_v5, %v1228_v23 }
 0x155   : > { %v1133_v21 = vpop.f32.mrf.mxu2  ;;  %v1233_v3 = vpop.f32.mrf.mxu3 }
 0x156   : > { %1527 = vst.msk [vmem:[%s2878_s19 + $0x30] sm:$0xff] %vm793_vm6, %v1455_v36  ;;  %v1163_v12 = vadd.f32 %v1133_v21, %v965_v6  ;;  %v1400_v24 = vadd.f32 %v1370_v0, %v1287_v42 }
 0x157   : > { %1543 = vst.msk [vmem:[%s2886_s22 + $0x30] sm:$0xff] %vm793_vm6, %v1511_v58 }
 0x158   : > { %v1420_v59 = vmul.f32 %v2855_v22, %v1163_v12  ;;  %v1476_v9 = vmul.f32 %v2865_v18, %v1400_v24 }
 0x15a   : > { %v1440_v46 = vadd.f32 %v2860_v29, %v1420_v59  ;;  %v1496_v11 = vadd.f32 %v2871_v60, %v1476_v9  ;;  %v1378_v23 = vpop.f32.mrf.mxu1 }
 0x15b   : > { %v1289_v40 = vpop.f32.mrf.mxu0 }
 0x15c   : > { %v1456_v15 = vmax.f32 %v1440_v46, 0.0  ;;  %v1512_v32 = vmax.f32 %v1496_v11, 0.0  ;;  %v1290_v56 = vadd.f32 %v1289_v40, %v1231_v34 }
 0x15d   : > { %v1136_v8 = vpop.f32.mrf.mxu2  ;;  %v1236_v54 = vpop.f32.mrf.mxu3 }
 0x15e   : > { %1528 = vst.msk [vmem:[%s2878_s19 + $0x38] sm:$0xff] %vm793_vm6, %v1456_v15  ;;  %v1164_v53 = vadd.f32 %v1136_v8, %v2734_v47  ;;  %v1401_v33 = vadd.f32 %v1373_v48, %v1290_v56 }
 0x15f   : > { %1544 = vst.msk [vmem:[%s2886_s22 + $0x38] sm:$0xff] %vm793_vm6, %v1512_v32 }
 0x160   : > { %v1421_v37 = vmul.f32 %v2855_v22, %v1164_v53  ;;  %v1477_v19 = vmul.f32 %v2865_v18, %v1401_v33 }
 0x162   : > { %v1441_v45 = vadd.f32 %v2860_v29, %v1421_v37  ;;  %v1497_v39 = vadd.f32 %v2871_v60, %v1477_v19  ;;  %v1380_v31 = vpop.f32.mrf.mxu1 }
 0x163   : > { %v1291_v47 = vpop.f32.mrf.mxu0 }
 0x164   : > { %v1457_v26 = vmax.f32 %v1441_v45, 0.0  ;;  %v1513_v57 = vmax.f32 %v1497_v39, 0.0  ;;  %v1292_v14 = vadd.f32 %v1291_v47, %v1233_v3 }
 0x165   : > { %v1138_v62 = vpop.f32.mrf.mxu2  ;;  %v1238_v27 = vpop.f32.mrf.mxu3 }
 0x166   : > { %1529 = vst.msk [vmem:[%s2878_s19 + $0x40] sm:$0xff] %vm793_vm6, %v1457_v26  ;;  %v1165_v25 = vadd.f32 %v1138_v62, %v2742_v38  ;;  %v1402_v0 = vadd.f32 %v1375_v10, %v1292_v14 }
 0x167   : > { %1545 = vst.msk [vmem:[%s2886_s22 + $0x40] sm:$0xff] %vm793_vm6, %v1513_v57 }
 0x168   : > { %v1422_v41 = vmul.f32 %v2855_v22, %v1165_v25  ;;  %v1478_v7 = vmul.f32 %v2865_v18, %v1402_v0 }
 0x16a   : > { %v1442_v43 = vadd.f32 %v2860_v29, %v1422_v41  ;;  %v1498_v17 = vadd.f32 %v2871_v60, %v1478_v7  ;;  %v1383_v42 = vpop.f32.mrf.mxu1 }
 0x16b   : > { %v1294_v38 = vpop.f32.mrf.mxu0 }
 0x16c   : > { %v1458_v28 = vmax.f32 %v1442_v43, 0.0  ;;  %v1514_v49 = vmax.f32 %v1498_v17, 0.0  ;;  %v1295_v61 = vadd.f32 %v1294_v38, %v1236_v54 }
 0x16d   : > { %v1141_v13 = vpop.f32.mrf.mxu2  ;;  %v1241_v21 = vpop.f32.mrf.mxu3 }
 0x16e   : > { %1530 = vst.msk [vmem:[%s2878_s19 + $0x48] sm:$0xff] %vm793_vm6, %v1458_v28  ;;  %v1166_v20 = vadd.f32 %v1141_v13, %v2769_v52  ;;  %v1403_v16 = vadd.f32 %v1378_v23, %v1295_v61 }
 0x16f   : > { %1546 = vst.msk [vmem:[%s2886_s22 + $0x48] sm:$0xff] %vm793_vm6, %v1514_v49 }
 0x170   : > { %v1423_v63 = vmul.f32 %v2855_v22, %v1166_v20  ;;  %v1479_v55 = vmul.f32 %v2865_v18, %v1403_v16 }
 0x172   : > { %v1443_v34 = vadd.f32 %v2860_v29, %v1423_v63  ;;  %v1499_v48 = vadd.f32 %v2871_v60, %v1479_v55  ;;  %v1385_v37 = vpop.f32.mrf.mxu1 }
 0x173   : > { %v1296_v52 = vpop.f32.mrf.mxu0 }
 0x174   : > { %v1459_v1 = vmax.f32 %v1443_v34, 0.0  ;;  %v1515_v36 = vmax.f32 %v1499_v48, 0.0  ;;  %v1297_v4 = vadd.f32 %v1296_v52, %v1238_v27 }
 0x175   : > { %v1143_v35 = vpop.f32.mrf.mxu2  ;;  %v1243_v40 = vpop.f32.mrf.mxu3 }
 0x176   : > { %1531 = vst.msk [vmem:[%s2878_s19 + $0x50] sm:$0xff] %vm793_vm6, %v1459_v1  ;;  %v1167_v6 = vadd.f32 %v1143_v35, %v2784_v50  ;;  %v1404_v12 = vadd.f32 %v1380_v31, %v1297_v4 }
 0x177   : > { %1547 = vst.msk [vmem:[%s2886_s22 + $0x50] sm:$0xff] %vm793_vm6, %v1515_v36 }
 0x178   : > { %v1424_v5 = vmul.f32 %v2855_v22, %v1167_v6  ;;  %v1480_v59 = vmul.f32 %v2865_v18, %v1404_v12 }
 0x17a   : > { %v1444_v58 = vadd.f32 %v2860_v29, %v1424_v5  ;;  %v1500_v46 = vadd.f32 %v2871_v60, %v1480_v59 }
 0x17b   : > { %v1299_v50 = vpop.f32.mrf.mxu0 }
 0x17c   : > { %v1460_v24 = vmax.f32 %v1444_v58, 0.0  ;;  %v1516_v15 = vmax.f32 %v1500_v46, 0.0  ;;  %v1300_v10 = vadd.f32 %v1299_v50, %v1241_v21 }
 0x17d   : > { %v1146_v3 = vpop.f32.mrf.mxu2  ;;  %v1246_v23 = vpop.f32.mrf.mxu3 }
 0x17e   : > { %1532 = vst.msk [vmem:[%s2878_s19 + $0x58] sm:$0xff] %vm793_vm6, %v1460_v24  ;;  %v1168_v9 = vadd.f32 %v1146_v3, %v2808_v44  ;;  %v1405_v8 = vadd.f32 %v1383_v42, %v1300_v10 }
 0x17f   : > { %1548 = vst.msk [vmem:[%s2886_s22 + $0x58] sm:$0xff] %vm793_vm6, %v1516_v15 }
 0x180   : > { %v1425_v11 = vmul.f32 %v2855_v22, %v1168_v9  ;;  %v1481_v32 = vmul.f32 %v2865_v18, %v1405_v8 }
 0x182   : > { %v1445_v53 = vadd.f32 %v2860_v29, %v1425_v11  ;;  %v1501_v33 = vadd.f32 %v2871_v60, %v1481_v32 }
 0x183   : > { %v1301_v44 = vpop.f32.mrf.mxu0 }
 0x184   : > { %v1461_v56 = vmax.f32 %v1445_v53, 0.0  ;;  %v1517_v26 = vmax.f32 %v1501_v33, 0.0  ;;  %v1302_v54 = vadd.f32 %v1301_v44, %v1243_v40 }
 0x185   : > { %v1148_v45 = vpop.f32.mrf.mxu2  ;;  %v1248_v63 = vpop.f32.mrf.mxu3 }
 0x186   : > { %1533 = vst.msk [vmem:[%s2878_s19 + $0x60] sm:$0xff] %vm793_vm6, %v1461_v56  ;;  %v1169_v19 = vadd.f32 %v1148_v45, %v2820_v51  ;;  %v1406_v62 = vadd.f32 %v1385_v37, %v1302_v54  ;;  %v1388_v51 = vpop.f32.mrf.mxu1 }
 0x187   : > { %1549 = vst.msk [vmem:[%s2886_s22 + $0x60] sm:$0xff] %vm793_vm6, %v1517_v26 }
 0x188   : > { %v1426_v39 = vmul.f32 %v2855_v22, %v1169_v19  ;;  %v1482_v25 = vmul.f32 %v2865_v18, %v1406_v62 }
 0x18a   : > { %v1446_v47 = vadd.f32 %v2860_v29, %v1426_v39  ;;  %v1502_v14 = vadd.f32 %v2871_v60, %v1482_v25 }
 0x18b   : > { %v1304_v0 = vpop.f32.mrf.mxu0 }
 0x18c   : > { %v1462_v57 = vmax.f32 %v1446_v47, 0.0  ;;  %v1518_v7 = vmax.f32 %v1502_v14, 0.0  ;;  %v1305_v28 = vadd.f32 %v1304_v0, %v1246_v23 }
 0x18d   : > { %v1151_v41 = vpop.f32.mrf.mxu2 }
 0x18e   : > { %1534 = vst.msk [vmem:[%s2878_s19 + $0x68] sm:$0xff] %vm793_vm6, %v1462_v57  ;;  %v1170_v43 = vadd.f32 %v1151_v41, %v2840_v30  ;;  %v1407_v13 = vadd.f32 %v1388_v51, %v1305_v28  ;;  %v1390_v55 = vpop.f32.mrf.mxu1 }
 0x18f   : > { %1550 = vst.msk [vmem:[%s2886_s22 + $0x68] sm:$0xff] %vm793_vm6, %v1518_v7 }
 0x190   : > { %v1427_v17 = vmul.f32 %v2855_v22, %v1170_v43  ;;  %v1483_v27 = vmul.f32 %v2865_v18, %v1407_v13 }
 0x192   : > { %v1447_v38 = vadd.f32 %v2860_v29, %v1427_v17  ;;  %v1503_v49 = vadd.f32 %v2871_v60, %v1483_v27 }
 0x193   : > { %v1306_v30 = vpop.f32.mrf.mxu0 }
 0x194   : > { %v1463_v20 = vmax.f32 %v1447_v38, 0.0  ;;  %v1519_v16 = vmax.f32 %v1503_v49, 0.0  ;;  %v1307_v34 = vadd.f32 %v1306_v30, %v1248_v63 }
 0x195   : > { %v1153_v61 = vpop.f32.mrf.mxu2 }
 0x196   : > { %1535 = vst.msk [vmem:[%s2878_s19 + $0x70] sm:$0xff] %vm793_vm6, %v1463_v20  ;;  %v1171_v31 = vadd.f32 %v1153_v61, %v2847_v2  ;;  %v1408_v48 = vadd.f32 %v1390_v55, %v1307_v34 }
 0x197   : > { %1551 = vst.msk [vmem:[%s2886_s22 + $0x70] sm:$0xff] %vm793_vm6, %v1519_v16 }
 0x198   : > { %v1428_v1 = vmul.f32 %v2855_v22, %v1171_v31  ;;  %v1484_v52 = vmul.f32 %v2865_v18, %v1408_v48 }
 0x19a   : > { %v1448_v35 = vadd.f32 %v2860_v29, %v1428_v1  ;;  %v1504_v36 = vadd.f32 %v2871_v60, %v1484_v52 }
 0x19c   : > { %v1464_v6 = vmax.f32 %v1448_v35, 0.0  ;;  %v1520_v4 = vmax.f32 %v1504_v36, 0.0 }
 0x19e   : > { %1536 = vst.msk [vmem:[%s2878_s19 + $0x78] sm:$0xff] %vm793_vm6, %v1464_v6 }
 0x19f   : > { %1552 = vst.msk [vmem:[%s2886_s22 + $0x78] sm:$0xff] %vm793_vm6, %v1520_v4 }
 0x1a0 PF: > { %s21_s15 = sadd.s32 1, %s2134_s15   ;;  %s3109_s11 = smov %s2126_s13 }
 0x1a1   : > { %p18_p7 = scmp.ge.s32.totalorder %s21_s15, 6   ;;  %s3110_s12 = smov %s2130_s14 }
 0x1a2   : > { %s3111_s13 = smov %s3114_s0  ;;  %s3112_s14 = smov %s3118_s16 }
 0x1a3   :  { %20 = sbr.rel (!%p18_p7) target bundleno = 3 (0x3), region = 99 }

// kernel: _lambda_.7
= control target key start
LH: loop header
LB: loop body
LE: loop exit
PB: predicated region body
PF: predicated region fallthrough
CT: control target
= control target key end

     0   :  { %s698_s16 = smov 0   ;;  %s700_s17 = smov 0   ;;  %s946_s0 = inlined_call_operand.<no memory space> [shape: f32[1], index: 0, kind: input, shape index: {}]   ;;  %s947_s1 = inlined_call_operand.<no memory space> [shape: f32[1], index: 1, kind: input, shape index: {}]   ;;  %s948_s2 = inlined_call_operand.vmem [shape: f32[2,16,16,16], index: 2, kind: input, shape index: {}]   ;;  %s949_s3 = inlined_call_operand.vmem [shape: f32[2,16,16,16], index: 3, kind: output, shape index: {}]  }
   0x1   :  { %8 = sst [smem:[#allocation2]] %s946_s0  ;;  %s702_s18 = smov 0  }
   0x2   :  { %9 = sst [smem:[#allocation3]] %s947_s1  ;;  %s704_s19 = smov 0  }
   0x3   :  { %s706_s20 = smov 0  }
   0x4 LB: > { %s24_s0 = sadd.s32 1, %s662_s18  ;;  %s27_s1 = sadd.s32 1, %s666_s19  ;;  %s670_s20 = sphi %s706_s20, %s15_s20   ;;  %s666_s19 = sphi %s704_s19, %s981_s19   ;;  %s662_s18 = sphi %s702_s18, %s980_s18   ;;  %s658_s17 = sphi %s700_s17, %s979_s17   ;;  %s654_s16 = sphi %s698_s16, %s978_s16  }
   0x5   : > { %p25_p0 = scmp.ge.s32.totalorder %s24_s0, 2  ;;  %p437_p1 = scmp.ge.s32.totalorder %s670_s20, 1 }
   0x6   : > { %p161_p2 = scmp.lt.s32.totalorder %s670_s20, 5 }
   0x7   : > { %s983_s0 = smov (%p25_p0, %s24_s0), 0  ;;  %s985_s1 = smov (!%p25_p0, %s27_s1), %s666_s19 }
   0x8   : > { %p162_p3 = pnand %p437_p1, %p161_p2  ;;  %p29_p4 = scmp.ge.s32.totalorder %s985_s1, 2 }
   0x9   : > { %s438_s21 = sshll.u32 (!%p162_p3), %s654_s16, 3  ;;  %p196_p5 = scmp.lt.s32.totalorder (!%p162_p3), %s658_s17, 1 }
   0xa   : > { %s987_s1 = smov (%p29_p4, %s985_s1), 0  ;;  %165 = sbr.rel (%p162_p3) target bundleno = 73 (0x49), region = 32 }
   0xb   : > { %p198_p6 = scmp.lt.s32.totalorder (!%p162_p3), %s438_s21, 15  ;;  %s233_s22 = sld [smem:[#allocation3]] (!%p162_p3) }
   0xc   : > { %s299_s24 = sld [smem:[#allocation2]] (!%p162_p3) }
   0xf   : > { %s989_s17 = smov (!%p196_p5, %s658_s17), 1  ;;  %s991_s21 = smov (!%p198_p6, %s438_s21), 15  ;;  %vm317_vm1 = vcmask 130048  }
  0x10   : > { %s440_s23 = sshll.u32 %s989_s17, 5  ;;  %s439_s25 = sshll.u32 %s991_s21, 1 }
  0x11   : > { %s728_s26 = sadd.s32 %s440_s23, %s439_s25  ;;  %v731_v0 = vstv %s233_s22 }
  0x12   : > { %s441_s27 = sshll.u32 %s728_s26, 3  ;;  %v749_v10 = vstv %s299_s24 }
  0x13   : > { %s738_s30 = scalar_lea.vmem %s948_s2, %s441_s27  ;;  %s796_s6 = scalar_lea.vmem %s949_s3, %s441_s27 }
  0x14   : > { %v217_v1 = vld [vmem:[%s738_s30] sm:$0xff]  ;;  %v218_v2 = vld [vmem:[%s738_s30 + $0x8] sm:$0xff]  ;;  %v219_v3 = vld [vmem:[%s738_s30 + $0x10] sm:$0xff] }
  0x15   : > { %v235_v4 = vmul.f32 %v731_v0, %v217_v1  ;;  %v236_v5 = vmul.f32 %v731_v0, %v218_v2  ;;  %v237_v6 = vmul.f32 %v731_v0, %v219_v3  ;;  %v220_v7 = vld [vmem:[%s738_s30 + $0x18] sm:$0xff]  ;;  %v221_v8 = vld [vmem:[%s738_s30 + $0x20] sm:$0xff]  ;;  %v222_v9 = vld [vmem:[%s738_s30 + $0x28] sm:$0xff] }
  0x16   : > { %v238_v11 = vmul.f32 %v731_v0, %v220_v7  ;;  %v753_v12 = vmul.f32 %v731_v0, %v221_v8  ;;  %v756_v16 = vmul.f32 %v731_v0, %v222_v9  ;;  %v223_v49 = vld [vmem:[%s738_s30 + $0x30] sm:$0xff]  ;;  %v224_v54 = vld [vmem:[%s738_s30 + $0x38] sm:$0xff] }
  0x17   : > { %v464_v13 = vand.u32 2147483647, %v235_v4  ;;  %v466_v14 = vcvt.f32.s32 %v235_v4  ;;  %v472_v15 = vand.u32 2147483647, %v236_v5  ;;  %v469_v17 = vand.u32 2147483648, %v235_v4 }
  0x18   : > { %v474_v18 = vcvt.f32.s32 %v236_v5  ;;  %v480_v19 = vand.u32 2147483647, %v237_v6  ;;  %v482_v20 = vcvt.f32.s32 %v237_v6  ;;  %v477_v24 = vand.u32 2147483648, %v236_v5 }
  0x19   : > { %vm758_vm0 = vcmp.lt.f32.partialorder %v464_v13, 8388608.0  ;;  %v467_v22 = vcvt.s32.f32 %v466_v14  ;;  %vm762_vm2 = vcmp.lt.f32.partialorder %v472_v15, 8388608.0  ;;  %v485_v27 = vand.u32 2147483648, %v237_v6  ;;  %v226_v15 = vld [vmem:[%s738_s30 + $0x48] sm:$0xff] }
  0x1a   : > { %v475_v25 = vcvt.s32.f32 %v474_v18  ;;  %v483_v26 = vcvt.s32.f32 %v482_v20  ;;  %v488_v28 = vand.u32 2147483647, %v238_v11  ;;  %vm766_vm3 = vcmp.lt.f32.partialorder %v480_v19, 8388608.0  ;;  %v227_v20 = vld [vmem:[%s738_s30 + $0x50] sm:$0xff] }
  0x1b   : > { %v468_v29 = vand.u32 2147483647, %v467_v22  ;;  %v490_v31 = vcvt.f32.s32 %v238_v11  ;;  %v496_v32 = vand.u32 2147483647, %v753_v12  ;;  %v493_v35 = vand.u32 2147483648, %v238_v11  ;;  %v231_v22 = vld [vmem:[%s738_s30 + $0x70] sm:$0xff] }
  0x1c   : > { %v476_v33 = vand.u32 2147483647, %v475_v25  ;;  %v484_v34 = vand.u32 2147483647, %v483_v26  ;;  %v498_v36 = vcvt.f32.s32 %v753_v12  ;;  %vm772_vm4 = vcmp.lt.f32.partialorder %v488_v28, 8388608.0  ;;  %v228_v25 = vld [vmem:[%s738_s30 + $0x58] sm:$0xff] }
  0x1d   : > { %v470_v37 = vor.u32 %v469_v17, %v468_v29  ;;  %v491_v39 = vcvt.s32.f32 %v490_v31  ;;  %vm776_vm5 = vcmp.lt.f32.partialorder %v496_v32, 8388608.0  ;;  %v501_v44 = vand.u32 2147483648, %v753_v12 }
  0x1e   : > { %v478_v41 = vor.u32 %v477_v24, %v476_v33  ;;  %v486_v42 = vor.u32 %v485_v27, %v484_v34  ;;  %v499_v43 = vcvt.s32.f32 %v498_v36  ;;  %v504_v47 = vand.u32 2147483647, %v756_v16 }
  0x1f   : > { %v471_v45 = vsel %vm758_vm0, %v470_v37, %v235_v4  ;;  %v492_v46 = vand.u32 2147483647, %v491_v39  ;;  %v506_v48 = vcvt.f32.s32 %v756_v16  ;;  %v509_v58 = vand.u32 2147483648, %v756_v16  ;;  %v225_v4 = vld [vmem:[%s738_s30 + $0x40] sm:$0xff] }
  0x20   : > { %v446_v50 = vclamps-f32 %v471_v45, 127.0  ;;  %v479_v51 = vsel %vm762_vm2, %v478_v41, %v236_v5  ;;  %v487_v52 = vsel %vm766_vm3, %v486_v42, %v237_v6  ;;  %v500_v53 = vand.u32 2147483647, %v499_v43 }
  0x21   : > { %v447_v55 = vclamps-f32 %v479_v51, 127.0  ;;  %v448_v56 = vclamps-f32 %v487_v52, 127.0  ;;  %v494_v57 = vor.u32 %v493_v35, %v492_v46  ;;  %v507_v61 = vcvt.s32.f32 %v506_v48 }
  0x22   : > { %v301_v59 = vmul.f32 %v446_v50, %v749_v10  ;;  %v502_v60 = vor.u32 %v501_v44, %v500_v53  ;;  %v241_v62 = vmul.f32 %v731_v0, %v223_v49  ;;  %v242_v3 = vmul.f32 %v731_v0, %v224_v54 }
  0x23   : > { %v302_v63 = vmul.f32 %v447_v55, %v749_v10  ;;  %v303_v1 = vmul.f32 %v448_v56, %v749_v10  ;;  %v495_v2 = vsel %vm772_vm4, %v494_v57, %v238_v11  ;;  %v508_v7 = vand.u32 2147483647, %v507_v61  ;;  %v229_v57 = vld [vmem:[%s738_s30 + $0x60] sm:$0xff] }
  0x24   : > { %318 = vst.msk [vmem:[%s796_s6] sm:$0xff] %vm317_vm1, %v301_v59  ;;  %v449_v5 = vclamps-f32 %v495_v2, 127.0  ;;  %v503_v6 = vsel %vm776_vm5, %v502_v60, %v753_v12  ;;  %v512_v8 = vand.u32 2147483647, %v241_v62  ;;  %vm814_vm6 = vcmp.lt.f32.partialorder %v504_v47, 8388608.0 }
  0x25   : > { %319 = vst.msk [vmem:[%s796_s6 + $0x8] sm:$0xff] %vm317_vm1, %v302_v63  ;;  %v450_v9 = vclamps-f32 %v503_v6, 127.0  ;;  %v514_v13 = vcvt.f32.s32 %v241_v62  ;;  %v520_v14 = vand.u32 2147483647, %v242_v3  ;;  %v510_v12 = vor.u32 %v509_v58, %v508_v7 }
  0x26   : > { %320 = vst.msk [vmem:[%s796_s6 + $0x10] sm:$0xff] %vm317_vm1, %v303_v1  ;;  %v304_v17 = vmul.f32 %v449_v5, %v749_v10  ;;  %v517_v18 = vand.u32 2147483648, %v241_v62  ;;  %v522_v19 = vcvt.f32.s32 %v242_v3  ;;  %vm824_vm7 = vcmp.lt.f32.partialorder %v512_v8, 8388608.0 }
  0x27   : > { %v305_v21 = vmul.f32 %v450_v9, %v749_v10  ;;  %v515_v23 = vcvt.s32.f32 %v514_v13  ;;  %v525_v24 = vand.u32 2147483648, %v242_v3  ;;  %v511_v26 = vsel %vm814_vm6, %v510_v12, %v756_v16 }
  0x28   : > { %321 = vst.msk [vmem:[%s796_s6 + $0x18] sm:$0xff] %vm317_vm1, %v304_v17  ;;  %v523_v27 = vcvt.s32.f32 %v522_v19  ;;  %v243_v28 = vmul.f32 %v731_v0, %v225_v4  ;;  %v244_v29 = vmul.f32 %v731_v0, %v226_v15  ;;  %v451_v30 = vclamps-f32 %v511_v26, 127.0 }
  0x29   : > { %322 = vst.msk [vmem:[%s796_s6 + $0x20] sm:$0xff] %vm317_vm1, %v305_v21  ;;  %v516_v31 = vand.u32 2147483647, %v515_v23  ;;  %vm838_vm8 = vcmp.lt.f32.partialorder %v520_v14, 8388608.0  ;;  %v245_v33 = vmul.f32 %v731_v0, %v227_v20  ;;  %v844_v16 = vmul.f32 %v731_v0, %v228_v25  ;;  %v232_v23 = vld [vmem:[%s738_s30 + $0x78] sm:$0xff] }
  0x2a   : > { %v524_v34 = vand.u32 2147483647, %v523_v27  ;;  %v528_v35 = vand.u32 2147483647, %v243_v28  ;;  %v530_v36 = vcvt.f32.s32 %v243_v28  ;;  %v306_v37 = vmul.f32 %v451_v30, %v749_v10 }
  0x2b   : > { %v518_v38 = vor.u32 %v517_v18, %v516_v31  ;;  %v536_v39 = vand.u32 2147483647, %v244_v29  ;;  %v538_v40 = vcvt.f32.s32 %v244_v29  ;;  %v533_v44 = vand.u32 2147483648, %v243_v28 }
  0x2c   : > { %v526_v41 = vor.u32 %v525_v24, %v524_v34  ;;  %vm847_vm9 = vcmp.lt.f32.partialorder %v528_v35, 8388608.0  ;;  %v531_v43 = vcvt.s32.f32 %v530_v36  ;;  %323 = vst.msk [vmem:[%s796_s6 + $0x28] sm:$0xff] %vm317_vm1, %v306_v37  ;;  %v541_v47 = vand.u32 2147483648, %v244_v29 }
  0x2d   : > { %v519_v45 = vsel %vm824_vm7, %v518_v38, %v241_v62  ;;  %v539_v46 = vcvt.s32.f32 %v538_v40  ;;  %v544_v48 = vand.u32 2147483647, %v245_v33  ;;  %v546_v52 = vcvt.f32.s32 %v245_v33  ;;  %v230_v62 = vld [vmem:[%s738_s30 + $0x68] sm:$0xff] }
  0x2e   : > { %v452_v49 = vclamps-f32 %v519_v45, 127.0  ;;  %v527_v50 = vsel %vm838_vm8, %v526_v41, %v242_v3  ;;  %v532_v51 = vand.u32 2147483647, %v531_v43  ;;  %vm857_vm10 = vcmp.lt.f32.partialorder %v536_v39, 8388608.0 }
  0x2f   : > { %v453_v53 = vclamps-f32 %v527_v50, 127.0  ;;  %v540_v55 = vand.u32 2147483647, %v539_v46  ;;  %vm861_vm11 = vcmp.lt.f32.partialorder %v544_v48, 8388608.0  ;;  %v547_v60 = vcvt.s32.f32 %v546_v52 }
  0x30   : > { %v307_v58 = vmul.f32 %v452_v49, %v749_v10  ;;  %v534_v59 = vor.u32 %v533_v44, %v532_v51  ;;  %v549_v61 = vand.u32 2147483648, %v245_v33  ;;  %v552_v2 = vand.u32 2147483647, %v844_v16 }
  0x31   : > { %v308_v63 = vmul.f32 %v453_v53, %v749_v10  ;;  %v542_v1 = vor.u32 %v541_v47, %v540_v55  ;;  %v554_v3 = vcvt.f32.s32 %v844_v16  ;;  %v548_v5 = vand.u32 2147483647, %v547_v60 }
  0x32   : > { %324 = vst.msk [vmem:[%s796_s6 + $0x30] sm:$0xff] %vm317_vm1, %v307_v58  ;;  %v535_v4 = vsel %vm847_vm9, %v534_v59, %v243_v28  ;;  %v557_v6 = vand.u32 2147483648, %v844_v16  ;;  %v247_v7 = vmul.f32 %v731_v0, %v229_v57  ;;  %v248_v13 = vmul.f32 %v731_v0, %v230_v62 }
  0x33   : > { %325 = vst.msk [vmem:[%s796_s6 + $0x38] sm:$0xff] %vm317_vm1, %v308_v63  ;;  %v454_v8 = vclamps-f32 %v535_v4, 127.0  ;;  %v543_v9 = vsel %vm857_vm10, %v542_v1, %v244_v29  ;;  %v555_v11 = vcvt.s32.f32 %v554_v3  ;;  %v550_v15 = vor.u32 %v549_v61, %v548_v5 }
  0x34   : > { %v455_v14 = vclamps-f32 %v543_v9, 127.0  ;;  %v560_v17 = vand.u32 2147483647, %v247_v7  ;;  %v562_v12 = vcvt.f32.s32 %v247_v7  ;;  %vm883_vm12 = vcmp.lt.f32.partialorder %v552_v2, 8388608.0 }
  0x35   : > { %v309_v18 = vmul.f32 %v454_v8, %v749_v10  ;;  %v556_v20 = vand.u32 2147483647, %v555_v11  ;;  %v565_v21 = vand.u32 2147483648, %v247_v7  ;;  %v551_v25 = vsel %vm861_vm11, %v550_v15, %v245_v33 }
  0x36   : > { %v310_v24 = vmul.f32 %v455_v14, %v749_v10  ;;  %v563_v26 = vcvt.s32.f32 %v562_v12  ;;  %v568_v27 = vand.u32 2147483647, %v248_v13  ;;  %v456_v28 = vclamps-f32 %v551_v25, 127.0 }
  0x37   : > { %326 = vst.msk [vmem:[%s796_s6 + $0x40] sm:$0xff] %vm317_vm1, %v309_v18  ;;  %v558_v29 = vor.u32 %v557_v6, %v556_v20  ;;  %v570_v30 = vcvt.f32.s32 %v248_v13  ;;  %vm896_vm13 = vcmp.lt.f32.partialorder %v560_v17, 8388608.0  ;;  %v249_v34 = vmul.f32 %v731_v0, %v231_v22 }
  0x38   : > { %327 = vst.msk [vmem:[%s796_s6 + $0x48] sm:$0xff] %vm317_vm1, %v310_v24  ;;  %v564_v32 = vand.u32 2147483647, %v563_v26  ;;  %v250_v35 = vmul.f32 %v731_v0, %v232_v23  ;;  %v311_v33 = vmul.f32 %v456_v28, %v749_v10  ;;  %v573_v38 = vand.u32 2147483648, %v248_v13 }
  0x39   : > { %v559_v36 = vsel %vm883_vm12, %v558_v29, %v844_v16  ;;  %v571_v37 = vcvt.s32.f32 %v570_v30  ;;  %vm906_vm14 = vcmp.lt.f32.partialorder %v568_v27, 8388608.0  ;;  %v578_v42 = vcvt.f32.s32 %v249_v34 }
  0x3a   : > { %v457_v39 = vclamps-f32 %v559_v36, 127.0  ;;  %v566_v40 = vor.u32 %v565_v21, %v564_v32  ;;  %328 = vst.msk [vmem:[%s796_s6 + $0x50] sm:$0xff] %vm317_vm1, %v311_v33  ;;  %v576_v0 = vand.u32 2147483647, %v249_v34  ;;  %v581_v44 = vand.u32 2147483648, %v249_v34 }
  0x3b   : > { %v572_v43 = vand.u32 2147483647, %v571_v37  ;;  %v586_v45 = vcvt.f32.s32 %v250_v35  ;;  %v579_v47 = vcvt.s32.f32 %v578_v42  ;;  %v584_v48 = vand.u32 2147483647, %v250_v35 }
  0x3c   : > { %v312_v46 = vmul.f32 %v457_v39, %v749_v10  ;;  %v567_v16 = vsel %vm896_vm13, %v566_v40, %v247_v7  ;;  %v589_v53 = vand.u32 2147483648, %v250_v35  ;;  %vm577_vm15 = vcmp.lt.f32.partialorder %v576_v0, 8388608.0 }
  0x3d   : > { %v458_v49 = vclamps-f32 %v567_v16, 127.0  ;;  %v574_v50 = vor.u32 %v573_v38, %v572_v43  ;;  %v587_v51 = vcvt.s32.f32 %v586_v45  ;;  %v580_v52 = vand.u32 2147483647, %v579_v47 }
  0x3e   : > { %329 = vst.msk [vmem:[%s796_s6 + $0x58] sm:$0xff] %vm317_vm1, %v312_v46  ;;  %vm585_vm0 = vcmp.lt.f32.partialorder %v584_v48, 8388608.0 }
  0x3f   : > { %v313_v54 = vmul.f32 %v458_v49, %v749_v10  ;;  %v575_v55 = vsel %vm906_vm14, %v574_v50, %v248_v13  ;;  %v588_v56 = vand.u32 2147483647, %v587_v51  ;;  %v582_v58 = vor.u32 %v581_v44, %v580_v52 }
  0x40   : > { %v459_v57 = vclamps-f32 %v575_v55, 127.0 }
  0x41   : > { %330 = vst.msk [vmem:[%s796_s6 + $0x60] sm:$0xff] %vm317_vm1, %v313_v54  ;;  %v590_v59 = vor.u32 %v589_v53, %v588_v56  ;;  %v583_v61 = vsel %vm577_vm15, %v582_v58, %v249_v34 }
  0x42   : > { %v314_v60 = vmul.f32 %v459_v57, %v749_v10  ;;  %v460_v62 = vclamps-f32 %v583_v61, 127.0 }
  0x43   : > { %v591_v63 = vsel %vm585_vm0, %v590_v59, %v250_v35 }
  0x44   : > { %331 = vst.msk [vmem:[%s796_s6 + $0x68] sm:$0xff] %vm317_vm1, %v314_v60  ;;  %v461_v1 = vclamps-f32 %v591_v63, 127.0  ;;  %v315_v2 = vmul.f32 %v460_v62, %v749_v10 }
  0x46   : > { %v316_v3 = vmul.f32 %v461_v1, %v749_v10  ;;  %332 = vst.msk [vmem:[%s796_s6 + $0x70] sm:$0xff] %vm317_vm1, %v315_v2 }
  0x48   : > { %333 = vst.msk [vmem:[%s796_s6 + $0x78] sm:$0xff] %vm317_vm1, %v316_v3 }
  0x49 PF: > { %s15_s20 = sadd.s32 1, %s670_s20   ;;  %s978_s16 = smov %s662_s18 }
  0x4a   : > { %p12_p7 = scmp.ge.s32.totalorder %s15_s20, 6   ;;  %s979_s17 = smov %s666_s19 }
  0x4b   : > { %s980_s18 = smov %s983_s0  ;;  %s981_s19 = smov %s987_s1 }
  0x4c   :  { %14 = sbr.rel (!%p12_p7) target bundleno = 4 (0x4), region = 62 }

</bundles_post_ra>
